<compile_context>
chip_gen: v7x
topology: tpu7x:2x2x1
jax: 0.10.0
libtpu: 0.0.40
codegen_flags: <defaults>
</compile_context>

<pallas_src>
import functools

import jax
import jax.numpy as jnp
from jax import lax
from jax.experimental import pallas as pl
from jax.experimental.pallas import tpu as pltpu

LANE = 128  # TPU lane width: feature axes are zero-padded to this.


def _vmem_spec():
    return pl.BlockSpec(memory_space=pltpu.MemorySpace.VMEM)


# ----------------------------- Pallas kernel --------------------------------

def encoder3_kernel(adj_ref, x_ref, ma_ref, mb_ref, sel_ref,
                    w11_ref, b11_ref, w12_ref, b12_ref,
                    w21_ref, b21_ref, w22_ref, b22_ref,
                    p_ref,
                    g0_ref, g1_ref, g2_ref, gated_ref, score_ref,
                    buf_ref):
    """Fused 2-layer GIN encoder over three augmentation variants.

    Variants: v0 = x (unmasked), v1 = x * mA, v2 = x * mB (shared adj/weights).
    Outputs:
      g0/g1/g2 : (G, H)  global-add-pool readout per variant.
      gated    : (N, H)  z0 * tanh(score)   (TopK gating of the unmasked z).
      score    : (1, N)  lane-dense TopK scores of the unmasked z.
    """
    n = adj_ref.shape[0]

    adj_b = adj_ref[...].astype(jnp.bfloat16)     # 0/1 (+I) entries: exact in bf16
    x_b = x_ref[...].astype(jnp.bfloat16)

    # ---- GIN layer 1 -------------------------------------------------------
    # The per-feature mask commutes with (A+I)@X, so aggregate once, mask after.
    agg0 = jnp.dot(adj_b, x_b, preferred_element_type=jnp.float32)      # (n, F)
    buf_ref[0:n, :] = agg0
    buf_ref[n:2 * n, :] = agg0 * ma_ref[...]
    buf_ref[2 * n:3 * n, :] = agg0 * mb_ref[...]

    # Shared MLP applied to all three variants as one (3n, F) contraction.
    h = jnp.dot(buf_ref[...].astype(jnp.bfloat16),
                w11_ref[...].astype(jnp.bfloat16),
                preferred_element_type=jnp.float32)
    h = jnp.maximum(h + b11_ref[...], 0.0)
    h = jnp.dot(h.astype(jnp.bfloat16), w12_ref[...].astype(jnp.bfloat16),
                preferred_element_type=jnp.float32)
    h = jnp.maximum(h + b12_ref[...], 0.0)                              # (3n, H)

    # ---- GIN layer 2 -------------------------------------------------------
    h_b = h.astype(jnp.bfloat16)
    for v in range(3):                      # inputs differ per variant here
        buf_ref[v * n:(v + 1) * n, :] = jnp.dot(
            adj_b, h_b[v * n:(v + 1) * n, :], preferred_element_type=jnp.float32)

    z = jnp.dot(buf_ref[...].astype(jnp.bfloat16),
                w21_ref[...].astype(jnp.bfloat16),
                preferred_element_type=jnp.float32)
    z = jnp.maximum(z + b21_ref[...], 0.0)
    z = jnp.dot(z.astype(jnp.bfloat16), w22_ref[...].astype(jnp.bfloat16),
                preferred_element_type=jnp.float32)
    z = jnp.maximum(z + b22_ref[...], 0.0)                              # (3n, H)

    # ---- global_add_pool readout per variant (one-hot selector matmul) -----
    sel_b = sel_ref[...].astype(jnp.bfloat16)
    z_b = z.astype(jnp.bfloat16)
    for v, g_out in enumerate((g0_ref, g1_ref, g2_ref)):
        g_out[...] = jnp.dot(sel_b, z_b[v * n:(v + 1) * n, :],
                             preferred_element_type=jnp.float32)

    # ---- TopK scoring / gating tail (unmasked variant only) ----------------
    z0 = z[0:n, :]                                                      # (n, H) f32
    p = p_ref[...]                                                      # (1, H), ||p|| = 1
    score_col = jnp.dot(z0, p.T, preferred_element_type=jnp.float32)    # (n, 1)
    gated_ref[...] = z0 * jnp.tanh(score_col)
    # lane-dense (1, n) score row for the host-side top-k selection
    score_ref[...] = lax.dot_general(p, z0, (((1,), (1,)), ((), ())),
                                     preferred_element_type=jnp.float32)


# ------------------------------ wrappers (JAX) -------------------------------

def fused_encoder(adj, x, m_a, m_b, sel, params, p_hat):
    """One pallas_call: 2 GIN layers + readouts for 3 variants + TopK tail."""
    n = x.shape[0]
    gc = sel.shape[0]
    hp = params[0][2].shape[1]          # lane-padded hidden width (= LANE)
    (w11, b11, w12, b12), (w21, b21, w22, b22) = params
    return pl.pallas_call(
        encoder3_kernel,
        out_shape=(
            jax.ShapeDtypeStruct((gc, hp), jnp.float32),   # g  (unmasked)
            jax.ShapeDtypeStruct((gc, hp), jnp.float32),   # g  (mask A)
            jax.ShapeDtypeStruct((gc, hp), jnp.float32),   # g  (mask B)
            jax.ShapeDtypeStruct((n, hp), jnp.float32),    # gated z (unmasked)
            jax.ShapeDtypeStruct((1, n), jnp.float32),     # lane-dense scores
        ),
        in_specs=[_vmem_spec()] * 14,
        out_specs=(_vmem_spec(),) * 5,
        scratch_shapes=[pltpu.VMEM((3 * n, hp), jnp.float32)],
    )(adj, x, m_a, m_b, sel, w11, b11, w12, b12, w21, b21, w22, b22, p_hat)


def topk_select(score_row, gated, adj, num_graphs, nodes_per_graph, ratio=0.5):
    """TopK pooling selection; argsort + gathers stay in XLA at these sizes."""
    k = max(1, int(ratio * nodes_per_graph))
    score_g = score_row[0].reshape(num_graphs, nodes_per_graph)
    idx_local = jnp.argsort(-score_g, axis=1)[:, :k]                    # (G, k)
    offsets = (jnp.arange(num_graphs) * nodes_per_graph)[:, None]
    perm = (idx_local + offsets).reshape(-1)                            # (G*k,)
    x_p = gated[perm]                                                   # gated features
    n = adj.shape[0]
    adj_no_i = adj - jnp.eye(n, dtype=adj.dtype)
    adj_p = adj_no_i[perm][:, perm] + jnp.eye(perm.shape[0], dtype=adj.dtype)
    sel_p = jnp.repeat(jnp.eye(num_graphs, dtype=jnp.float32), k, axis=1)
    return x_p, adj_p, sel_p, k


@functools.partial(jax.jit, static_argnums=(4, 5, 6))
def hdgcl_forward(params, x, adj, sel, num_graphs, nodes_per_graph, hidden):
    (enc, sub1, sub2, p1_hat, p2_hat,
     m1a, m1b, m2a, m2b, m3a, m3b) = params
    gc = num_graphs

    # stage 0: graph_encoder on (x, aug1(x), aug1(x)); pool_1 scoring fused in tail.
    g, g1, g2, gated0, score0 = fused_encoder(adj, x, m1a, m1b, sel, enc, p1_hat)

    # pool_1 (index selection + gathers stay in XLA; tiny at these sizes).
    # TODO(synk): for large N, scalar-prefetch `perm` (PrefetchScalarGridSpec)
    # and gather rows inside the next encoder kernel instead of materializing
    # gated[perm] / adj[perm][:, perm] as new HBM arrays.
    x_1, adj_1, sel_1, k1 = topk_select(score0, gated0, adj, gc, nodes_per_graph)

    # stage 1: sub_encoder1 on (x_1, aug2(x_1), aug2(x_1)); pool_2 scoring fused.
    g3, g4, g5, gated1, score1 = fused_encoder(adj_1, x_1, m2a, m2b, sel_1, sub1, p2_hat)

    x_2, adj_2, sel_2, _ = topk_select(score1, gated1, adj_1, gc, k1)

    # stage 2: sub_encoder2 on (x_2, aug2(x_2), aug2(x_2)); scoring outputs unused.
    g6, g7, g8, _, _ = fused_encoder(adj_2, x_2, m3a, m3b, sel_2, sub2, p2_hat)

    outs = (g, g3, g6, g1, g2, g4, g5, g7, g8)
    return tuple(o[:, :hidden] for o in outs)   # trim lane padding back to HIDDEN


# --------------------------- parameter construction --------------------------

def make_encoder_params(key, fin, hidden, num_layers=2):
    params = []
    dims = [fin] + [hidden] * num_layers
    for i in range(num_layers):
        key, k1, k2 = jax.random.split(key, 3)
        w1 = jax.random.normal(k1, (dims[i], hidden), jnp.float32) / jnp.sqrt(dims[i] * 1.0)
        b1 = jnp.zeros((1, hidden), jnp.float32)
        w2 = jax.random.normal(k2, (hidden, hidden), jnp.float32) / jnp.sqrt(hidden * 1.0)
        b2 = jnp.zeros((1, hidden), jnp.float32)
        params.append((w1, b1, w2, b2))
    return params


def pad2(a, rows, cols):
    return jnp.pad(a, ((0, rows - a.shape[0]), (0, cols - a.shape[1])))


def pad_encoder_params(params, lane=LANE):
    """Zero-pad GIN MLP weights/biases to the 128-lane width (exact)."""
    out = []
    for (w1, b1, w2, b2) in params:
        out.append((pad2(w1, lane, lane), pad2(b1, 1, lane),
                    pad2(w2, lane, lane), pad2(b2, 1, lane)))
    return out


# --------------------------------- main --------------------------------------

if __name__ == "__main__":
    key = jax.random.PRNGKey(0)

    num_graphs = 2
    nodes_per_graph = 16
    N = num_graphs * nodes_per_graph
    F_IN = 8
    HIDDEN = 32

    # deterministic ring graph per graph in the batch
    src, dst = [], []
    for gidx in range(num_graphs):
        for i in range(nodes_per_graph):
            a = gidx * nodes_per_graph + i
            b = gidx * nodes_per_graph + (i + 1) % nodes_per_graph
            src += [a, b]
            dst += [b, a]
    edge_index = jnp.array([src, dst], dtype=jnp.int32)
    adj = jnp.zeros((N, N), jnp.float32).at[edge_index[0], edge_index[1]].set(1.0)
    adj = adj + jnp.eye(N, dtype=jnp.float32)            # (A + I) for GIN aggregation
    sel = jnp.repeat(jnp.eye(num_graphs, dtype=jnp.float32), nodes_per_graph, axis=1)

    key, kx = jax.random.split(key)
    x = jax.random.normal(kx, (N, F_IN), jnp.float32)
    x_pad = jnp.pad(x, ((0, 0), (0, LANE - F_IN)))       # lane-dense node features

    # parameters (deterministic), zero-padded to the 128-lane width
    key, ke, ks1, ks2, kp1, kp2 = jax.random.split(key, 6)
    enc = pad_encoder_params(make_encoder_params(ke, F_IN, HIDDEN))
    sub1 = pad_encoder_params(make_encoder_params(ks1, HIDDEN, HIDDEN))
    sub2 = pad_encoder_params(make_encoder_params(ks2, HIDDEN, HIDDEN))
    p1 = jax.random.normal(kp1, (1, HIDDEN), jnp.float32)
    p2 = jax.random.normal(kp2, (1, HIDDEN), jnp.float32)
    # hoist the TopK score normalization out of the kernels: p_hat = p / ||p||
    p1_hat = pad2(p1 / jnp.linalg.norm(p1), 1, LANE)
    p2_hat = pad2(p2 / jnp.linalg.norm(p2), 1, LANE)

    # deterministic augmentation masks (feature masking, pf = 0.3), lane-padded
    def mk_mask(k, dim, pf=0.3):
        m = (jax.random.uniform(k, (1, dim)) > pf).astype(jnp.float32)
        return pad2(m, 1, LANE)

    key, *mkeys = jax.random.split(key, 7)
    m1a = mk_mask(mkeys[0], F_IN)
    m1b = mk_mask(mkeys[1], F_IN)
    m2a = mk_mask(mkeys[2], HIDDEN)
    m2b = mk_mask(mkeys[3], HIDDEN)
    m3a = mk_mask(mkeys[4], HIDDEN)
    m3b = mk_mask(mkeys[5], HIDDEN)

    params = (enc, sub1, sub2, p1_hat, p2_hat, m1a, m1b, m2a, m2b, m3a, m3b)

    outs = hdgcl_forward(params, x_pad, adj, sel, num_graphs, nodes_per_graph, HIDDEN)
    outs = jax.block_until_ready(outs)

    assert len(outs) == 9
    for o in outs:
        assert o.shape == (num_graphs, HIDDEN)
        assert bool(jnp.all(jnp.isfinite(o)))

    print("KERNEL_OK")
</pallas_src>

<mosaic_0001>
module attributes {stable_mosaic.version = 11 : i64} {
  func.func @encoder3_kernel(%arg0: memref<32x32xf32, #tpu.memory_space<vmem>>, %arg1: memref<32x128xf32, #tpu.memory_space<vmem>>, %arg2: memref<1x128xf32, #tpu.memory_space<vmem>>, %arg3: memref<1x128xf32, #tpu.memory_space<vmem>>, %arg4: memref<2x32xf32, #tpu.memory_space<vmem>>, %arg5: memref<128x128xf32, #tpu.memory_space<vmem>>, %arg6: memref<1x128xf32, #tpu.memory_space<vmem>>, %arg7: memref<128x128xf32, #tpu.memory_space<vmem>>, %arg8: memref<1x128xf32, #tpu.memory_space<vmem>>, %arg9: memref<128x128xf32, #tpu.memory_space<vmem>>, %arg10: memref<1x128xf32, #tpu.memory_space<vmem>>, %arg11: memref<128x128xf32, #tpu.memory_space<vmem>>, %arg12: memref<1x128xf32, #tpu.memory_space<vmem>>, %arg13: memref<1x128xf32, #tpu.memory_space<vmem>>, %arg14: memref<2x128xf32, #tpu.memory_space<vmem>>, %arg15: memref<2x128xf32, #tpu.memory_space<vmem>>, %arg16: memref<2x128xf32, #tpu.memory_space<vmem>>, %arg17: memref<32x128xf32, #tpu.memory_space<vmem>>, %arg18: memref<1x32xf32, #tpu.memory_space<vmem>>, %arg19: memref<96x128xf32, #tpu.memory_space<vmem>>) attributes {dimension_semantics = [], scalar_prefetch = 0 : i64, scratch_operands = 1 : i64, tpu.core_type = #tpu.core_type<tc>} {
    %c0 = arith.constant 0 : index
    %c0_0 = arith.constant 0 : index
    %0 = vector.load %arg0[%c0, %c0_0] : memref<32x32xf32, #tpu.memory_space<vmem>>, vector<32x32xf32>
    %1 = arith.truncf %0 : vector<32x32xf32> to vector<32x32xbf16>
    %c0_1 = arith.constant 0 : index
    %c0_2 = arith.constant 0 : index
    %2 = vector.load %arg1[%c0_1, %c0_2] : memref<32x128xf32, #tpu.memory_space<vmem>>, vector<32x128xf32>
    %3 = arith.truncf %2 : vector<32x128xf32> to vector<32x128xbf16>
    %cst = arith.constant dense<0.000000e+00> : vector<32x128xf32>
    %4 = tpu.matmul %1, %3, %cst {dimension_numbers = #tpu.dot_dimension_numbers<[1], [0], [0], [1], [0, 0, 1, 1], [], []>} : vector<32x32xbf16>, vector<32x128xbf16>, vector<32x128xf32> -> vector<32x128xf32>
    %c0_3 = arith.constant 0 : index
    %c0_4 = arith.constant 0 : index
    %5 = vector.load %arg19[%c0_3, %c0_4] : memref<96x128xf32, #tpu.memory_space<vmem>>, vector<32x128xf32>
    tpu.vector_store %arg19[%c0_3, %c0_4], %4 {strides = array<i32>} : memref<96x128xf32, #tpu.memory_space<vmem>>, vector<32x128xf32>,
    %c0_5 = arith.constant 0 : index
    %c0_6 = arith.constant 0 : index
    %6 = vector.load %arg2[%c0_5, %c0_6] : memref<1x128xf32, #tpu.memory_space<vmem>>, vector<1x128xf32>
    %7 = vector.broadcast %6 : vector<1x128xf32> to vector<32x128xf32>
    %8 = arith.mulf %4, %7 : vector<32x128xf32>
    %c32 = arith.constant 32 : index
    %c0_7 = arith.constant 0 : index
    %9 = vector.load %arg19[%c32, %c0_7] : memref<96x128xf32, #tpu.memory_space<vmem>>, vector<32x128xf32>
    tpu.vector_store %arg19[%c32, %c0_7], %8 {strides = array<i32>} : memref<96x128xf32, #tpu.memory_space<vmem>>, vector<32x128xf32>,
    %c0_8 = arith.constant 0 : index
    %c0_9 = arith.constant 0 : index
    %10 = vector.load %arg3[%c0_8, %c0_9] : memref<1x128xf32, #tpu.memory_space<vmem>>, vector<1x128xf32>
    %11 = vector.broadcast %10 : vector<1x128xf32> to vector<32x128xf32>
    %12 = arith.mulf %4, %11 : vector<32x128xf32>
    %c64 = arith.constant 64 : index
    %c0_10 = arith.constant 0 : index
    %13 = vector.load %arg19[%c64, %c0_10] : memref<96x128xf32, #tpu.memory_space<vmem>>, vector<32x128xf32>
    tpu.vector_store %arg19[%c64, %c0_10], %12 {strides = array<i32>} : memref<96x128xf32, #tpu.memory_space<vmem>>, vector<32x128xf32>,
    %c0_11 = arith.constant 0 : index
    %c0_12 = arith.constant 0 : index
    %14 = vector.load %arg19[%c0_11, %c0_12] : memref<96x128xf32, #tpu.memory_space<vmem>>, vector<96x128xf32>
    %15 = arith.truncf %14 : vector<96x128xf32> to vector<96x128xbf16>
    %c0_13 = arith.constant 0 : index
    %c0_14 = arith.constant 0 : index
    %16 = vector.load %arg5[%c0_13, %c0_14] : memref<128x128xf32, #tpu.memory_space<vmem>>, vector<128x128xf32>
    %17 = arith.truncf %16 : vector<128x128xf32> to vector<128x128xbf16>
    %cst_15 = arith.constant dense<0.000000e+00> : vector<96x128xf32>
    %18 = tpu.matmul %15, %17, %cst_15 {dimension_numbers = #tpu.dot_dimension_numbers<[1], [0], [0], [1], [0, 0, 1, 1], [], []>} : vector<96x128xbf16>, vector<128x128xbf16>, vector<96x128xf32> -> vector<96x128xf32>
    %c0_16 = arith.constant 0 : index
    %c0_17 = arith.constant 0 : index
    %19 = vector.load %arg6[%c0_16, %c0_17] : memref<1x128xf32, #tpu.memory_space<vmem>>, vector<1x128xf32>
    %20 = vector.broadcast %19 : vector<1x128xf32> to vector<96x128xf32>
    %21 = arith.addf %18, %20 : vector<96x128xf32>
    %cst_18 = arith.constant 0.000000e+00 : f32
    %22 = vector.broadcast %cst_18 : f32 to vector<96x128xf32>
    %23 = arith.maximumf %21, %22 : vector<96x128xf32>
    %24 = arith.truncf %23 : vector<96x128xf32> to vector<96x128xbf16>
    %c0_19 = arith.constant 0 : index
    %c0_20 = arith.constant 0 : index
    %25 = vector.load %arg7[%c0_19, %c0_20] : memref<128x128xf32, #tpu.memory_space<vmem>>, vector<128x128xf32>
    %26 = arith.truncf %25 : vector<128x128xf32> to vector<128x128xbf16>
    %cst_21 = arith.constant dense<0.000000e+00> : vector<96x128xf32>
    %27 = tpu.matmul %24, %26, %cst_21 {dimension_numbers = #tpu.dot_dimension_numbers<[1], [0], [0], [1], [0, 0, 1, 1], [], []>} : vector<96x128xbf16>, vector<128x128xbf16>, vector<96x128xf32> -> vector<96x128xf32>
    %c0_22 = arith.constant 0 : index
    %c0_23 = arith.constant 0 : index
    %28 = vector.load %arg8[%c0_22, %c0_23] : memref<1x128xf32, #tpu.memory_space<vmem>>, vector<1x128xf32>
    %29 = vector.broadcast %28 : vector<1x128xf32> to vector<96x128xf32>
    %30 = arith.addf %27, %29 : vector<96x128xf32>
    %cst_24 = arith.constant 0.000000e+00 : f32
    %31 = vector.broadcast %cst_24 : f32 to vector<96x128xf32>
    %32 = arith.maximumf %30, %31 : vector<96x128xf32>
    %33 = arith.truncf %32 : vector<96x128xf32> to vector<96x128xbf16>
    %34 = vector.extract_strided_slice %33 {offsets = [0, 0], sizes = [32, 128], strides = [1, 1]} : vector<96x128xbf16> to vector<32x128xbf16>
    %cst_25 = arith.constant dense<0.000000e+00> : vector<32x128xf32>
    %35 = tpu.matmul %1, %34, %cst_25 {dimension_numbers = #tpu.dot_dimension_numbers<[1], [0], [0], [1], [0, 0, 1, 1], [], []>} : vector<32x32xbf16>, vector<32x128xbf16>, vector<32x128xf32> -> vector<32x128xf32>
    %c0_26 = arith.constant 0 : index
    %c0_27 = arith.constant 0 : index
    %36 = vector.load %arg19[%c0_26, %c0_27] : memref<96x128xf32, #tpu.memory_space<vmem>>, vector<32x128xf32>
    tpu.vector_store %arg19[%c0_26, %c0_27], %35 {strides = array<i32>} : memref<96x128xf32, #tpu.memory_space<vmem>>, vector<32x128xf32>,
    %37 = vector.extract_strided_slice %33 {offsets = [32, 0], sizes = [32, 128], strides = [1, 1]} : vector<96x128xbf16> to vector<32x128xbf16>
    %cst_28 = arith.constant dense<0.000000e+00> : vector<32x128xf32>
    %38 = tpu.matmul %1, %37, %cst_28 {dimension_numbers = #tpu.dot_dimension_numbers<[1], [0], [0], [1], [0, 0, 1, 1], [], []>} : vector<32x32xbf16>, vector<32x128xbf16>, vector<32x128xf32> -> vector<32x128xf32>
    %c32_29 = arith.constant 32 : index
    %c0_30 = arith.constant 0 : index
    %39 = vector.load %arg19[%c32_29, %c0_30] : memref<96x128xf32, #tpu.memory_space<vmem>>, vector<32x128xf32>
    tpu.vector_store %arg19[%c32_29, %c0_30], %38 {strides = array<i32>} : memref<96x128xf32, #tpu.memory_space<vmem>>, vector<32x128xf32>,
    %40 = vector.extract_strided_slice %33 {offsets = [64, 0], sizes = [32, 128], strides = [1, 1]} : vector<96x128xbf16> to vector<32x128xbf16>
    %cst_31 = arith.constant dense<0.000000e+00> : vector<32x128xf32>
    %41 = tpu.matmul %1, %40, %cst_31 {dimension_numbers = #tpu.dot_dimension_numbers<[1], [0], [0], [1], [0, 0, 1, 1], [], []>} : vector<32x32xbf16>, vector<32x128xbf16>, vector<32x128xf32> -> vector<32x128xf32>
    %c64_32 = arith.constant 64 : index
    %c0_33 = arith.constant 0 : index
    %42 = vector.load %arg19[%c64_32, %c0_33] : memref<96x128xf32, #tpu.memory_space<vmem>>, vector<32x128xf32>
    tpu.vector_store %arg19[%c64_32, %c0_33], %41 {strides = array<i32>} : memref<96x128xf32, #tpu.memory_space<vmem>>, vector<32x128xf32>,
    %c0_34 = arith.constant 0 : index
    %c0_35 = arith.constant 0 : index
    %43 = vector.load %arg19[%c0_34, %c0_35] : memref<96x128xf32, #tpu.memory_space<vmem>>, vector<96x128xf32>
    %44 = arith.truncf %43 : vector<96x128xf32> to vector<96x128xbf16>
    %c0_36 = arith.constant 0 : index
    %c0_37 = arith.constant 0 : index
    %45 = vector.load %arg9[%c0_36, %c0_37] : memref<128x128xf32, #tpu.memory_space<vmem>>, vector<128x128xf32>
    %46 = arith.truncf %45 : vector<128x128xf32> to vector<128x128xbf16>
    %cst_38 = arith.constant dense<0.000000e+00> : vector<96x128xf32>
    %47 = tpu.matmul %44, %46, %cst_38 {dimension_numbers = #tpu.dot_dimension_numbers<[1], [0], [0], [1], [0, 0, 1, 1], [], []>} : vector<96x128xbf16>, vector<128x128xbf16>, vector<96x128xf32> -> vector<96x128xf32>
    %c0_39 = arith.constant 0 : index
    %c0_40 = arith.constant 0 : index
    %48 = vector.load %arg10[%c0_39, %c0_40] : memref<1x128xf32, #tpu.memory_space<vmem>>, vector<1x128xf32>
    %49 = vector.broadcast %48 : vector<1x128xf32> to vector<96x128xf32>
    %50 = arith.addf %47, %49 : vector<96x128xf32>
    %cst_41 = arith.constant 0.000000e+00 : f32
    %51 = vector.broadcast %cst_41 : f32 to vector<96x128xf32>
    %52 = arith.maximumf %50, %51 : vector<96x128xf32>
    %53 = arith.truncf %52 : vector<96x128xf32> to vector<96x128xbf16>
    %c0_42 = arith.constant 0 : index
    %c0_43 = arith.constant 0 : index
    %54 = vector.load %arg11[%c0_42, %c0_43] : memref<128x128xf32, #tpu.memory_space<vmem>>, vector<128x128xf32>
    %55 = arith.truncf %54 : vector<128x128xf32> to vector<128x128xbf16>
    %cst_44 = arith.constant dense<0.000000e+00> : vector<96x128xf32>
    %56 = tpu.matmul %53, %55, %cst_44 {dimension_numbers = #tpu.dot_dimension_numbers<[1], [0], [0], [1], [0, 0, 1, 1], [], []>} : vector<96x128xbf16>, vector<128x128xbf16>, vector<96x128xf32> -> vector<96x128xf32>
    %c0_45 = arith.constant 0 : index
    %c0_46 = arith.constant 0 : index
    %57 = vector.load %arg12[%c0_45, %c0_46] : memref<1x128xf32, #tpu.memory_space<vmem>>, vector<1x128xf32>
    %58 = vector.broadcast %57 : vector<1x128xf32> to vector<96x128xf32>
    %59 = arith.addf %56, %58 : vector<96x128xf32>
    %cst_47 = arith.constant 0.000000e+00 : f32
    %60 = vector.broadcast %cst_47 : f32 to vector<96x128xf32>
    %61 = arith.maximumf %59, %60 : vector<96x128xf32>
    %c0_48 = arith.constant 0 : index
    %c0_49 = arith.constant 0 : index
    %62 = vector.load %arg4[%c0_48, %c0_49] : memref<2x32xf32, #tpu.memory_space<vmem>>, vector<2x32xf32>
    %63 = arith.truncf %62 : vector<2x32xf32> to vector<2x32xbf16>
    %64 = arith.truncf %61 : vector<96x128xf32> to vector<96x128xbf16>
    %65 = vector.extract_strided_slice %64 {offsets = [0, 0], sizes = [32, 128], strides = [1, 1]} : vector<96x128xbf16> to vector<32x128xbf16>
    %cst_50 = arith.constant dense<0.000000e+00> : vector<2x128xf32>
    %66 = tpu.matmul %63, %65, %cst_50 {dimension_numbers = #tpu.dot_dimension_numbers<[1], [0], [0], [1], [0, 0, 1, 1], [], []>} : vector<2x32xbf16>, vector<32x128xbf16>, vector<2x128xf32> -> vector<2x128xf32>
    %c0_51 = arith.constant 0 : index
    %c0_52 = arith.constant 0 : index
    %67 = vector.load %arg14[%c0_51, %c0_52] : memref<2x128xf32, #tpu.memory_space<vmem>>, vector<2x128xf32>
    tpu.vector_store %arg14[%c0_51, %c0_52], %66 {strides = array<i32>} : memref<2x128xf32, #tpu.memory_space<vmem>>, vector<2x128xf32>,
    %68 = vector.extract_strided_slice %64 {offsets = [32, 0], sizes = [32, 128], strides = [1, 1]} : vector<96x128xbf16> to vector<32x128xbf16>
    %cst_53 = arith.constant dense<0.000000e+00> : vector<2x128xf32>
    %69 = tpu.matmul %63, %68, %cst_53 {dimension_numbers = #tpu.dot_dimension_numbers<[1], [0], [0], [1], [0, 0, 1, 1], [], []>} : vector<2x32xbf16>, vector<32x128xbf16>, vector<2x128xf32> -> vector<2x128xf32>
    %c0_54 = arith.constant 0 : index
    %c0_55 = arith.constant 0 : index
    %70 = vector.load %arg15[%c0_54, %c0_55] : memref<2x128xf32, #tpu.memory_space<vmem>>, vector<2x128xf32>
    tpu.vector_store %arg15[%c0_54, %c0_55], %69 {strides = array<i32>} : memref<2x128xf32, #tpu.memory_space<vmem>>, vector<2x128xf32>,
    %71 = vector.extract_strided_slice %64 {offsets = [64, 0], sizes = [32, 128], strides = [1, 1]} : vector<96x128xbf16> to vector<32x128xbf16>
    %cst_56 = arith.constant dense<0.000000e+00> : vector<2x128xf32>
    %72 = tpu.matmul %63, %71, %cst_56 {dimension_numbers = #tpu.dot_dimension_numbers<[1], [0], [0], [1], [0, 0, 1, 1], [], []>} : vector<2x32xbf16>, vector<32x128xbf16>, vector<2x128xf32> -> vector<2x128xf32>
    %c0_57 = arith.constant 0 : index
    %c0_58 = arith.constant 0 : index
    %73 = vector.load %arg16[%c0_57, %c0_58] : memref<2x128xf32, #tpu.memory_space<vmem>>, vector<2x128xf32>
    tpu.vector_store %arg16[%c0_57, %c0_58], %72 {strides = array<i32>} : memref<2x128xf32, #tpu.memory_space<vmem>>, vector<2x128xf32>,
    %74 = vector.extract_strided_slice %61 {offsets = [0, 0], sizes = [32, 128], strides = [1, 1]} : vector<96x128xf32> to vector<32x128xf32>
    %c0_59 = arith.constant 0 : index
    %c0_60 = arith.constant 0 : index
    %75 = vector.load %arg13[%c0_59, %c0_60] : memref<1x128xf32, #tpu.memory_space<vmem>>, vector<1x128xf32>
    %76 = tpu.transpose %75, [1, 0] : vector<1x128xf32> -> vector<128x1xf32>
    %cst_61 = arith.constant dense<0.000000e+00> : vector<32x1xf32>
    %77 = tpu.matmul %74, %76, %cst_61 {dimension_numbers = #tpu.dot_dimension_numbers<[1], [0], [0], [1], [0, 0, 1, 1], [], []>} : vector<32x128xf32>, vector<128x1xf32>, vector<32x1xf32> -> vector<32x1xf32>
    %78 = math.tanh %77 : vector<32x1xf32>
    %79 = vector.broadcast %78 : vector<32x1xf32> to vector<32x128xf32>
    %80 = arith.mulf %74, %79 : vector<32x128xf32>
    %c0_62 = arith.constant 0 : index
    %c0_63 = arith.constant 0 : index
    %81 = vector.load %arg17[%c0_62, %c0_63] : memref<32x128xf32, #tpu.memory_space<vmem>>, vector<32x128xf32>
    tpu.vector_store %arg17[%c0_62, %c0_63], %80 {strides = array<i32>} : memref<32x128xf32, #tpu.memory_space<vmem>>, vector<32x128xf32>,
    %cst_64 = arith.constant dense<0.000000e+00> : vector<1x32xf32>
    %82 = tpu.matmul %75, %74, %cst_64 {dimension_numbers = #tpu.dot_dimension_numbers<[1], [1], [0], [0], [0, 0, 1, 0], [], []>} : vector<1x128xf32>, vector<32x128xf32>, vector<1x32xf32> -> vector<1x32xf32>
    %c0_65 = arith.constant 0 : index
    %c0_66 = arith.constant 0 : index
    %83 = vector.load %arg18[%c0_65, %c0_66] : memref<1x32xf32, #tpu.memory_space<vmem>>, vector<1x32xf32>
    tpu.vector_store %arg18[%c0_65, %c0_66], %82 {strides = array<i32>} : memref<1x32xf32, #tpu.memory_space<vmem>>, vector<1x32xf32>,
    return
  }
}

module attributes {stable_mosaic.version = 11 : i64} {
  func.func @encoder3_kernel(%arg0: memref<16x16xf32, #tpu.memory_space<vmem>>, %arg1: memref<16x128xf32, #tpu.memory_space<vmem>>, %arg2: memref<1x128xf32, #tpu.memory_space<vmem>>, %arg3: memref<1x128xf32, #tpu.memory_space<vmem>>, %arg4: memref<2x16xf32, #tpu.memory_space<vmem>>, %arg5: memref<128x128xf32, #tpu.memory_space<vmem>>, %arg6: memref<1x128xf32, #tpu.memory_space<vmem>>, %arg7: memref<128x128xf32, #tpu.memory_space<vmem>>, %arg8: memref<1x128xf32, #tpu.memory_space<vmem>>, %arg9: memref<128x128xf32, #tpu.memory_space<vmem>>, %arg10: memref<1x128xf32, #tpu.memory_space<vmem>>, %arg11: memref<128x128xf32, #tpu.memory_space<vmem>>, %arg12: memref<1x128xf32, #tpu.memory_space<vmem>>, %arg13: memref<1x128xf32, #tpu.memory_space<vmem>>, %arg14: memref<2x128xf32, #tpu.memory_space<vmem>>, %arg15: memref<2x128xf32, #tpu.memory_space<vmem>>, %arg16: memref<2x128xf32, #tpu.memory_space<vmem>>, %arg17: memref<16x128xf32, #tpu.memory_space<vmem>>, %arg18: memref<1x16xf32, #tpu.memory_space<vmem>>, %arg19: memref<48x128xf32, #tpu.memory_space<vmem>>) attributes {dimension_semantics = [], scalar_prefetch = 0 : i64, scratch_operands = 1 : i64, tpu.core_type = #tpu.core_type<tc>} {
    %c0 = arith.constant 0 : index
    %c0_0 = arith.constant 0 : index
    %0 = vector.load %arg0[%c0, %c0_0] : memref<16x16xf32, #tpu.memory_space<vmem>>, vector<16x16xf32>
    %1 = arith.truncf %0 : vector<16x16xf32> to vector<16x16xbf16>
    %c0_1 = arith.constant 0 : index
    %c0_2 = arith.constant 0 : index
    %2 = vector.load %arg1[%c0_1, %c0_2] : memref<16x128xf32, #tpu.memory_space<vmem>>, vector<16x128xf32>
    %3 = arith.truncf %2 : vector<16x128xf32> to vector<16x128xbf16>
    %cst = arith.constant dense<0.000000e+00> : vector<16x128xf32>
    %4 = tpu.matmul %1, %3, %cst {dimension_numbers = #tpu.dot_dimension_numbers<[1], [0], [0], [1], [0, 0, 1, 1], [], []>} : vector<16x16xbf16>, vector<16x128xbf16>, vector<16x128xf32> -> vector<16x128xf32>
    %c0_3 = arith.constant 0 : index
    %c0_4 = arith.constant 0 : index
    %5 = vector.load %arg19[%c0_3, %c0_4] : memref<48x128xf32, #tpu.memory_space<vmem>>, vector<16x128xf32>
    tpu.vector_store %arg19[%c0_3, %c0_4], %4 {strides = array<i32>} : memref<48x128xf32, #tpu.memory_space<vmem>>, vector<16x128xf32>,
    %c0_5 = arith.constant 0 : index
    %c0_6 = arith.constant 0 : index
    %6 = vector.load %arg2[%c0_5, %c0_6] : memref<1x128xf32, #tpu.memory_space<vmem>>, vector<1x128xf32>
    %7 = vector.broadcast %6 : vector<1x128xf32> to vector<16x128xf32>
    %8 = arith.mulf %4, %7 : vector<16x128xf32>
    %c16 = arith.constant 16 : index
    %c0_7 = arith.constant 0 : index
    %9 = vector.load %arg19[%c16, %c0_7] : memref<48x128xf32, #tpu.memory_space<vmem>>, vector<16x128xf32>
    tpu.vector_store %arg19[%c16, %c0_7], %8 {strides = array<i32>} : memref<48x128xf32, #tpu.memory_space<vmem>>, vector<16x128xf32>,
    %c0_8 = arith.constant 0 : index
    %c0_9 = arith.constant 0 : index
    %10 = vector.load %arg3[%c0_8, %c0_9] : memref<1x128xf32, #tpu.memory_space<vmem>>, vector<1x128xf32>
    %11 = vector.broadcast %10 : vector<1x128xf32> to vector<16x128xf32>
    %12 = arith.mulf %4, %11 : vector<16x128xf32>
    %c32 = arith.constant 32 : index
    %c0_10 = arith.constant 0 : index
    %13 = vector.load %arg19[%c32, %c0_10] : memref<48x128xf32, #tpu.memory_space<vmem>>, vector<16x128xf32>
    tpu.vector_store %arg19[%c32, %c0_10], %12 {strides = array<i32>} : memref<48x128xf32, #tpu.memory_space<vmem>>, vector<16x128xf32>,
    %c0_11 = arith.constant 0 : index
    %c0_12 = arith.constant 0 : index
    %14 = vector.load %arg19[%c0_11, %c0_12] : memref<48x128xf32, #tpu.memory_space<vmem>>, vector<48x128xf32>
    %15 = arith.truncf %14 : vector<48x128xf32> to vector<48x128xbf16>
    %c0_13 = arith.constant 0 : index
    %c0_14 = arith.constant 0 : index
    %16 = vector.load %arg5[%c0_13, %c0_14] : memref<128x128xf32, #tpu.memory_space<vmem>>, vector<128x128xf32>
    %17 = arith.truncf %16 : vector<128x128xf32> to vector<128x128xbf16>
    %cst_15 = arith.constant dense<0.000000e+00> : vector<48x128xf32>
    %18 = tpu.matmul %15, %17, %cst_15 {dimension_numbers = #tpu.dot_dimension_numbers<[1], [0], [0], [1], [0, 0, 1, 1], [], []>} : vector<48x128xbf16>, vector<128x128xbf16>, vector<48x128xf32> -> vector<48x128xf32>
    %c0_16 = arith.constant 0 : index
    %c0_17 = arith.constant 0 : index
    %19 = vector.load %arg6[%c0_16, %c0_17] : memref<1x128xf32, #tpu.memory_space<vmem>>, vector<1x128xf32>
    %20 = vector.broadcast %19 : vector<1x128xf32> to vector<48x128xf32>
    %21 = arith.addf %18, %20 : vector<48x128xf32>
    %cst_18 = arith.constant 0.000000e+00 : f32
    %22 = vector.broadcast %cst_18 : f32 to vector<48x128xf32>
    %23 = arith.maximumf %21, %22 : vector<48x128xf32>
    %24 = arith.truncf %23 : vector<48x128xf32> to vector<48x128xbf16>
    %c0_19 = arith.constant 0 : index
    %c0_20 = arith.constant 0 : index
    %25 = vector.load %arg7[%c0_19, %c0_20] : memref<128x128xf32, #tpu.memory_space<vmem>>, vector<128x128xf32>
    %26 = arith.truncf %25 : vector<128x128xf32> to vector<128x128xbf16>
    %cst_21 = arith.constant dense<0.000000e+00> : vector<48x128xf32>
    %27 = tpu.matmul %24, %26, %cst_21 {dimension_numbers = #tpu.dot_dimension_numbers<[1], [0], [0], [1], [0, 0, 1, 1], [], []>} : vector<48x128xbf16>, vector<128x128xbf16>, vector<48x128xf32> -> vector<48x128xf32>
    %c0_22 = arith.constant 0 : index
    %c0_23 = arith.constant 0 : index
    %28 = vector.load %arg8[%c0_22, %c0_23] : memref<1x128xf32, #tpu.memory_space<vmem>>, vector<1x128xf32>
    %29 = vector.broadcast %28 : vector<1x128xf32> to vector<48x128xf32>
    %30 = arith.addf %27, %29 : vector<48x128xf32>
    %cst_24 = arith.constant 0.000000e+00 : f32
    %31 = vector.broadcast %cst_24 : f32 to vector<48x128xf32>
    %32 = arith.maximumf %30, %31 : vector<48x128xf32>
    %33 = arith.truncf %32 : vector<48x128xf32> to vector<48x128xbf16>
    %34 = vector.extract_strided_slice %33 {offsets = [0, 0], sizes = [16, 128], strides = [1, 1]} : vector<48x128xbf16> to vector<16x128xbf16>
    %cst_25 = arith.constant dense<0.000000e+00> : vector<16x128xf32>
    %35 = tpu.matmul %1, %34, %cst_25 {dimension_numbers = #tpu.dot_dimension_numbers<[1], [0], [0], [1], [0, 0, 1, 1], [], []>} : vector<16x16xbf16>, vector<16x128xbf16>, vector<16x128xf32> -> vector<16x128xf32>
    %c0_26 = arith.constant 0 : index
    %c0_27 = arith.constant 0 : index
    %36 = vector.load %arg19[%c0_26, %c0_27] : memref<48x128xf32, #tpu.memory_space<vmem>>, vector<16x128xf32>
    tpu.vector_store %arg19[%c0_26, %c0_27], %35 {strides = array<i32>} : memref<48x128xf32, #tpu.memory_space<vmem>>, vector<16x128xf32>,
    %37 = vector.extract_strided_slice %33 {offsets = [16, 0], sizes = [16, 128], strides = [1, 1]} : vector<48x128xbf16> to vector<16x128xbf16>
    %cst_28 = arith.constant dense<0.000000e+00> : vector<16x128xf32>
    %38 = tpu.matmul %1, %37, %cst_28 {dimension_numbers = #tpu.dot_dimension_numbers<[1], [0], [0], [1], [0, 0, 1, 1], [], []>} : vector<16x16xbf16>, vector<16x128xbf16>, vector<16x128xf32> -> vector<16x128xf32>
    %c16_29 = arith.constant 16 : index
    %c0_30 = arith.constant 0 : index
    %39 = vector.load %arg19[%c16_29, %c0_30] : memref<48x128xf32, #tpu.memory_space<vmem>>, vector<16x128xf32>
    tpu.vector_store %arg19[%c16_29, %c0_30], %38 {strides = array<i32>} : memref<48x128xf32, #tpu.memory_space<vmem>>, vector<16x128xf32>,
    %40 = vector.extract_strided_slice %33 {offsets = [32, 0], sizes = [16, 128], strides = [1, 1]} : vector<48x128xbf16> to vector<16x128xbf16>
    %cst_31 = arith.constant dense<0.000000e+00> : vector<16x128xf32>
    %41 = tpu.matmul %1, %40, %cst_31 {dimension_numbers = #tpu.dot_dimension_numbers<[1], [0], [0], [1], [0, 0, 1, 1], [], []>} : vector<16x16xbf16>, vector<16x128xbf16>, vector<16x128xf32> -> vector<16x128xf32>
    %c32_32 = arith.constant 32 : index
    %c0_33 = arith.constant 0 : index
    %42 = vector.load %arg19[%c32_32, %c0_33] : memref<48x128xf32, #tpu.memory_space<vmem>>, vector<16x128xf32>
    tpu.vector_store %arg19[%c32_32, %c0_33], %41 {strides = array<i32>} : memref<48x128xf32, #tpu.memory_space<vmem>>, vector<16x128xf32>,
    %c0_34 = arith.constant 0 : index
    %c0_35 = arith.constant 0 : index
    %43 = vector.load %arg19[%c0_34, %c0_35] : memref<48x128xf32, #tpu.memory_space<vmem>>, vector<48x128xf32>
    %44 = arith.truncf %43 : vector<48x128xf32> to vector<48x128xbf16>
    %c0_36 = arith.constant 0 : index
    %c0_37 = arith.constant 0 : index
    %45 = vector.load %arg9[%c0_36, %c0_37] : memref<128x128xf32, #tpu.memory_space<vmem>>, vector<128x128xf32>
    %46 = arith.truncf %45 : vector<128x128xf32> to vector<128x128xbf16>
    %cst_38 = arith.constant dense<0.000000e+00> : vector<48x128xf32>
    %47 = tpu.matmul %44, %46, %cst_38 {dimension_numbers = #tpu.dot_dimension_numbers<[1], [0], [0], [1], [0, 0, 1, 1], [], []>} : vector<48x128xbf16>, vector<128x128xbf16>, vector<48x128xf32> -> vector<48x128xf32>
    %c0_39 = arith.constant 0 : index
    %c0_40 = arith.constant 0 : index
    %48 = vector.load %arg10[%c0_39, %c0_40] : memref<1x128xf32, #tpu.memory_space<vmem>>, vector<1x128xf32>
    %49 = vector.broadcast %48 : vector<1x128xf32> to vector<48x128xf32>
    %50 = arith.addf %47, %49 : vector<48x128xf32>
    %cst_41 = arith.constant 0.000000e+00 : f32
    %51 = vector.broadcast %cst_41 : f32 to vector<48x128xf32>
    %52 = arith.maximumf %50, %51 : vector<48x128xf32>
    %53 = arith.truncf %52 : vector<48x128xf32> to vector<48x128xbf16>
    %c0_42 = arith.constant 0 : index
    %c0_43 = arith.constant 0 : index
    %54 = vector.load %arg11[%c0_42, %c0_43] : memref<128x128xf32, #tpu.memory_space<vmem>>, vector<128x128xf32>
    %55 = arith.truncf %54 : vector<128x128xf32> to vector<128x128xbf16>
    %cst_44 = arith.constant dense<0.000000e+00> : vector<48x128xf32>
    %56 = tpu.matmul %53, %55, %cst_44 {dimension_numbers = #tpu.dot_dimension_numbers<[1], [0], [0], [1], [0, 0, 1, 1], [], []>} : vector<48x128xbf16>, vector<128x128xbf16>, vector<48x128xf32> -> vector<48x128xf32>
    %c0_45 = arith.constant 0 : index
    %c0_46 = arith.constant 0 : index
    %57 = vector.load %arg12[%c0_45, %c0_46] : memref<1x128xf32, #tpu.memory_space<vmem>>, vector<1x128xf32>
    %58 = vector.broadcast %57 : vector<1x128xf32> to vector<48x128xf32>
    %59 = arith.addf %56, %58 : vector<48x128xf32>
    %cst_47 = arith.constant 0.000000e+00 : f32
    %60 = vector.broadcast %cst_47 : f32 to vector<48x128xf32>
    %61 = arith.maximumf %59, %60 : vector<48x128xf32>
    %c0_48 = arith.constant 0 : index
    %c0_49 = arith.constant 0 : index
    %62 = vector.load %arg4[%c0_48, %c0_49] : memref<2x16xf32, #tpu.memory_space<vmem>>, vector<2x16xf32>
    %63 = arith.truncf %62 : vector<2x16xf32> to vector<2x16xbf16>
    %64 = arith.truncf %61 : vector<48x128xf32> to vector<48x128xbf16>
    %65 = vector.extract_strided_slice %64 {offsets = [0, 0], sizes = [16, 128], strides = [1, 1]} : vector<48x128xbf16> to vector<16x128xbf16>
    %cst_50 = arith.constant dense<0.000000e+00> : vector<2x128xf32>
    %66 = tpu.matmul %63, %65, %cst_50 {dimension_numbers = #tpu.dot_dimension_numbers<[1], [0], [0], [1], [0, 0, 1, 1], [], []>} : vector<2x16xbf16>, vector<16x128xbf16>, vector<2x128xf32> -> vector<2x128xf32>
    %c0_51 = arith.constant 0 : index
    %c0_52 = arith.constant 0 : index
    %67 = vector.load %arg14[%c0_51, %c0_52] : memref<2x128xf32, #tpu.memory_space<vmem>>, vector<2x128xf32>
    tpu.vector_store %arg14[%c0_51, %c0_52], %66 {strides = array<i32>} : memref<2x128xf32, #tpu.memory_space<vmem>>, vector<2x128xf32>,
    %68 = vector.extract_strided_slice %64 {offsets = [16, 0], sizes = [16, 128], strides = [1, 1]} : vector<48x128xbf16> to vector<16x128xbf16>
    %cst_53 = arith.constant dense<0.000000e+00> : vector<2x128xf32>
    %69 = tpu.matmul %63, %68, %cst_53 {dimension_numbers = #tpu.dot_dimension_numbers<[1], [0], [0], [1], [0, 0, 1, 1], [], []>} : vector<2x16xbf16>, vector<16x128xbf16>, vector<2x128xf32> -> vector<2x128xf32>
    %c0_54 = arith.constant 0 : index
    %c0_55 = arith.constant 0 : index
    %70 = vector.load %arg15[%c0_54, %c0_55] : memref<2x128xf32, #tpu.memory_space<vmem>>, vector<2x128xf32>
    tpu.vector_store %arg15[%c0_54, %c0_55], %69 {strides = array<i32>} : memref<2x128xf32, #tpu.memory_space<vmem>>, vector<2x128xf32>,
    %71 = vector.extract_strided_slice %64 {offsets = [32, 0], sizes = [16, 128], strides = [1, 1]} : vector<48x128xbf16> to vector<16x128xbf16>
    %cst_56 = arith.constant dense<0.000000e+00> : vector<2x128xf32>
    %72 = tpu.matmul %63, %71, %cst_56 {dimension_numbers = #tpu.dot_dimension_numbers<[1], [0], [0], [1], [0, 0, 1, 1], [], []>} : vector<2x16xbf16>, vector<16x128xbf16>, vector<2x128xf32> -> vector<2x128xf32>
    %c0_57 = arith.constant 0 : index
    %c0_58 = arith.constant 0 : index
    %73 = vector.load %arg16[%c0_57, %c0_58] : memref<2x128xf32, #tpu.memory_space<vmem>>, vector<2x128xf32>
    tpu.vector_store %arg16[%c0_57, %c0_58], %72 {strides = array<i32>} : memref<2x128xf32, #tpu.memory_space<vmem>>, vector<2x128xf32>,
    %74 = vector.extract_strided_slice %61 {offsets = [0, 0], sizes = [16, 128], strides = [1, 1]} : vector<48x128xf32> to vector<16x128xf32>
    %c0_59 = arith.constant 0 : index
    %c0_60 = arith.constant 0 : index
    %75 = vector.load %arg13[%c0_59, %c0_60] : memref<1x128xf32, #tpu.memory_space<vmem>>, vector<1x128xf32>
    %76 = tpu.transpose %75, [1, 0] : vector<1x128xf32> -> vector<128x1xf32>
    %cst_61 = arith.constant dense<0.000000e+00> : vector<16x1xf32>
    %77 = tpu.matmul %74, %76, %cst_61 {dimension_numbers = #tpu.dot_dimension_numbers<[1], [0], [0], [1], [0, 0, 1, 1], [], []>} : vector<16x128xf32>, vector<128x1xf32>, vector<16x1xf32> -> vector<16x1xf32>
    %78 = math.tanh %77 : vector<16x1xf32>
    %79 = vector.broadcast %78 : vector<16x1xf32> to vector<16x128xf32>
    %80 = arith.mulf %74, %79 : vector<16x128xf32>
    %c0_62 = arith.constant 0 : index
    %c0_63 = arith.constant 0 : index
    %81 = vector.load %arg17[%c0_62, %c0_63] : memref<16x128xf32, #tpu.memory_space<vmem>>, vector<16x128xf32>
    tpu.vector_store %arg17[%c0_62, %c0_63], %80 {strides = array<i32>} : memref<16x128xf32, #tpu.memory_space<vmem>>, vector<16x128xf32>,
    %cst_64 = arith.constant dense<0.000000e+00> : vector<1x16xf32>
    %82 = tpu.matmul %75, %74, %cst_64 {dimension_numbers = #tpu.dot_dimension_numbers<[1], [1], [0], [0], [0, 0, 1, 0], [], []>} : vector<1x128xf32>, vector<16x128xf32>, vector<1x16xf32> -> vector<1x16xf32>
    %c0_65 = arith.constant 0 : index
    %c0_66 = arith.constant 0 : index
    %83 = vector.load %arg18[%c0_65, %c0_66] : memref<1x16xf32, #tpu.memory_space<vmem>>, vector<1x16xf32>
    tpu.vector_store %arg18[%c0_65, %c0_66], %82 {strides = array<i32>} : memref<1x16xf32, #tpu.memory_space<vmem>>, vector<1x16xf32>,
    return
  }
}

module attributes {stable_mosaic.version = 11 : i64} {
  func.func @encoder3_kernel(%arg0: memref<8x8xf32, #tpu.memory_space<vmem>>, %arg1: memref<8x128xf32, #tpu.memory_space<vmem>>, %arg2: memref<1x128xf32, #tpu.memory_space<vmem>>, %arg3: memref<1x128xf32, #tpu.memory_space<vmem>>, %arg4: memref<2x8xf32, #tpu.memory_space<vmem>>, %arg5: memref<128x128xf32, #tpu.memory_space<vmem>>, %arg6: memref<1x128xf32, #tpu.memory_space<vmem>>, %arg7: memref<128x128xf32, #tpu.memory_space<vmem>>, %arg8: memref<1x128xf32, #tpu.memory_space<vmem>>, %arg9: memref<128x128xf32, #tpu.memory_space<vmem>>, %arg10: memref<1x128xf32, #tpu.memory_space<vmem>>, %arg11: memref<128x128xf32, #tpu.memory_space<vmem>>, %arg12: memref<1x128xf32, #tpu.memory_space<vmem>>, %arg13: memref<1x128xf32, #tpu.memory_space<vmem>>, %arg14: memref<2x128xf32, #tpu.memory_space<vmem>>, %arg15: memref<2x128xf32, #tpu.memory_space<vmem>>, %arg16: memref<2x128xf32, #tpu.memory_space<vmem>>, %arg17: memref<8x128xf32, #tpu.memory_space<vmem>>, %arg18: memref<1x8xf32, #tpu.memory_space<vmem>>, %arg19: memref<24x128xf32, #tpu.memory_space<vmem>>) attributes {dimension_semantics = [], scalar_prefetch = 0 : i64, scratch_operands = 1 : i64, tpu.core_type = #tpu.core_type<tc>} {
    %c0 = arith.constant 0 : index
    %c0_0 = arith.constant 0 : index
    %0 = vector.load %arg0[%c0, %c0_0] : memref<8x8xf32, #tpu.memory_space<vmem>>, vector<8x8xf32>
    %1 = arith.truncf %0 : vector<8x8xf32> to vector<8x8xbf16>
    %c0_1 = arith.constant 0 : index
    %c0_2 = arith.constant 0 : index
    %2 = vector.load %arg1[%c0_1, %c0_2] : memref<8x128xf32, #tpu.memory_space<vmem>>, vector<8x128xf32>
    %3 = arith.truncf %2 : vector<8x128xf32> to vector<8x128xbf16>
    %cst = arith.constant dense<0.000000e+00> : vector<8x128xf32>
    %4 = tpu.matmul %1, %3, %cst {dimension_numbers = #tpu.dot_dimension_numbers<[1], [0], [0], [1], [0, 0, 1, 1], [], []>} : vector<8x8xbf16>, vector<8x128xbf16>, vector<8x128xf32> -> vector<8x128xf32>
    %c0_3 = arith.constant 0 : index
    %c0_4 = arith.constant 0 : index
    %5 = vector.load %arg19[%c0_3, %c0_4] : memref<24x128xf32, #tpu.memory_space<vmem>>, vector<8x128xf32>
    tpu.vector_store %arg19[%c0_3, %c0_4], %4 {strides = array<i32>} : memref<24x128xf32, #tpu.memory_space<vmem>>, vector<8x128xf32>,
    %c0_5 = arith.constant 0 : index
    %c0_6 = arith.constant 0 : index
    %6 = vector.load %arg2[%c0_5, %c0_6] : memref<1x128xf32, #tpu.memory_space<vmem>>, vector<1x128xf32>
    %7 = vector.broadcast %6 : vector<1x128xf32> to vector<8x128xf32>
    %8 = arith.mulf %4, %7 : vector<8x128xf32>
    %c8 = arith.constant 8 : index
    %c0_7 = arith.constant 0 : index
    %9 = vector.load %arg19[%c8, %c0_7] : memref<24x128xf32, #tpu.memory_space<vmem>>, vector<8x128xf32>
    tpu.vector_store %arg19[%c8, %c0_7], %8 {strides = array<i32>} : memref<24x128xf32, #tpu.memory_space<vmem>>, vector<8x128xf32>,
    %c0_8 = arith.constant 0 : index
    %c0_9 = arith.constant 0 : index
    %10 = vector.load %arg3[%c0_8, %c0_9] : memref<1x128xf32, #tpu.memory_space<vmem>>, vector<1x128xf32>
    %11 = vector.broadcast %10 : vector<1x128xf32> to vector<8x128xf32>
    %12 = arith.mulf %4, %11 : vector<8x128xf32>
    %c16 = arith.constant 16 : index
    %c0_10 = arith.constant 0 : index
    %13 = vector.load %arg19[%c16, %c0_10] : memref<24x128xf32, #tpu.memory_space<vmem>>, vector<8x128xf32>
    tpu.vector_store %arg19[%c16, %c0_10], %12 {strides = array<i32>} : memref<24x128xf32, #tpu.memory_space<vmem>>, vector<8x128xf32>,
    %c0_11 = arith.constant 0 : index
    %c0_12 = arith.constant 0 : index
    %14 = vector.load %arg19[%c0_11, %c0_12] : memref<24x128xf32, #tpu.memory_space<vmem>>, vector<24x128xf32>
    %15 = arith.truncf %14 : vector<24x128xf32> to vector<24x128xbf16>
    %c0_13 = arith.constant 0 : index
    %c0_14 = arith.constant 0 : index
    %16 = vector.load %arg5[%c0_13, %c0_14] : memref<128x128xf32, #tpu.memory_space<vmem>>, vector<128x128xf32>
    %17 = arith.truncf %16 : vector<128x128xf32> to vector<128x128xbf16>
    %cst_15 = arith.constant dense<0.000000e+00> : vector<24x128xf32>
    %18 = tpu.matmul %15, %17, %cst_15 {dimension_numbers = #tpu.dot_dimension_numbers<[1], [0], [0], [1], [0, 0, 1, 1], [], []>} : vector<24x128xbf16>, vector<128x128xbf16>, vector<24x128xf32> -> vector<24x128xf32>
    %c0_16 = arith.constant 0 : index
    %c0_17 = arith.constant 0 : index
    %19 = vector.load %arg6[%c0_16, %c0_17] : memref<1x128xf32, #tpu.memory_space<vmem>>, vector<1x128xf32>
    %20 = vector.broadcast %19 : vector<1x128xf32> to vector<24x128xf32>
    %21 = arith.addf %18, %20 : vector<24x128xf32>
    %cst_18 = arith.constant 0.000000e+00 : f32
    %22 = vector.broadcast %cst_18 : f32 to vector<24x128xf32>
    %23 = arith.maximumf %21, %22 : vector<24x128xf32>
    %24 = arith.truncf %23 : vector<24x128xf32> to vector<24x128xbf16>
    %c0_19 = arith.constant 0 : index
    %c0_20 = arith.constant 0 : index
    %25 = vector.load %arg7[%c0_19, %c0_20] : memref<128x128xf32, #tpu.memory_space<vmem>>, vector<128x128xf32>
    %26 = arith.truncf %25 : vector<128x128xf32> to vector<128x128xbf16>
    %cst_21 = arith.constant dense<0.000000e+00> : vector<24x128xf32>
    %27 = tpu.matmul %24, %26, %cst_21 {dimension_numbers = #tpu.dot_dimension_numbers<[1], [0], [0], [1], [0, 0, 1, 1], [], []>} : vector<24x128xbf16>, vector<128x128xbf16>, vector<24x128xf32> -> vector<24x128xf32>
    %c0_22 = arith.constant 0 : index
    %c0_23 = arith.constant 0 : index
    %28 = vector.load %arg8[%c0_22, %c0_23] : memref<1x128xf32, #tpu.memory_space<vmem>>, vector<1x128xf32>
    %29 = vector.broadcast %28 : vector<1x128xf32> to vector<24x128xf32>
    %30 = arith.addf %27, %29 : vector<24x128xf32>
    %cst_24 = arith.constant 0.000000e+00 : f32
    %31 = vector.broadcast %cst_24 : f32 to vector<24x128xf32>
    %32 = arith.maximumf %30, %31 : vector<24x128xf32>
    %33 = arith.truncf %32 : vector<24x128xf32> to vector<24x128xbf16>
    %34 = vector.extract_strided_slice %33 {offsets = [0, 0], sizes = [8, 128], strides = [1, 1]} : vector<24x128xbf16> to vector<8x128xbf16>
    %cst_25 = arith.constant dense<0.000000e+00> : vector<8x128xf32>
    %35 = tpu.matmul %1, %34, %cst_25 {dimension_numbers = #tpu.dot_dimension_numbers<[1], [0], [0], [1], [0, 0, 1, 1], [], []>} : vector<8x8xbf16>, vector<8x128xbf16>, vector<8x128xf32> -> vector<8x128xf32>
    %c0_26 = arith.constant 0 : index
    %c0_27 = arith.constant 0 : index
    %36 = vector.load %arg19[%c0_26, %c0_27] : memref<24x128xf32, #tpu.memory_space<vmem>>, vector<8x128xf32>
    tpu.vector_store %arg19[%c0_26, %c0_27], %35 {strides = array<i32>} : memref<24x128xf32, #tpu.memory_space<vmem>>, vector<8x128xf32>,
    %37 = vector.extract_strided_slice %33 {offsets = [8, 0], sizes = [8, 128], strides = [1, 1]} : vector<24x128xbf16> to vector<8x128xbf16>
    %cst_28 = arith.constant dense<0.000000e+00> : vector<8x128xf32>
    %38 = tpu.matmul %1, %37, %cst_28 {dimension_numbers = #tpu.dot_dimension_numbers<[1], [0], [0], [1], [0, 0, 1, 1], [], []>} : vector<8x8xbf16>, vector<8x128xbf16>, vector<8x128xf32> -> vector<8x128xf32>
    %c8_29 = arith.constant 8 : index
    %c0_30 = arith.constant 0 : index
    %39 = vector.load %arg19[%c8_29, %c0_30] : memref<24x128xf32, #tpu.memory_space<vmem>>, vector<8x128xf32>
    tpu.vector_store %arg19[%c8_29, %c0_30], %38 {strides = array<i32>} : memref<24x128xf32, #tpu.memory_space<vmem>>, vector<8x128xf32>,
    %40 = vector.extract_strided_slice %33 {offsets = [16, 0], sizes = [8, 128], strides = [1, 1]} : vector<24x128xbf16> to vector<8x128xbf16>
    %cst_31 = arith.constant dense<0.000000e+00> : vector<8x128xf32>
    %41 = tpu.matmul %1, %40, %cst_31 {dimension_numbers = #tpu.dot_dimension_numbers<[1], [0], [0], [1], [0, 0, 1, 1], [], []>} : vector<8x8xbf16>, vector<8x128xbf16>, vector<8x128xf32> -> vector<8x128xf32>
    %c16_32 = arith.constant 16 : index
    %c0_33 = arith.constant 0 : index
    %42 = vector.load %arg19[%c16_32, %c0_33] : memref<24x128xf32, #tpu.memory_space<vmem>>, vector<8x128xf32>
    tpu.vector_store %arg19[%c16_32, %c0_33], %41 {strides = array<i32>} : memref<24x128xf32, #tpu.memory_space<vmem>>, vector<8x128xf32>,
    %c0_34 = arith.constant 0 : index
    %c0_35 = arith.constant 0 : index
    %43 = vector.load %arg19[%c0_34, %c0_35] : memref<24x128xf32, #tpu.memory_space<vmem>>, vector<24x128xf32>
    %44 = arith.truncf %43 : vector<24x128xf32> to vector<24x128xbf16>
    %c0_36 = arith.constant 0 : index
    %c0_37 = arith.constant 0 : index
    %45 = vector.load %arg9[%c0_36, %c0_37] : memref<128x128xf32, #tpu.memory_space<vmem>>, vector<128x128xf32>
    %46 = arith.truncf %45 : vector<128x128xf32> to vector<128x128xbf16>
    %cst_38 = arith.constant dense<0.000000e+00> : vector<24x128xf32>
    %47 = tpu.matmul %44, %46, %cst_38 {dimension_numbers = #tpu.dot_dimension_numbers<[1], [0], [0], [1], [0, 0, 1, 1], [], []>} : vector<24x128xbf16>, vector<128x128xbf16>, vector<24x128xf32> -> vector<24x128xf32>
    %c0_39 = arith.constant 0 : index
    %c0_40 = arith.constant 0 : index
    %48 = vector.load %arg10[%c0_39, %c0_40] : memref<1x128xf32, #tpu.memory_space<vmem>>, vector<1x128xf32>
    %49 = vector.broadcast %48 : vector<1x128xf32> to vector<24x128xf32>
    %50 = arith.addf %47, %49 : vector<24x128xf32>
    %cst_41 = arith.constant 0.000000e+00 : f32
    %51 = vector.broadcast %cst_41 : f32 to vector<24x128xf32>
    %52 = arith.maximumf %50, %51 : vector<24x128xf32>
    %53 = arith.truncf %52 : vector<24x128xf32> to vector<24x128xbf16>
    %c0_42 = arith.constant 0 : index
    %c0_43 = arith.constant 0 : index
    %54 = vector.load %arg11[%c0_42, %c0_43] : memref<128x128xf32, #tpu.memory_space<vmem>>, vector<128x128xf32>
    %55 = arith.truncf %54 : vector<128x128xf32> to vector<128x128xbf16>
    %cst_44 = arith.constant dense<0.000000e+00> : vector<24x128xf32>
    %56 = tpu.matmul %53, %55, %cst_44 {dimension_numbers = #tpu.dot_dimension_numbers<[1], [0], [0], [1], [0, 0, 1, 1], [], []>} : vector<24x128xbf16>, vector<128x128xbf16>, vector<24x128xf32> -> vector<24x128xf32>
    %c0_45 = arith.constant 0 : index
    %c0_46 = arith.constant 0 : index
    %57 = vector.load %arg12[%c0_45, %c0_46] : memref<1x128xf32, #tpu.memory_space<vmem>>, vector<1x128xf32>
    %58 = vector.broadcast %57 : vector<1x128xf32> to vector<24x128xf32>
    %59 = arith.addf %56, %58 : vector<24x128xf32>
    %cst_47 = arith.constant 0.000000e+00 : f32
    %60 = vector.broadcast %cst_47 : f32 to vector<24x128xf32>
    %61 = arith.maximumf %59, %60 : vector<24x128xf32>
    %c0_48 = arith.constant 0 : index
    %c0_49 = arith.constant 0 : index
    %62 = vector.load %arg4[%c0_48, %c0_49] : memref<2x8xf32, #tpu.memory_space<vmem>>, vector<2x8xf32>
    %63 = arith.truncf %62 : vector<2x8xf32> to vector<2x8xbf16>
    %64 = arith.truncf %61 : vector<24x128xf32> to vector<24x128xbf16>
    %65 = vector.extract_strided_slice %64 {offsets = [0, 0], sizes = [8, 128], strides = [1, 1]} : vector<24x128xbf16> to vector<8x128xbf16>
    %cst_50 = arith.constant dense<0.000000e+00> : vector<2x128xf32>
    %66 = tpu.matmul %63, %65, %cst_50 {dimension_numbers = #tpu.dot_dimension_numbers<[1], [0], [0], [1], [0, 0, 1, 1], [], []>} : vector<2x8xbf16>, vector<8x128xbf16>, vector<2x128xf32> -> vector<2x128xf32>
    %c0_51 = arith.constant 0 : index
    %c0_52 = arith.constant 0 : index
    %67 = vector.load %arg14[%c0_51, %c0_52] : memref<2x128xf32, #tpu.memory_space<vmem>>, vector<2x128xf32>
    tpu.vector_store %arg14[%c0_51, %c0_52], %66 {strides = array<i32>} : memref<2x128xf32, #tpu.memory_space<vmem>>, vector<2x128xf32>,
    %68 = vector.extract_strided_slice %64 {offsets = [8, 0], sizes = [8, 128], strides = [1, 1]} : vector<24x128xbf16> to vector<8x128xbf16>
    %cst_53 = arith.constant dense<0.000000e+00> : vector<2x128xf32>
    %69 = tpu.matmul %63, %68, %cst_53 {dimension_numbers = #tpu.dot_dimension_numbers<[1], [0], [0], [1], [0, 0, 1, 1], [], []>} : vector<2x8xbf16>, vector<8x128xbf16>, vector<2x128xf32> -> vector<2x128xf32>
    %c0_54 = arith.constant 0 : index
    %c0_55 = arith.constant 0 : index
    %70 = vector.load %arg15[%c0_54, %c0_55] : memref<2x128xf32, #tpu.memory_space<vmem>>, vector<2x128xf32>
    tpu.vector_store %arg15[%c0_54, %c0_55], %69 {strides = array<i32>} : memref<2x128xf32, #tpu.memory_space<vmem>>, vector<2x128xf32>,
    %71 = vector.extract_strided_slice %64 {offsets = [16, 0], sizes = [8, 128], strides = [1, 1]} : vector<24x128xbf16> to vector<8x128xbf16>
    %cst_56 = arith.constant dense<0.000000e+00> : vector<2x128xf32>
    %72 = tpu.matmul %63, %71, %cst_56 {dimension_numbers = #tpu.dot_dimension_numbers<[1], [0], [0], [1], [0, 0, 1, 1], [], []>} : vector<2x8xbf16>, vector<8x128xbf16>, vector<2x128xf32> -> vector<2x128xf32>
    %c0_57 = arith.constant 0 : index
    %c0_58 = arith.constant 0 : index
    %73 = vector.load %arg16[%c0_57, %c0_58] : memref<2x128xf32, #tpu.memory_space<vmem>>, vector<2x128xf32>
    tpu.vector_store %arg16[%c0_57, %c0_58], %72 {strides = array<i32>} : memref<2x128xf32, #tpu.memory_space<vmem>>, vector<2x128xf32>,
    %74 = vector.extract_strided_slice %61 {offsets = [0, 0], sizes = [8, 128], strides = [1, 1]} : vector<24x128xf32> to vector<8x128xf32>
    %c0_59 = arith.constant 0 : index
    %c0_60 = arith.constant 0 : index
    %75 = vector.load %arg13[%c0_59, %c0_60] : memref<1x128xf32, #tpu.memory_space<vmem>>, vector<1x128xf32>
    %76 = tpu.transpose %75, [1, 0] : vector<1x128xf32> -> vector<128x1xf32>
    %cst_61 = arith.constant dense<0.000000e+00> : vector<8x1xf32>
    %77 = tpu.matmul %74, %76, %cst_61 {dimension_numbers = #tpu.dot_dimension_numbers<[1], [0], [0], [1], [0, 0, 1, 1], [], []>} : vector<8x128xf32>, vector<128x1xf32>, vector<8x1xf32> -> vector<8x1xf32>
    %78 = math.tanh %77 : vector<8x1xf32>
    %79 = vector.broadcast %78 : vector<8x1xf32> to vector<8x128xf32>
    %80 = arith.mulf %74, %79 : vector<8x128xf32>
    %c0_62 = arith.constant 0 : index
    %c0_63 = arith.constant 0 : index
    %81 = vector.load %arg17[%c0_62, %c0_63] : memref<8x128xf32, #tpu.memory_space<vmem>>, vector<8x128xf32>
    tpu.vector_store %arg17[%c0_62, %c0_63], %80 {strides = array<i32>} : memref<8x128xf32, #tpu.memory_space<vmem>>, vector<8x128xf32>,
    %cst_64 = arith.constant dense<0.000000e+00> : vector<1x8xf32>
    %82 = tpu.matmul %75, %74, %cst_64 {dimension_numbers = #tpu.dot_dimension_numbers<[1], [1], [0], [0], [0, 0, 1, 0], [], []>} : vector<1x128xf32>, vector<8x128xf32>, vector<1x8xf32> -> vector<1x8xf32>
    %c0_65 = arith.constant 0 : index
    %c0_66 = arith.constant 0 : index
    %83 = vector.load %arg18[%c0_65, %c0_66] : memref<1x8xf32, #tpu.memory_space<vmem>>, vector<1x8xf32>
    tpu.vector_store %arg18[%c0_65, %c0_66], %82 {strides = array<i32>} : memref<1x8xf32, #tpu.memory_space<vmem>>, vector<1x8xf32>,
    return
  }
}

</mosaic_0001>

<bundles_post_ra>
// kernel: hdgcl_forward.3
= control target key start
LH: loop header
LB: loop body
LE: loop exit
PB: predicated region body
PF: predicated region fallthrough
CT: control target
= control target key end

     0   :  { %s2023_s0 = inlined_call_operand.vmem [shape: f32[32,32], index: 0, kind: input, shape index: {}]   ;;  %s2024_s1 = inlined_call_operand.vmem [shape: f32[32,128], index: 1, kind: input, shape index: {}]   ;;  %s2025_s2 = inlined_call_operand.vmem [shape: f32[1,128], index: 2, kind: input, shape index: {}]   ;;  %s2026_s3 = inlined_call_operand.vmem [shape: f32[1,128], index: 3, kind: input, shape index: {}]   ;;  %s2027_s4 = inlined_call_operand.vmem [shape: f32[2,32], index: 4, kind: input, shape index: {}]   ;;  %s2028_s5 = inlined_call_operand.hbm [shape: f32[128,128], index: 5, kind: input, shape index: {}]   ;;  %s2029_s6 = inlined_call_operand.vmem [shape: f32[1,128], index: 6, kind: input, shape index: {}]   ;;  %s2030_s7 = inlined_call_operand.hbm [shape: f32[128,128], index: 7, kind: input, shape index: {}]   ;;  %s2031_s8 = inlined_call_operand.vmem [shape: f32[1,128], index: 8, kind: input, shape index: {}]   ;;  %s2032_s9 = inlined_call_operand.hbm [shape: f32[128,128], index: 9, kind: input, shape index: {}]   ;;  %s2033_s10 = inlined_call_operand.vmem [shape: f32[1,128], index: 10, kind: input, shape index: {}]   ;;  %s2034_s11 = inlined_call_operand.hbm [shape: f32[128,128], index: 11, kind: input, shape index: {}]   ;;  %s2035_s12 = inlined_call_operand.vmem [shape: f32[1,128], index: 12, kind: input, shape index: {}]   ;;  %s2036_s13 = inlined_call_operand.vmem [shape: f32[1,128], index: 13, kind: input, shape index: {}]   ;;  %s2037_s14 = inlined_call_operand.hbm [shape: f32[2,128], index: 14, kind: output, shape index: {0}]   ;;  %s2038_s15 = inlined_call_operand.hbm [shape: f32[2,128], index: 15, kind: output, shape index: {1}]   ;;  %s2039_s16 = inlined_call_operand.hbm [shape: f32[2,128], index: 16, kind: output, shape index: {2}]   ;;  %s2040_s17 = inlined_call_operand.vmem [shape: f32[32,128], index: 17, kind: output, shape index: {3}]   ;;  %s2041_s18 = inlined_call_operand.vmem [shape: f32[1,32], index: 18, kind: output, shape index: {4}]  }
   0x1   :  { %2044 = sst [smem:[#allocation20_spill]] %s2023_s0 }
   0x2   :  { %2045 = sst [smem:[#allocation21_spill]] %s2024_s1 }
   0x3   :  { %2046 = sst [smem:[#allocation22_spill]] %s2025_s2 }
   0x4   :  { %24 = vsyncpa [#allocation4], 0 }
   0x5   :  { %25 = vsyncpa [#allocation7], 0 }
   0x6   :  { %26 = vsyncpa [#allocation10], 0 }
   0x7   :  { %27 = vsyncpa [#allocation5], 0 }
   0x8   :  { %28 = vsyncpa [#allocation13], 0  ;;  %s1682_s27 = smov [#allocation6]   ;;  %s1683_s29 = smov [#allocation3]  }
   0x9   :  { %s58_s28 = sshll.u32 %s1682_s27, 4  ;;  %s44_s30 = sshll.u32 %s1683_s29, 4  ;;  %s59_s28 = int_to_ptr.vmem [resolvable:$true] %s58_s28  ;;  %s1789_s30 = int_to_ptr.vmem [resolvable:$true] %s44_s30 }
   0xa   :  { %s1518_s1 = scalar_lea.hbm %s2030_s7, 2048 }
   0xb   :  { %p1519_p0 = scmp.ne.s32.totalorder %s2030_s7, %s1518_s1  ;;  %p1522_p1 = scmp.lt.u32.totalorder %s1518_s1, %s2030_s7 }
   0xd   :  { %p1524_p2 = pnand %p1522_p1, %p1519_p0 }
   0xf   :  { %1527 = shalt.err (!%p1524_p2)
}
  0x10   :  { %s1528_s23 = scalar_lea.vmem %s59_s28, 2048  ;;  %p1533_p4 = scmp.lt.s32.totalorder %s59_s28, %s59_s28 }
  0x11   :  { %p1529_p3 = scmp.ne.s32.totalorder %s59_s28, %s1528_s23  ;;  %p1534_p5 = scmp.lt.s32.totalorder %s1528_s23, %s1528_s23 }
  0x13   :  { %p1535_p6 = por %p1534_p5, %p1533_p4 }
  0x15   :  { %p1536_p7 = pnand %p1535_p6, %p1529_p3 }
  0x17   :  { %1539 = shalt.err (!%p1536_p7)
}
  0x18   :  { %s1684_s24 = smov 128   ;;  %s1685_s25 = smov 8  }
  0x19   :  { %64 = dma.hbm_to_vmem [thread:$0]  %s2030_s7, 2048, %s59_s28, [#allocation7], %s1684_s24, %s1684_s24, %s1685_s25  }
  0x1a   :  { %s1540_s19 = scalar_lea.hbm %s2028_s5, 2048 }
  0x1b   :  { %p1541_p8 = scmp.ne.s32.totalorder %s2028_s5, %s1540_s19  ;;  %p1544_p9 = scmp.lt.u32.totalorder %s1540_s19, %s2028_s5 }
  0x1d   :  { %p1546_p10 = pnand %p1544_p9, %p1541_p8 }
  0x1f   :  { %1549 = shalt.err (!%p1546_p10)
}
  0x20   :  { %s1550_s2 = scalar_lea.vmem %s1789_s30, 2048  ;;  %p1555_p12 = scmp.lt.s32.totalorder %s1789_s30, %s1789_s30 }
  0x21   :  { %p1551_p11 = scmp.ne.s32.totalorder %s1789_s30, %s1550_s2  ;;  %p1556_p13 = scmp.lt.s32.totalorder %s1550_s2, %s1550_s2 }
  0x23   :  { %p1557_p0 = por %p1556_p13, %p1555_p12 }
  0x25   :  { %p1558_p1 = pnand %p1557_p0, %p1551_p11 }
  0x27   :  { %1561 = shalt.err (!%p1558_p1)
}
  0x28   :  { %50 = dma.hbm_to_vmem [thread:$0]  %s2028_s5, 2048, %s1789_s30, [#allocation4], %s1684_s24, %s1684_s24, %s1685_s25  }
  0x29   :  { %s1686_s23 = smov [#allocation8]   ;;  %s1687_s27 = smov [#allocation9]  }
  0x2a   :  { %s72_s26 = sshll.u32 %s1686_s23, 4  ;;  %s86_s29 = sshll.u32 %s1687_s27, 4  ;;  %s73_s26 = int_to_ptr.vmem [resolvable:$true] %s72_s26  ;;  %s1826_s29 = int_to_ptr.vmem [resolvable:$true] %s86_s29 }
  0x2b   :  { %s1562_s1 = scalar_lea.hbm %s2032_s9, 2048 }
  0x2c   :  { %p1563_p2 = scmp.ne.s32.totalorder %s2032_s9, %s1562_s1  ;;  %p1566_p3 = scmp.lt.u32.totalorder %s1562_s1, %s2032_s9 }
  0x2e   :  { %p1568_p4 = pnand %p1566_p3, %p1563_p2 }
  0x30   :  { %1571 = shalt.err (!%p1568_p4)
}
  0x31   :  { %s1572_s5 = scalar_lea.vmem %s73_s26, 2048  ;;  %p1577_p6 = scmp.lt.s32.totalorder %s73_s26, %s73_s26 }
  0x32   :  { %p1573_p5 = scmp.ne.s32.totalorder %s73_s26, %s1572_s5  ;;  %p1578_p7 = scmp.lt.s32.totalorder %s1572_s5, %s1572_s5 }
  0x34   :  { %p1579_p8 = por %p1578_p7, %p1577_p6 }
  0x36   :  { %p1580_p9 = pnand %p1579_p8, %p1573_p5 }
  0x38   :  { %1583 = shalt.err (!%p1580_p9)
}
  0x39   :  { %78 = dma.hbm_to_vmem [thread:$0]  %s2032_s9, 2048, %s73_s26, [#allocation7], %s1684_s24, %s1684_s24, %s1685_s25  }
  0x3a   :  { %s1584_s27 = scalar_lea.hbm %s2034_s11, 2048 }
  0x3b   :  { %p1585_p10 = scmp.ne.s32.totalorder %s2034_s11, %s1584_s27  ;;  %p1588_p11 = scmp.lt.u32.totalorder %s1584_s27, %s2034_s11 }
  0x3d   :  { %p1590_p12 = pnand %p1588_p11, %p1585_p10 }
  0x3f   :  { %1593 = shalt.err (!%p1590_p12)
}
  0x40   :  { %s1594_s21 = scalar_lea.vmem %s1826_s29, 2048  ;;  %p1599_p0 = scmp.lt.s32.totalorder %s1826_s29, %s1826_s29 }
  0x41   :  { %p1595_p13 = scmp.ne.s32.totalorder %s1826_s29, %s1594_s21  ;;  %p1600_p1 = scmp.lt.s32.totalorder %s1594_s21, %s1594_s21 }
  0x43   :  { %p1601_p2 = por %p1600_p1, %p1599_p0 }
  0x45   :  { %p1602_p3 = pnand %p1601_p2, %p1595_p13 }
  0x47   :  { %1605 = shalt.err (!%p1602_p3)
}
  0x48   :  { %92 = dma.hbm_to_vmem [thread:$0]  %s2034_s11, 2048, %s1826_s29, [#allocation10], %s1684_s24, %s1684_s24, %s1685_s25  }
  0x49   :  { %1672 = dma.done.wait [#allocation4], 2048  }
  0x4a   :  { %1673 = vsyncadd [#allocation4], 4294965248 }
  0x4b   :  { %1674 = dma.done.wait [#allocation7], 4096  }
  0x4c   :  { %1675 = vsyncadd [#allocation7], 4294963200 }
  0x4d   :  { %1676 = dma.done.wait [#allocation10], 2048  }
  0x4e   :  { %1677 = vsyncadd [#allocation10], 4294965248  ;;  %s2047_s5 = sld [smem:[#allocation21_spill]]  ;;  %s2048_s27 = sld [smem:[#allocation20_spill]]  ;;  %vm122_vm0 = vcmask 261120   ;;  %v230_v9 = vld [vmem:[#allocation3] sm:$0xff] }
  0x4f   :  { %v231_v10 = vld [vmem:[#allocation3 + $0x8] sm:$0xff]  ;;  %v232_v11 = vld [vmem:[#allocation3 + $0x10] sm:$0xff]  ;;  %v233_v12 = vld [vmem:[#allocation3 + $0x18] sm:$0xff]  ;;  %s2049_s2 = sld [smem:[#allocation22_spill]]  ;;  %vm1689_vm1 = vmmov 0   ;;  %s1691_s9 = smov [#allocation11]  }
  0x50   :  { %v246_v15 = vpack.c.bf16 %v231_v10, %v230_v9  ;;  %v247_v16 = vpack.c.bf16 %v233_v12, %v232_v11  ;;  %v234_v17 = vld [vmem:[#allocation3 + $0x20] sm:$0xff]  ;;  %v235_v18 = vld [vmem:[#allocation3 + $0x28] sm:$0xff]  ;;  %v236_v21 = vld [vmem:[#allocation3 + $0x30] sm:$0xff]  ;;  %s1164_s26 = sshll.u32 %s1691_s9, 4  ;;  %s1165_s26 = int_to_ptr.vmem [resolvable:$true] %s1164_s26 }
  0x51   :  { %v248_v20 = vpack.c.bf16 %v235_v18, %v234_v17  ;;  %v237_v22 = vld [vmem:[#allocation3 + $0x38] sm:$0xff]  ;;  %v238_v24 = vld [vmem:[#allocation3 + $0x40] sm:$0xff]  ;;  %v239_v25 = vld [vmem:[#allocation3 + $0x48] sm:$0xff]  ;;  %s1606_s22 = scalar_lea.vmem %s1165_s26, 32  ;;  %p1611_p5 = scmp.lt.s32.totalorder %s1165_s26, %s1165_s26 }
  0x52   :  { %1321 = vmatprep.subr.bf16.mxu1 %v246_v15  ;;  %v249_v23 = vpack.c.bf16 %v237_v22, %v236_v21  ;;  %v250_v26 = vpack.c.bf16 %v239_v25, %v238_v24  ;;  %v240_v27 = vld [vmem:[#allocation3 + $0x50] sm:$0xff]  ;;  %v241_v28 = vld [vmem:[#allocation3 + $0x58] sm:$0xff]  ;;  %v242_v30 = vld [vmem:[#allocation3 + $0x60] sm:$0xff]  ;;  %p1607_p4 = scmp.ne.s32.totalorder %s1165_s26, %s1606_s22  ;;  %p1612_p6 = scmp.lt.s32.totalorder %s1606_s22, %s1606_s22 }
  0x53   :  { %1322 = vmatpush3.bf16.msra.mxu1 %v246_v15  ;;  %v251_v29 = vpack.c.bf16 %v241_v28, %v240_v27  ;;  %v243_v31 = vld [vmem:[#allocation3 + $0x68] sm:$0xff]  ;;  %v244_v33 = vld [vmem:[#allocation3 + $0x70] sm:$0xff]  ;;  %v245_v34 = vld [vmem:[#allocation3 + $0x78] sm:$0xff] }
  0x54   :  { %v116_v0 = vld [vmem:[%s2047_s5] sm:$0xff]  ;;  %v117_v1 = vld [vmem:[%s2047_s5 + $0x8] sm:$0xff]  ;;  %v118_v2 = vld [vmem:[%s2047_s5 + $0x10] sm:$0xff]  ;;  %1323 = vmatprep.subr.bf16.mxu1 %v247_v16  ;;  %v252_v32 = vpack.c.bf16 %v243_v31, %v242_v30  ;;  %v253_v35 = vpack.c.bf16 %v245_v34, %v244_v33  ;;  %p1613_p7 = por %p1612_p6, %p1611_p5 }
  0x55   :  { %v120_v3 = vpack.c.bf16 %v117_v1, %v116_v0  ;;  %v119_v4 = vld [vmem:[%s2047_s5 + $0x18] sm:$0xff]  ;;  %v110_v5 = vld [vmem:[%s2048_s27] sm:$0xff]  ;;  %v111_v6 = vld [vmem:[%s2048_s27 + $0x8] sm:$0xff] }
  0x56   :  { %v121_v7 = vpack.c.bf16 %v119_v4, %v118_v2  ;;  %v1881_v8 = vpack.c.bf16 %v111_v6, %v110_v5  ;;  %v112_v13 = vld [vmem:[%s2048_s27 + $0x10] sm:$0xff]  ;;  %v113_v14 = vld [vmem:[%s2048_s27 + $0x18] sm:$0xff]  ;;  %v360_v36 = vld [vmem:[#allocation6] sm:$0xff]  ;;  %p1614_p8 = pnand %p1613_p7, %p1607_p4 }
  0x57   :  { %1313 = vmatprep.subr.bf16.mxu0 %v120_v3  ;;  %v1891_v19 = vpack.c.bf16 %v113_v14, %v112_v13  ;;  %1324 = vmatpush3.bf16.msra.mxu1 %v247_v16  ;;  %v361_v37 = vld [vmem:[#allocation6 + $0x8] sm:$0xff]  ;;  %v362_v38 = vld [vmem:[#allocation6 + $0x10] sm:$0xff]  ;;  %v363_v40 = vld [vmem:[#allocation6 + $0x18] sm:$0xff] }
  0x58   :  { %1314 = vmatpush3.bf16.msra.mxu0 %v120_v3  ;;  %1317 = vmatprep.mubr.msk.bf16.mxu0 %vm122_vm0, %v1881_v8  ;;  %v376_v39 = vpack.c.bf16 %v361_v37, %v360_v36  ;;  %v377_v41 = vpack.c.bf16 %v363_v40, %v362_v38  ;;  %v364_v42 = vld [vmem:[#allocation6 + $0x20] sm:$0xff]  ;;  %v365_v43 = vld [vmem:[#allocation6 + $0x28] sm:$0xff]  ;;  %v366_v45 = vld [vmem:[#allocation6 + $0x30] sm:$0xff] }
  0x59   :  { %1315 = vmatprep.subr.bf16.mxu0 %v121_v7  ;;  %1325 = vmatprep.subr.bf16.mxu1 %v248_v20  ;;  %v378_v44 = vpack.c.bf16 %v365_v43, %v364_v42  ;;  %v367_v46 = vld [vmem:[#allocation6 + $0x38] sm:$0xff]  ;;  %v368_v48 = vld [vmem:[#allocation6 + $0x40] sm:$0xff]  ;;  %v369_v49 = vld [vmem:[#allocation6 + $0x48] sm:$0xff] }
  0x5a   :  { %v379_v47 = vpack.c.bf16 %v367_v46, %v366_v45  ;;  %v380_v50 = vpack.c.bf16 %v369_v49, %v368_v48  ;;  %v370_v51 = vld [vmem:[#allocation6 + $0x50] sm:$0xff]  ;;  %v371_v52 = vld [vmem:[#allocation6 + $0x58] sm:$0xff]  ;;  %v1212_v54 = vld [vmem:[%s2049_s2] ss:$0 sm:$0xff] }
  0x5b   :  { %1326 = vmatpush3.bf16.msra.mxu1 %v248_v20  ;;  %v381_v53 = vpack.c.bf16 %v371_v52, %v370_v51  ;;  %v1213_v55 = vld [vmem:[%s2026_s3] ss:$0 sm:$0xff]  ;;  %v373_v12 = vld [vmem:[#allocation6 + $0x68] sm:$0xff]  ;;  %v374_v14 = vld [vmem:[#allocation6 + $0x70] sm:$0xff] }
  0x5c   :  { %1316 = vmatpush3.bf16.msra.mxu0 %v121_v7  ;;  %1327 = vmatprep.subr.bf16.mxu1 %v249_v23  ;;  %v372_v11 = vld [vmem:[#allocation6 + $0x60] sm:$0xff]  ;;  %v375_v15 = vld [vmem:[#allocation6 + $0x78] sm:$0xff] }
  0x5d   :  { %1349 = vmatprep.subr.bf16.mxu0 %v376_v39  ;;  %v382_v13 = vpack.c.bf16 %v373_v12, %v372_v11  ;;  %v383_v16 = vpack.c.bf16 %v375_v15, %v374_v14  ;;  %v1214_v17 = vld [vmem:[%s2029_s6] ss:$0 sm:$0xff] }
  0x5f   :  { %1318 = vmatmul.mubr.msk.bf16.vlgmr.msra.gmra.mrb[0].mxu0 %vm122_vm0, %v1891_v19  ;;  %1328 = vmatpush3.bf16.msra.mxu1 %v249_v23 }
  0x60   :  { %1329 = vmatprep.subr.bf16.mxu1 %v250_v26  ;;  %1350 = vmatpush3.bf16.msra.mxu0 %v376_v39 }
  0x61   :  { %1351 = vmatprep.subr.bf16.mxu0 %v377_v41 }
  0x63   :  { %1330 = vmatpush3.bf16.msra.mxu1 %v250_v26 }
  0x64   :  { %1331 = vmatprep.subr.bf16.mxu1 %v251_v29  ;;  %1352 = vmatpush3.bf16.msra.mxu0 %v377_v41 }
  0x65   :  { %1353 = vmatprep.subr.bf16.mxu0 %v378_v44 }
  0x67   :  { %1332 = vmatpush3.bf16.msra.mxu1 %v251_v29 }
  0x68   :  { %1333 = vmatprep.subr.bf16.mxu1 %v252_v32  ;;  %1354 = vmatpush3.bf16.msra.mxu0 %v378_v44 }
  0x69   :  { %1355 = vmatprep.subr.bf16.mxu0 %v379_v47 }
  0x6b   :  { %1334 = vmatpush3.bf16.msra.mxu1 %v252_v32 }
  0x6c   :  { %1335 = vmatprep.subr.bf16.mxu1 %v253_v35  ;;  %1356 = vmatpush3.bf16.msra.mxu0 %v379_v47 }
  0x6d   :  { %1357 = vmatprep.subr.bf16.mxu0 %v380_v50 }
  0x6f   :  { %1336 = vmatpush3.bf16.msra.mxu1 %v253_v35 }
  0x70   :  { %1358 = vmatpush3.bf16.msra.mxu0 %v380_v50 }
  0x71   :  { %1359 = vmatprep.subr.bf16.mxu0 %v381_v53 }
  0x74   :  { %1360 = vmatpush3.bf16.msra.mxu0 %v381_v53 }
  0x75   :  { %1361 = vmatprep.subr.bf16.mxu0 %v382_v13 }
  0x78   :  { %1362 = vmatpush3.bf16.msra.mxu0 %v382_v13 }
  0x79   :  { %1363 = vmatprep.subr.bf16.mxu0 %v383_v16 }
  0x7c   :  { %1364 = vmatpush3.bf16.msra.mxu0 %v383_v16 }
 0x132   :  { %v1319_v56 = vpop.f32.mrb[0].mxu0 }
 0x133   :  { %v163_v57 = vpop.f32.mrb[1].mxu0  ;;  %v191_v58 = vmul.f32 %v1319_v56, %v1212_v54  ;;  %v206_v59 = vmul.f32 %v1319_v56, %v1213_v55 }
 0x134   :  { %v1320_v60 = vpop.f32.mrb[2].mxu0  ;;  %v189_v61 = vmul.f32 %v1212_v54, %v163_v57  ;;  %v204_v2 = vmul.f32 %v1213_v55, %v163_v57 }
 0x135   :  { %v192_v62 = vmul.f32 %v1320_v60, %v1212_v54  ;;  %v207_v63 = vmul.f32 %v1320_v60, %v1213_v55  ;;  %v225_v0 = vpack.c.bf16 %v1320_v60, %v1319_v56  ;;  %v166_v1 = vpop.f32.mrb[3].mxu0 }
 0x136   :  { %v190_v3 = vmul.f32 %v1212_v54, %v166_v1  ;;  %v205_v4 = vmul.f32 %v1213_v55, %v166_v1  ;;  %v224_v5 = vpack.c.bf16 %v166_v1, %v163_v57 }
 0x137   :  { %v227_v6 = vpack.c.bf16 %v192_v62, %v191_v58  ;;  %v229_v7 = vpack.c.bf16 %v207_v63, %v206_v59 }
 0x138   :  { %1337 = vmatprep.mubr.bf16.mxu1 %v224_v5  ;;  %v226_v9 = vpack.c.bf16 %v190_v3, %v189_v61  ;;  %v228_v10 = vpack.c.bf16 %v205_v4, %v204_v2  ;;  %v1215_v61 = vld [vmem:[%s2031_s8] ss:$0 sm:$0xff] }
 0x139   :  { %1338 = vmatmul.mubr.bf16.vlgmr.msra.gmra.mrb[0].mxu1 %v225_v0 }
 0x13a   :  { %1341 = vmatprep.mubr.bf16.mxu1 %v226_v9 }
 0x141   :  { %1342 = vmatmul.mubr.bf16.gmra.mrb[4].mxu1 %v227_v6 }
 0x142   :  { %1345 = vmatprep.mubr.bf16.mxu1 %v228_v10 }
 0x149   :  { %1346 = vmatmul.mubr.bf16.gmra.mrb[8].mxu1 %v229_v7 }
 0x14a   :  { %1381 = vmatprep.mubr.msk.bf16.mxu1 %vm122_vm0, %v1881_v8 }
 0x20c   :  { %v1339_v18 = vpop.f32.mrb[0].mxu1 }
 0x20d   :  { %v304_v20 = vadd.f32 %v1339_v18, %v1214_v17  ;;  %v295_v21 = vpop.f32.mrb[1].mxu1 }
 0x20e   :  { %v296_v22 = vadd.f32 %v1214_v17, %v295_v21  ;;  %v1340_v23 = vpop.f32.mrb[2].mxu1 }
 0x20f   :  { %v307_v24 = vadd.f32 %v1340_v23, %v1214_v17  ;;  %v298_v25 = vpop.f32.mrb[3].mxu1  ;;  %v344_v27 = vmax.f32 %v304_v20, 0.0 }
 0x210   :  { %v299_v26 = vadd.f32 %v1214_v17, %v298_v25  ;;  %v342_v29 = vmax.f32 %v296_v22, 0.0 }
 0x211   :  { %v345_v28 = vmax.f32 %v307_v24, 0.0 }
 0x212   :  { %v343_v30 = vmax.f32 %v299_v26, 0.0 }
 0x213   :  { %v355_v31 = vpack.c.bf16 %v345_v28, %v344_v27 }
 0x214   :  { %v354_v32 = vpack.c.bf16 %v343_v30, %v342_v29  ;;  %v1343_v33 = vpop.f32.mrb[4].mxu1 }
 0x215   :  { %v320_v34 = vadd.f32 %v1343_v33, %v1214_v17  ;;  %v311_v35 = vpop.f32.mrb[5].mxu1 }
 0x216   :  { %v312_v36 = vadd.f32 %v1214_v17, %v311_v35  ;;  %v1344_v37 = vpop.f32.mrb[6].mxu1  ;;  %1365 = vmatprep.mubr.bf16.mxu0 %v354_v32  ;;  %v668_v32 = vld [vmem:[#allocation8 + $0x8] sm:$0xff] }
 0x217   :  { %v323_v38 = vadd.f32 %v1344_v37, %v1214_v17  ;;  %v314_v39 = vpop.f32.mrb[7].mxu1  ;;  %1366 = vmatmul.mubr.bf16.vlgmr.msra.gmra.mrb[4].mxu0 %v355_v31  ;;  %v348_v41 = vmax.f32 %v320_v34, 0.0  ;;  %v667_v31 = vld [vmem:[#allocation8] sm:$0xff] }
 0x218   :  { %v315_v40 = vadd.f32 %v1214_v17, %v314_v39  ;;  %v346_v43 = vmax.f32 %v312_v36, 0.0 }
 0x219   :  { %v349_v42 = vmax.f32 %v323_v38, 0.0  ;;  %v683_v38 = vpack.c.bf16 %v668_v32, %v667_v31 }
 0x21a   :  { %v347_v44 = vmax.f32 %v315_v40, 0.0 }
 0x21b   :  { %v357_v45 = vpack.c.bf16 %v349_v42, %v348_v41  ;;  %v669_v41 = vld [vmem:[#allocation8 + $0x10] sm:$0xff]  ;;  %v670_v42 = vld [vmem:[#allocation8 + $0x18] sm:$0xff] }
 0x21c   :  { %v356_v46 = vpack.c.bf16 %v347_v44, %v346_v43  ;;  %v1347_v47 = vpop.f32.mrb[8].mxu1 }
 0x21d   :  { %v336_v48 = vadd.f32 %v1347_v47, %v1214_v17  ;;  %v327_v49 = vpop.f32.mrb[9].mxu1  ;;  %v684_v47 = vpack.c.bf16 %v670_v42, %v669_v41  ;;  %v811_v41 = vld [vmem:[#allocation9 + $0x70] sm:$0xff]  ;;  %v812_v42 = vld [vmem:[#allocation9 + $0x78] sm:$0xff] }
 0x21e   :  { %v328_v50 = vadd.f32 %v1214_v17, %v327_v49  ;;  %v1348_v51 = vpop.f32.mrb[10].mxu1  ;;  %1369 = vmatprep.mubr.bf16.mxu0 %v356_v46  ;;  %v672_v49 = vld [vmem:[#allocation8 + $0x28] sm:$0xff] }
 0x21f   :  { %v339_v52 = vadd.f32 %v1348_v51, %v1214_v17  ;;  %v330_v53 = vpop.f32.mrb[11].mxu1  ;;  %1370 = vmatmul.mubr.bf16.gmra.mrb[8].mxu0 %v357_v45  ;;  %v352_v55 = vmax.f32 %v336_v48, 0.0  ;;  %v671_v48 = vld [vmem:[#allocation8 + $0x20] sm:$0xff]  ;;  %v674_v51 = vld [vmem:[#allocation8 + $0x38] sm:$0xff] }
 0x220   :  { %v331_v54 = vadd.f32 %v1214_v17, %v330_v53  ;;  %v350_v57 = vmax.f32 %v328_v50, 0.0  ;;  %v673_v50 = vld [vmem:[#allocation8 + $0x30] sm:$0xff]  ;;  %v675_v53 = vld [vmem:[#allocation8 + $0x40] sm:$0xff] }
 0x221   :  { %v353_v56 = vmax.f32 %v339_v52, 0.0  ;;  %v686_v52 = vpack.c.bf16 %v674_v51, %v673_v50 }
 0x222   :  { %v351_v58 = vmax.f32 %v331_v54, 0.0  ;;  %v676_v54 = vld [vmem:[#allocation8 + $0x48] sm:$0xff] }
 0x223   :  { %v359_v59 = vpack.c.bf16 %v353_v56, %v352_v55  ;;  %v687_v55 = vpack.c.bf16 %v676_v54, %v675_v53  ;;  %v677_v56 = vld [vmem:[#allocation8 + $0x50] sm:$0xff] }
 0x224   :  { %v358_v60 = vpack.c.bf16 %v351_v58, %v350_v57  ;;  %v678_v57 = vld [vmem:[#allocation8 + $0x58] sm:$0xff] }
 0x225   :  { %v688_v58 = vpack.c.bf16 %v678_v57, %v677_v56 }
 0x226   :  { %1373 = vmatprep.mubr.bf16.mxu0 %v358_v60  ;;  %v680_v60 = vld [vmem:[#allocation8 + $0x68] sm:$0xff] }
 0x227   :  { %1374 = vmatmul.mubr.bf16.gmra.mrb[12].mxu0 %v359_v59  ;;  %v679_v59 = vld [vmem:[#allocation8 + $0x60] sm:$0xff] }
 0x228   :  { %1389 = vmatprep.mubr.msk.bf16.mxu0 %vm122_vm0, %v1881_v8 }
 0x2ea   :  { %v1367_v62 = vpop.f32.mrb[4].mxu0 }
 0x2eb   :  { %v434_v63 = vadd.f32 %v1367_v62, %v1215_v61  ;;  %v425_v0 = vpop.f32.mrb[5].mxu0  ;;  %v681_v62 = vld [vmem:[#allocation8 + $0x70] sm:$0xff] }
 0x2ec   :  { %v426_v1 = vadd.f32 %v1215_v61, %v425_v0  ;;  %v1368_v2 = vpop.f32.mrb[6].mxu0 }
 0x2ed   :  { %v437_v3 = vadd.f32 %v1368_v2, %v1215_v61  ;;  %v428_v4 = vpop.f32.mrb[7].mxu0  ;;  %v474_v6 = vmax.f32 %v434_v63, 0.0  ;;  %v682_v63 = vld [vmem:[#allocation8 + $0x78] sm:$0xff]  ;;  %v799_v2 = vld [vmem:[#allocation9 + $0x10] sm:$0xff] }
 0x2ee   :  { %v429_v5 = vadd.f32 %v1215_v61, %v428_v4  ;;  %v472_v9 = vmax.f32 %v426_v1, 0.0  ;;  %v690_v0 = vpack.c.bf16 %v682_v63, %v681_v62  ;;  %v798_v1 = vld [vmem:[#allocation9 + $0x8] sm:$0xff]  ;;  %v800_v4 = vld [vmem:[#allocation9 + $0x18] sm:$0xff] }
 0x2ef   :  { %v475_v7 = vmax.f32 %v437_v3, 0.0 }
 0x2f0   :  { %v473_v10 = vmax.f32 %v429_v5, 0.0  ;;  %v814_v5 = vpack.c.bf16 %v800_v4, %v799_v2 }
 0x2f1   :  { %v485_v11 = vpack.c.bf16 %v475_v7, %v474_v6  ;;  %v801_v6 = vld [vmem:[#allocation9 + $0x20] sm:$0xff]  ;;  %v802_v7 = vld [vmem:[#allocation9 + $0x28] sm:$0xff] }
 0x2f2   :  { %v484_v12 = vpack.c.bf16 %v473_v10, %v472_v9  ;;  %v1371_v13 = vpop.f32.mrb[8].mxu0  ;;  %v815_v9 = vpack.c.bf16 %v802_v7, %v801_v6  ;;  %v803_v10 = vld [vmem:[#allocation9 + $0x30] sm:$0xff] }
 0x2f3   :  { %v450_v14 = vadd.f32 %v1371_v13, %v1215_v61  ;;  %v441_v15 = vpop.f32.mrb[9].mxu0  ;;  %v805_v13 = vld [vmem:[#allocation9 + $0x40] sm:$0xff] }
 0x2f4   :  { %v442_v16 = vadd.f32 %v1215_v61, %v441_v15  ;;  %v1372_v17 = vpop.f32.mrb[10].mxu0  ;;  %1377 = vmatprep.subr.bf16.mxu1 %v484_v12 }
 0x2f5   :  { %v453_v18 = vadd.f32 %v1372_v17, %v1215_v61  ;;  %v444_v20 = vpop.f32.mrb[11].mxu0  ;;  %1378 = vmatpush3.bf16.msra.mxu1 %v484_v12  ;;  %v478_v22 = vmax.f32 %v450_v14, 0.0  ;;  %v806_v14 = vld [vmem:[#allocation9 + $0x48] sm:$0xff]  ;;  %v808_v17 = vld [vmem:[#allocation9 + $0x58] sm:$0xff] }
 0x2f6   :  { %v445_v21 = vadd.f32 %v1215_v61, %v444_v20  ;;  %1379 = vmatprep.subr.bf16.mxu1 %v485_v11  ;;  %v476_v24 = vmax.f32 %v442_v16, 0.0  ;;  %v817_v15 = vpack.c.bf16 %v806_v14, %v805_v13  ;;  %v807_v16 = vld [vmem:[#allocation9 + $0x50] sm:$0xff] }
 0x2f7   :  { %v479_v23 = vmax.f32 %v453_v18, 0.0  ;;  %v818_v18 = vpack.c.bf16 %v808_v17, %v807_v16 }
 0x2f8   :  { %v477_v25 = vmax.f32 %v445_v21, 0.0 }
 0x2f9   :  { %v487_v26 = vpack.c.bf16 %v479_v23, %v478_v22  ;;  %1380 = vmatpush3.bf16.msra.mxu1 %v485_v11  ;;  %v804_v11 = vld [vmem:[#allocation9 + $0x38] sm:$0xff] }
 0x2fa   :  { %v486_v27 = vpack.c.bf16 %v477_v25, %v476_v24  ;;  %v1375_v28 = vpop.f32.mrb[12].mxu0  ;;  %v816_v12 = vpack.c.bf16 %v804_v11, %v803_v10 }
 0x2fb   :  { %v466_v29 = vadd.f32 %v1375_v28, %v1215_v61  ;;  %v457_v30 = vpop.f32.mrb[13].mxu0 }
 0x2fc   :  { %v458_v33 = vadd.f32 %v1215_v61, %v457_v30  ;;  %v1376_v34 = vpop.f32.mrb[14].mxu0  ;;  %1382 = vmatmul.mubr.msk.bf16.vlgmr.msra.gmra.mrb[12].mxu1 %vm122_vm0, %v1891_v19  ;;  %1385 = vmatprep.subr.bf16.mxu0 %v486_v27 }
 0x2fd   :  { %v469_v35 = vadd.f32 %v1376_v34, %v1215_v61  ;;  %v460_v36 = vpop.f32.mrb[15].mxu0  ;;  %1386 = vmatpush3.bf16.msra.mxu0 %v486_v27  ;;  %1397 = vmatprep.mubr.msk.bf16.mxu1 %vm122_vm0, %v1881_v8  ;;  %v482_v39 = vmax.f32 %v466_v29, 0.0  ;;  %v685_v8 = vpack.c.bf16 %v672_v49, %v671_v48 }
 0x2fe   :  { %v461_v37 = vadd.f32 %v1215_v61, %v460_v36  ;;  %1387 = vmatprep.subr.bf16.mxu0 %v487_v26  ;;  %v480_v43 = vmax.f32 %v458_v33, 0.0  ;;  %v689_v61 = vpack.c.bf16 %v680_v60, %v679_v59 }
 0x2ff   :  { %v483_v40 = vmax.f32 %v469_v35, 0.0 }
 0x300   :  { %v481_v44 = vmax.f32 %v461_v37, 0.0 }
 0x301   :  { %v489_v45 = vpack.c.bf16 %v483_v40, %v482_v39  ;;  %1388 = vmatpush3.bf16.msra.mxu0 %v487_v26  ;;  %v810_v39 = vld [vmem:[#allocation9 + $0x68] sm:$0xff] }
 0x302   :  { %v488_v46 = vpack.c.bf16 %v481_v44, %v480_v43  ;;  %1401 = vmatprep.subr.bf16.mxu0 %v683_v38  ;;  %v820_v43 = vpack.c.bf16 %v812_v42, %v811_v41  ;;  %v1222_v44 = vld [vmem:[%s2033_s10] ss:$0 sm:$0xff] }
 0x304   :  { %1390 = vmatmul.mubr.msk.bf16.vlgmr.msra.gmra.mrb[16].mxu0 %vm122_vm0, %v1891_v19  ;;  %1393 = vmatprep.subr.bf16.mxu1 %v488_v46 }
 0x305   :  { %1394 = vmatpush3.bf16.msra.mxu1 %v488_v46  ;;  %1402 = vmatpush3.bf16.msra.mxu0 %v683_v38  ;;  %v809_v38 = vld [vmem:[#allocation9 + $0x60] sm:$0xff] }
 0x306   :  { %1395 = vmatprep.subr.bf16.mxu1 %v489_v45  ;;  %1403 = vmatprep.subr.bf16.mxu0 %v684_v47  ;;  %v819_v40 = vpack.c.bf16 %v810_v39, %v809_v38 }
 0x309   :  { %1396 = vmatpush3.bf16.msra.mxu1 %v489_v45  ;;  %1404 = vmatpush3.bf16.msra.mxu0 %v684_v47 }
 0x30a   :  { %1405 = vmatprep.subr.bf16.mxu0 %v685_v8 }
 0x30c   :  { %1398 = vmatmul.mubr.msk.bf16.vlgmr.msra.gmra.mrb[16].mxu1 %vm122_vm0, %v1891_v19  ;;  %v797_v19 = vld [vmem:[#allocation9] sm:$0xff] }
 0x30d   :  { %1406 = vmatpush3.bf16.msra.mxu0 %v685_v8  ;;  %v813_v3 = vpack.c.bf16 %v798_v1, %v797_v19 }
 0x30e   :  { %1407 = vmatprep.subr.bf16.mxu0 %v686_v52 }
 0x30f   :  { %1429 = vmatprep.subr.bf16.mxu1 %v813_v3 }
 0x310   :  { %1430 = vmatpush3.bf16.msra.mxu1 %v813_v3 }
 0x311   :  { %1408 = vmatpush3.bf16.msra.mxu0 %v686_v52  ;;  %1431 = vmatprep.subr.bf16.mxu1 %v814_v5 }
 0x312   :  { %1409 = vmatprep.subr.bf16.mxu0 %v687_v55 }
 0x314   :  { %1432 = vmatpush3.bf16.msra.mxu1 %v814_v5 }
 0x315   :  { %1410 = vmatpush3.bf16.msra.mxu0 %v687_v55  ;;  %1433 = vmatprep.subr.bf16.mxu1 %v815_v9 }
 0x316   :  { %1411 = vmatprep.subr.bf16.mxu0 %v688_v58 }
 0x318   :  { %1434 = vmatpush3.bf16.msra.mxu1 %v815_v9 }
 0x319   :  { %1412 = vmatpush3.bf16.msra.mxu0 %v688_v58  ;;  %1435 = vmatprep.subr.bf16.mxu1 %v816_v12 }
 0x31a   :  { %1413 = vmatprep.subr.bf16.mxu0 %v689_v61 }
 0x31c   :  { %1436 = vmatpush3.bf16.msra.mxu1 %v816_v12 }
 0x31d   :  { %1414 = vmatpush3.bf16.msra.mxu0 %v689_v61  ;;  %1437 = vmatprep.subr.bf16.mxu1 %v817_v15 }
 0x31e   :  { %1415 = vmatprep.subr.bf16.mxu0 %v690_v0 }
 0x320   :  { %1438 = vmatpush3.bf16.msra.mxu1 %v817_v15 }
 0x321   :  { %1416 = vmatpush3.bf16.msra.mxu0 %v690_v0  ;;  %1439 = vmatprep.subr.bf16.mxu1 %v818_v18 }
 0x324   :  { %1440 = vmatpush3.bf16.msra.mxu1 %v818_v18 }
 0x325   :  { %1441 = vmatprep.subr.bf16.mxu1 %v819_v40 }
 0x328   :  { %1442 = vmatpush3.bf16.msra.mxu1 %v819_v40 }
 0x329   :  { %1443 = vmatprep.subr.bf16.mxu1 %v820_v43 }
 0x32c   :  { %1444 = vmatpush3.bf16.msra.mxu1 %v820_v43 }
 0x3cf   :  { %v1383_v20 = vpop.f32.mrb[12].mxu1 }
 0x3d0   :  { %v524_v21 = vpop.f32.mrb[13].mxu1 }
 0x3d1   :  { %v1384_v22 = vpop.f32.mrb[14].mxu1 }
 0x3d2   :  { %v662_v23 = vpack.c.bf16 %v1384_v22, %v1383_v20  ;;  %v527_v24 = vpop.f32.mrb[15].mxu1 }
 0x3d3   :  { %v661_v25 = vpack.c.bf16 %v527_v24, %v524_v21  ;;  %v1057_v24 = vlaneseq }
 0x3d5   :  { %1417 = vmatprep.mubr.bf16.mxu0 %v661_v25  ;;  %v1058_v25 = vshrl.u32 %v1057_v24, 7 }
 0x3d6   :  { %1418 = vmatmul.mubr.bf16.vlgmr.msra.gmra.mrb[20].mxu0 %v662_v23  ;;  %v1688_v23 = vmov 0.0  }
 0x3d7   :  { %v1391_v26 = vpop.f32.mrb[16].mxu0  ;;  %1457 = vmatprep.subr.bf16.mxu0 %v1688_v23  ;;  %1465 = vmatprep.subr.bf16.mxu1 %v1688_v23 }
 0x3d8   :  { %v577_v27 = vpop.f32.mrb[17].mxu0 }
 0x3d9   :  { %v1392_v28 = vpop.f32.mrb[18].mxu0 }
 0x3da   :  { %v664_v29 = vpack.c.bf16 %v1392_v28, %v1391_v26  ;;  %v580_v30 = vpop.f32.mrb[19].mxu0  ;;  %v1059_v26 = vsub.s32 0, %v1058_v25  ;;  %v1934_v28 = vld [vmem:[%s2036_s13] sm:$0x1] }
 0x3db   :  { %v663_v31 = vpack.c.bf16 %v580_v30, %v577_v27  ;;  %v1223_v27 = vld [vmem:[%s2035_s12] ss:$0 sm:$0xff] }
 0x3dd   :  { %1421 = vmatprep.mubr.bf16.mxu0 %v663_v31 }
 0x3de   :  { %1422 = vmatmul.mubr.bf16.gmra.mrb[24].mxu0 %v664_v29 }
 0x3df   :  { %v1399_v32 = vpop.f32.mrb[16].mxu1 }
 0x3e0   :  { %v630_v33 = vpop.f32.mrb[17].mxu1 }
 0x3e1   :  { %v1400_v34 = vpop.f32.mrb[18].mxu1 }
 0x3e2   :  { %v666_v35 = vpack.c.bf16 %v1400_v34, %v1399_v32  ;;  %v633_v36 = vpop.f32.mrb[19].mxu1  ;;  %v1060_v32 = vrot.slane %v1934_v28, %v1059_v26 }
 0x3e3   :  { %v665_v37 = vpack.c.bf16 %v633_v36, %v630_v33 }
 0x3e5   :  { %1425 = vmatprep.mubr.bf16.mxu0 %v665_v37 }
 0x3e6   :  { %1426 = vmatmul.mubr.bf16.gmra.mrb[28].mxu0 %v666_v35 }
 0x3e7   :  { %1461 = vmatprep.mubr.msk.bf16.mxu0 %vm1689_vm1, %v1688_v23 }
 0x4a9   :  { %v1419_v45 = vpop.f32.mrb[20].mxu0 }
 0x4aa   :  { %v741_v46 = vadd.f32 %v1419_v45, %v1222_v44  ;;  %v732_v47 = vpop.f32.mrb[21].mxu0 }
 0x4ab   :  { %v733_v48 = vadd.f32 %v1222_v44, %v732_v47  ;;  %v1420_v49 = vpop.f32.mrb[22].mxu0 }
 0x4ac   :  { %v744_v8 = vadd.f32 %v1420_v49, %v1222_v44  ;;  %v735_v50 = vpop.f32.mrb[23].mxu0  ;;  %v781_v52 = vmax.f32 %v741_v46, 0.0 }
 0x4ad   :  { %v736_v51 = vadd.f32 %v1222_v44, %v735_v50  ;;  %v779_v54 = vmax.f32 %v733_v48, 0.0 }
 0x4ae   :  { %v782_v53 = vmax.f32 %v744_v8, 0.0 }
 0x4af   :  { %v780_v55 = vmax.f32 %v736_v51, 0.0  ;;  %v921_v51 = vld [vmem:[%s2027_s4] sm:$0x3] }
 0x4b0   :  { %v792_v56 = vpack.c.bf16 %v782_v53, %v781_v52 }
 0x4b1   :  { %v791_v57 = vpack.c.bf16 %v780_v55, %v779_v54  ;;  %v1423_v58 = vpop.f32.mrb[24].mxu0 }
 0x4b2   :  { %v757_v59 = vadd.f32 %v1423_v58, %v1222_v44  ;;  %v748_v60 = vpop.f32.mrb[25].mxu0  ;;  %v922_v58 = vpack.c.bf16 %v921_v51, %v921_v51 }
 0x4b3   :  { %v749_v61 = vadd.f32 %v1222_v44, %v748_v60  ;;  %v1424_v62 = vpop.f32.mrb[26].mxu0  ;;  %1445 = vmatprep.mubr.bf16.mxu1 %v791_v57 }
 0x4b4   :  { %v760_v63 = vadd.f32 %v1424_v62, %v1222_v44  ;;  %v751_v0 = vpop.f32.mrb[27].mxu0  ;;  %1446 = vmatmul.mubr.bf16.vlgmr.msra.gmra.mrb[20].mxu1 %v792_v56  ;;  %v785_v1 = vmax.f32 %v757_v59, 0.0 }
 0x4b5   :  { %v752_v19 = vadd.f32 %v1222_v44, %v751_v0  ;;  %v783_v3 = vmax.f32 %v749_v61, 0.0 }
 0x4b6   :  { %v786_v2 = vmax.f32 %v760_v63, 0.0 }
 0x4b7   :  { %v784_v4 = vmax.f32 %v752_v19, 0.0 }
 0x4b8   :  { %v794_v5 = vpack.c.bf16 %v786_v2, %v785_v1 }
 0x4b9   :  { %v793_v6 = vpack.c.bf16 %v784_v4, %v783_v3  ;;  %v1427_v7 = vpop.f32.mrb[28].mxu0 }
 0x4ba   :  { %v773_v9 = vadd.f32 %v1427_v7, %v1222_v44  ;;  %v764_v10 = vpop.f32.mrb[29].mxu0 }
 0x4bb   :  { %1449 = vmatprep.mubr.bf16.mxu1 %v793_v6  ;;  %v765_v11 = vadd.f32 %v1222_v44, %v764_v10  ;;  %v1428_v12 = vpop.f32.mrb[30].mxu0 }
 0x4bc   :  { %1450 = vmatmul.mubr.bf16.gmra.mrb[24].mxu1 %v794_v5  ;;  %v789_v13 = vmax.f32 %v773_v9, 0.0  ;;  %v776_v14 = vadd.f32 %v1428_v12, %v1222_v44  ;;  %v767_v15 = vpop.f32.mrb[31].mxu0  ;;  %v1690_v12 = vmov 0.0|0.0  }
 0x4bd   :  { %v787_v16 = vmax.f32 %v765_v11, 0.0  ;;  %v768_v17 = vadd.f32 %v1222_v44, %v767_v15 }
 0x4be   :  { %v790_v18 = vmax.f32 %v776_v14, 0.0 }
 0x4bf   :  { %v788_v20 = vmax.f32 %v768_v17, 0.0 }
 0x4c0   :  { %v796_v21 = vpack.c.bf16 %v790_v18, %v789_v13 }
 0x4c1   :  { %v795_v22 = vpack.c.bf16 %v788_v20, %v787_v16 }
 0x4c3   :  { %1453 = vmatprep.mubr.bf16.mxu1 %v795_v22 }
 0x4c4   :  { %1454 = vmatmul.mubr.bf16.gmra.mrb[28].mxu1 %v796_v21 }
 0x4c5   :  { %1469 = vmatprep.mubr.msk.bf16.mxu1 %vm1689_vm1, %v1688_v23 }
 0x587   :  { %v1447_v29 = vpop.f32.mrb[20].mxu1 }
 0x588   :  { %v871_v30 = vadd.f32 %v1447_v29, %v1223_v27  ;;  %v862_v31 = vpop.f32.mrb[21].mxu1 }
 0x589   :  { %v863_v33 = vadd.f32 %v1223_v27, %v862_v31  ;;  %v1448_v34 = vpop.f32.mrb[22].mxu1 }
 0x58a   :  { %v1937_v35 = vmax.f32 %v871_v30, 0.0  ;;  %v874_v36 = vadd.f32 %v1448_v34, %v1223_v27  ;;  %v865_v37 = vpop.f32.mrb[23].mxu1 }
 0x58b   :  { %v1939_v38 = vmax.f32 %v863_v33, 0.0  ;;  %v866_v39 = vadd.f32 %v1223_v27, %v865_v37 }
 0x58c   :  { %v1941_v40 = vmax.f32 %v874_v36, 0.0  ;;  %v1064_v41 = vmul.f32 %v1060_v32, %v1937_v35 }
 0x58d   :  { %v1944_v42 = vmax.f32 %v866_v39, 0.0  ;;  %v1062_v43 = vmul.f32 %v1060_v32, %v1939_v38 }
 0x58e   :  { %1070 = vadd.xlane.f32.xlu1 %v1064_v41  ;;  %v1065_v48 = vmul.f32 %v1060_v32, %v1941_v40  ;;  %v924_v54 = vpack.c.bf16 %v1941_v40, %v1937_v35 }
 0x58f   :  { %v923_v44 = vpack.c.bf16 %v1944_v42, %v1939_v38  ;;  %1066 = vadd.xlane.f32.xlu0 %v1062_v43  ;;  %v1451_v45 = vpop.f32.mrb[24].mxu1  ;;  %v1063_v50 = vmul.f32 %v1060_v32, %v1944_v42 }
 0x590   :  { %v887_v46 = vadd.f32 %v1451_v45, %v1223_v27  ;;  %v878_v47 = vpop.f32.mrb[25].mxu1 }
 0x591   :  { %v879_v49 = vadd.f32 %v1223_v27, %v878_v47  ;;  %v1452_v8 = vpop.f32.mrb[26].mxu1  ;;  %1458 = vmatpush3.bf16.msra.mxu0 %v923_v44 }
 0x592   :  { %v890_v52 = vadd.f32 %v1452_v8, %v1223_v27  ;;  %1072 = vadd.xlane.f32.xlu1 %v1065_v48  ;;  %v881_v53 = vpop.f32.mrb[27].mxu1  ;;  %1459 = vmatprep.subr.bf16.mxu0 %v1688_v23  ;;  %v915_v56 = vmax.f32 %v887_v46, 0.0 }
 0x593   :  { %v882_v55 = vadd.f32 %v1223_v27, %v881_v53  ;;  %1068 = vadd.xlane.f32.xlu0 %v1063_v50  ;;  %v913_v59 = vmax.f32 %v879_v49, 0.0 }
 0x594   :  { %v916_v57 = vmax.f32 %v890_v52, 0.0 }
 0x595   :  { %v914_v60 = vmax.f32 %v882_v55, 0.0  ;;  %1460 = vmatpush3.bf16.msra.mxu0 %v924_v54 }
 0x596   :  { %v926_v61 = vpack.c.bf16 %v916_v57, %v915_v56  ;;  %1473 = vmatprep.subr.bf16.mxu0 %v1688_v23 }
 0x597   :  { %v925_v62 = vpack.c.bf16 %v914_v60, %v913_v59  ;;  %v1455_v63 = vpop.f32.mrb[28].mxu1 }
 0x598   :  { %v903_v0 = vadd.f32 %v1455_v63, %v1223_v27  ;;  %v894_v19 = vpop.f32.mrb[29].mxu1  ;;  %1462 = vmatmul.mubr.msk.bf16.vlgmr.msra.gmra.mrb[32].mxu0 %vm122_vm0, %v922_v58 }
 0x599   :  { %1466 = vmatpush3.bf16.msra.mxu1 %v925_v62  ;;  %v895_v1 = vadd.f32 %v1223_v27, %v894_v19  ;;  %v1456_v2 = vpop.f32.mrb[30].mxu1  ;;  %1477 = vmatprep.mubr.msk.bf16.mxu0 %vm1689_vm1, %v1688_v23 }
 0x59a   :  { %1467 = vmatprep.subr.bf16.mxu1 %v1688_v23  ;;  %v919_v3 = vmax.f32 %v903_v0, 0.0  ;;  %v906_v4 = vadd.f32 %v1456_v2, %v1223_v27  ;;  %v897_v5 = vpop.f32.mrb[31].mxu1 }
 0x59b   :  { %v917_v6 = vmax.f32 %v895_v1, 0.0  ;;  %v898_v7 = vadd.f32 %v1223_v27, %v897_v5 }
 0x59c   :  { %v920_v9 = vmax.f32 %v906_v4, 0.0 }
 0x59d   :  { %1468 = vmatpush3.bf16.msra.mxu1 %v926_v61  ;;  %v918_v10 = vmax.f32 %v898_v7, 0.0 }
 0x59e   :  { %v928_v11 = vpack.c.bf16 %v920_v9, %v919_v3  ;;  %1492 = vmatprep.subr.bf16.mxu1 %v1690_v12 }
 0x59f   :  { %v927_v13 = vpack.c.bf16 %v918_v10, %v917_v6 }
 0x5a0   :  { %1470 = vmatmul.mubr.msk.bf16.vlgmr.msra.gmra.mrb[32].mxu1 %vm122_vm0, %v922_v58 }
 0x5a1   :  { %1474 = vmatpush3.bf16.msra.mxu0 %v927_v13  ;;  %1489 = vmatprep.mubr.msk.f32.mxu1 %vm1689_vm1, %v1688_v23 }
 0x5a2   :  { %1475 = vmatprep.subr.bf16.mxu0 %v1688_v23 }
 0x5a5   :  { %1476 = vmatpush3.bf16.msra.mxu0 %v928_v11 }
 0x5a6   :  { %1494 = vmatpush3.bf16.xpose.msra.mxu1 %v923_v44 }
 0x5a7   :  { %1495 = vmatprep.subr.bf16.mxu1 %v1690_v12 }
 0x5a8   :  { %1478 = vmatmul.mubr.msk.bf16.vlgmr.msra.gmra.mrb[36].mxu0 %vm122_vm0, %v922_v58 }
 0x5ae   :  { %1497 = vmatpush3.bf16.xpose.msra.mxu1 %v924_v54 }
 0x5b5   :  { %1490 = vmatmul.mubr.f32.vlgmr.msra.gmra.mrb[36].mxu1 %v1934_v28 }
 0x61b   :  { %v1071_v14 = vpop.xlane.xlu1 %1070 }
 0x61c   :  { %1510 = vtanh.f32 %v1071_v14  ;;  %v1067_v15 = vpop.xlane.xlu0 %1066 }
 0x61d   :  { %1512 = vtanh.f32 %v1067_v15 }
 0x61f   :  { %v1073_v16 = vpop.xlane.xlu1 %1072 }
 0x620   :  { %1514 = vtanh.f32 %v1073_v16  ;;  %v1069_v17 = vpop.xlane.xlu0 %1068 }
 0x621   :  { %1516 = vtanh.f32 %v1069_v17 }
 0x626   :  { %v1511_v18 = vpop.eup %1510 }
 0x627   :  { %v1513_v20 = vpop.eup %1512  ;;  %v1080_v21 = vmul.f32 %v1511_v18, %v1937_v35 }
 0x628   :  { %v1078_v22 = vmul.f32 %v1513_v20, %v1939_v38 }
 0x629   :  { %1084 = vst [vmem:[%s2040_s17 + $0x10] sm:$0xff] %v1080_v21 }
 0x62a   :  { %v1515_v23 = vpop.eup %1514  ;;  %1082 = vst [vmem:[%s2040_s17] sm:$0xff] %v1078_v22 }
 0x62b   :  { %v1517_v24 = vpop.eup %1516  ;;  %v1081_v25 = vmul.f32 %v1515_v23, %v1941_v40 }
 0x62c   :  { %v1079_v26 = vmul.f32 %v1517_v24, %v1944_v42 }
 0x62d   :  { %1085 = vst [vmem:[%s2040_s17 + $0x18] sm:$0xff] %v1081_v25 }
 0x62e   :  { %1083 = vst [vmem:[%s2040_s17 + $0x8] sm:$0xff] %v1079_v26 }
 0x66b   :  { %v966_v27 = vpop.f32.mrb[32].mxu0 }
 0x66c   :  { %972 = vst [vmem:[#allocation11] sm:$0x3] %v966_v27  ;;  %v1463_v28 = vpop.f32.mrb[33].mxu0 }
 0x66d   :  { %v969_v29 = vpop.f32.mrb[34].mxu0 }
 0x66e   :  { %1617 = shalt.err (!%p1614_p8)
}
 0x66f   :  { %s1618_s30 = scalar_lea.hbm %s2037_s14, 32 }
 0x670   :  { %p1619_p9 = scmp.ne.s32.totalorder %s2037_s14, %s1618_s30  ;;  %p1622_p10 = scmp.lt.u32.totalorder %s1618_s30, %s2037_s14 }
 0x672   :  { %p1624_p11 = pnand %p1622_p10, %p1619_p9 }
 0x674   :  { %1627 = shalt.err (!%p1624_p11)
}
 0x675   :  { %1167 = dma.vmem_to_hbm [thread:$0]  %s1165_s26, 32, %s2037_s14, [#allocation5]   ;;  %v1464_v30 = vpop.f32.mrb[35].mxu0  ;;  %v1007_v31 = vpop.f32.mrb[32].mxu1 }
 0x676   :  { %s1692_s23 = smov [#allocation12]   ;;  %1013 = vst [vmem:[#allocation12] sm:$0x3] %v1007_v31  ;;  %v1471_v32 = vpop.f32.mrb[33].mxu1 }
 0x677   :  { %s1174_s10 = sshll.u32 %s1692_s23, 4  ;;  %v1010_v33 = vpop.f32.mrb[34].mxu1  ;;  %s1175_s10 = int_to_ptr.vmem [resolvable:$true] %s1174_s10 }
 0x678   :  { %s1628_s11 = scalar_lea.vmem %s1175_s10, 32  ;;  %p1633_p13 = scmp.lt.s32.totalorder %s1175_s10, %s1175_s10 }
 0x679   :  { %p1629_p12 = scmp.ne.s32.totalorder %s1175_s10, %s1628_s11  ;;  %p1634_p0 = scmp.lt.s32.totalorder %s1628_s11, %s1628_s11 }
 0x67b   :  { %p1635_p1 = por %p1634_p0, %p1633_p13 }
 0x67d   :  { %p1636_p2 = pnand %p1635_p1, %p1629_p12 }
 0x67f   :  { %1639 = shalt.err (!%p1636_p2)
}
 0x680   :  { %s1640_s12 = scalar_lea.hbm %s2038_s15, 32 }
 0x681   :  { %p1641_p3 = scmp.ne.s32.totalorder %s2038_s15, %s1640_s12  ;;  %p1644_p4 = scmp.lt.u32.totalorder %s1640_s12, %s2038_s15 }
 0x683   :  { %p1646_p5 = pnand %p1644_p4, %p1641_p3 }
 0x685   :  { %1649 = shalt.err (!%p1646_p5)
}
 0x686   :  { %1177 = dma.vmem_to_hbm [thread:$0]  %s1175_s10, 32, %s2038_s15, [#allocation13]   ;;  %v1472_v34 = vpop.f32.mrb[35].mxu1  ;;  %v1048_v35 = vpop.f32.mrb[36].mxu0 }
 0x687   :  { %s1693_s19 = smov [#allocation14]   ;;  %1054 = vst [vmem:[#allocation14] sm:$0x3] %v1048_v35  ;;  %v1479_v36 = vpop.f32.mrb[37].mxu0 }
 0x688   :  { %s1184_s1 = sshll.u32 %s1693_s19, 4  ;;  %v1051_v37 = vpop.f32.mrb[38].mxu0  ;;  %s1185_s1 = int_to_ptr.vmem [resolvable:$true] %s1184_s1 }
 0x689   :  { %s1650_s20 = scalar_lea.vmem %s1185_s1, 32  ;;  %p1655_p7 = scmp.lt.s32.totalorder %s1185_s1, %s1185_s1 }
 0x68a   :  { %p1651_p6 = scmp.ne.s32.totalorder %s1185_s1, %s1650_s20  ;;  %p1656_p8 = scmp.lt.s32.totalorder %s1650_s20, %s1650_s20 }
 0x68c   :  { %p1657_p9 = por %p1656_p8, %p1655_p7 }
 0x68e   :  { %p1658_p10 = pnand %p1657_p9, %p1651_p6 }
 0x690   :  { %1661 = shalt.err (!%p1658_p10)
}
 0x691   :  { %s1662_s26 = scalar_lea.hbm %s2039_s16, 32 }
 0x692   :  { %p1663_p11 = scmp.ne.s32.totalorder %s2039_s16, %s1662_s26  ;;  %p1666_p12 = scmp.lt.u32.totalorder %s1662_s26, %s2039_s16 }
 0x694   :  { %p1668_p13 = pnand %p1666_p12, %p1663_p11 }
 0x696   :  { %1671 = shalt.err (!%p1668_p13)
}
 0x697   :  { %1187 = dma.vmem_to_hbm [thread:$0]  %s1185_s1, 32, %s2039_s16, [#allocation13]   ;;  %v1480_v38 = vpop.f32.mrb[39].mxu0  ;;  %vm1156_vm2 = vcmask 253952   ;;  %v1152_v39 = vpop.f32.mrb[36].mxu1 }
 0x698   :  { %1157 = vst.msk [vmem:[%s2041_s18] sm:$0x1] %vm1156_vm2, %v1152_v39  ;;  %v1491_v40 = vpop.f32.mrb[37].mxu1 }
 0x699   :  { %1678 = dma.done.wait [#allocation5], 32  }
 0x69a   :  { %1679 = vsyncadd [#allocation5], 4294967264 }
 0x69b   :  { %1680 = dma.done.wait [#allocation13], 64  }
 0x69c   :  { %1681 = vsyncadd [#allocation13], 4294967232 }
 0x69d   :  { %1205 = vsyncpa [#allocation4], 1 }
 0x69e   :  { %1206 = vsyncpa [#allocation7], 1 }
 0x69f   :  { %1207 = vsyncpa [#allocation10], 1 }
 0x6a0   :  { %1208 = vsyncpa [#allocation5], 1 }
 0x6a1   :  { %1209 = vsyncpa [#allocation13], 1 }

// kernel: hdgcl_forward.4
= control target key start
LH: loop header
LB: loop body
LE: loop exit
PB: predicated region body
PF: predicated region fallthrough
CT: control target
= control target key end

     0   :  { %s1717_s0 = inlined_call_operand.vmem [shape: f32[16,16], index: 0, kind: input, shape index: {}]   ;;  %s1718_s1 = inlined_call_operand.vmem [shape: f32[16,128], index: 1, kind: input, shape index: {}]   ;;  %s1719_s2 = inlined_call_operand.vmem [shape: f32[1,128], index: 2, kind: input, shape index: {}]   ;;  %s1720_s3 = inlined_call_operand.vmem [shape: f32[1,128], index: 3, kind: input, shape index: {}]   ;;  %s1721_s4 = inlined_call_operand.vmem [shape: f32[2,16], index: 4, kind: input, shape index: {}]   ;;  %s1722_s5 = inlined_call_operand.vmem [shape: f32[128,128], index: 5, kind: input, shape index: {}]   ;;  %s1723_s6 = inlined_call_operand.vmem [shape: f32[1,128], index: 6, kind: input, shape index: {}]   ;;  %s1724_s7 = inlined_call_operand.vmem [shape: f32[128,128], index: 7, kind: input, shape index: {}]   ;;  %s1725_s8 = inlined_call_operand.vmem [shape: f32[1,128], index: 8, kind: input, shape index: {}]   ;;  %s1726_s9 = inlined_call_operand.vmem [shape: f32[128,128], index: 9, kind: input, shape index: {}]   ;;  %s1727_s10 = inlined_call_operand.vmem [shape: f32[1,128], index: 10, kind: input, shape index: {}]   ;;  %s1728_s11 = inlined_call_operand.vmem [shape: f32[128,128], index: 11, kind: input, shape index: {}]   ;;  %s1729_s12 = inlined_call_operand.vmem [shape: f32[1,128], index: 12, kind: input, shape index: {}]   ;;  %s1730_s13 = inlined_call_operand.vmem [shape: f32[1,128], index: 13, kind: input, shape index: {}]   ;;  %s1731_s14 = inlined_call_operand.hbm [shape: f32[2,128], index: 14, kind: output, shape index: {0}]   ;;  %s1732_s15 = inlined_call_operand.hbm [shape: f32[2,128], index: 15, kind: output, shape index: {1}]   ;;  %s1733_s16 = inlined_call_operand.hbm [shape: f32[2,128], index: 16, kind: output, shape index: {2}]   ;;  %s1734_s17 = inlined_call_operand.vmem [shape: f32[16,128], index: 17, kind: output, shape index: {3}]   ;;  %s1735_s18 = inlined_call_operand.vmem [shape: f32[1,16], index: 18, kind: output, shape index: {4}]  }
   0x1   :  { %1738 = sst [smem:[#allocation10_spill]] %s1717_s0 }
   0x2   :  { %1739 = sst [smem:[#allocation11_spill]] %s1718_s1 }
   0x3   :  { %1740 = sst [smem:[#allocation12_spill]] %s1719_s2 }
   0x4   :  { %24 = vsyncpa [#allocation4], 0  ;;  %s1741_s29 = sld [smem:[#allocation11_spill]]  ;;  %s1742_s20 = sld [smem:[#allocation10_spill]]  ;;  %v1251_v3 = vmov 0.0   ;;  %vm1252_vm0 = vmmov 0  }
   0x5   :  { %1007 = vmatprep.subr.bf16.mxu0 %v1251_v3  ;;  %1009 = vmatprep.mubr.msk.bf16.mxu0 %vm1252_vm0, %v1251_v3  ;;  %v139_v6 = vld [vmem:[%s1722_s5] sm:$0xff]  ;;  %v140_v7 = vld [vmem:[%s1722_s5 + $0x8] sm:$0xff]  ;;  %v141_v10 = vld [vmem:[%s1722_s5 + $0x10] sm:$0xff]  ;;  %vm61_vm1 = vcmask 130048  }
   0x6   :  { %1013 = vmatprep.subr.bf16.mxu1 %v1251_v3  ;;  %v155_v9 = vpack.c.bf16 %v140_v7, %v139_v6  ;;  %v142_v11 = vld [vmem:[%s1722_s5 + $0x18] sm:$0xff]  ;;  %1029 = vmatprep.mubr.msk.bf16.mxu1 %vm1252_vm0, %v1251_v3  ;;  %v143_v13 = vld [vmem:[%s1722_s5 + $0x20] sm:$0xff]  ;;  %v144_v14 = vld [vmem:[%s1722_s5 + $0x28] sm:$0xff] }
   0x7   :  { %v156_v12 = vpack.c.bf16 %v142_v11, %v141_v10 }
   0x8   :  { %1014 = vmatpush3.bf16.msra.mxu1 %v155_v9 }
   0x9   :  { %1015 = vmatprep.subr.bf16.mxu1 %v1251_v3 }
   0xa   :  { %v58_v0 = vld [vmem:[%s1741_s29] sm:$0xff]  ;;  %v59_v1 = vld [vmem:[%s1741_s29 + $0x8] sm:$0xff] }
   0xb   :  { %v55_v2 = vld [vmem:[%s1742_s20] sm:$0xff]  ;;  %v60_v4 = vpack.c.bf16 %v59_v1, %v58_v0  ;;  %v56_v5 = vld [vmem:[%s1742_s20 + $0x8] sm:$0xff] }
   0xc   :  { %v1373_v8 = vpack.c.bf16 %v56_v5, %v55_v2 }
   0xd   :  { %1008 = vmatpush3.bf16.msra.mxu0 %v60_v4 }
   0xe   :  { %1041 = vmatprep.subr.bf16.mxu0 %v1251_v3 }
  0x10   :  { %1010 = vmatmul.mubr.msk.bf16.vlgmr.msra.gmra.mrb[0].mxu0 %vm61_vm1, %v1373_v8 }
  0x11   :  { %25 = vsyncpa [#allocation6], 0  ;;  %1057 = vmatprep.mubr.msk.bf16.mxu0 %vm1252_vm0, %v1251_v3  ;;  %1016 = vmatpush3.bf16.msra.mxu1 %v156_v12  ;;  %v157_v15 = vpack.c.bf16 %v144_v14, %v143_v13  ;;  %v145_v16 = vld [vmem:[%s1722_s5 + $0x30] sm:$0xff]  ;;  %v146_v17 = vld [vmem:[%s1722_s5 + $0x38] sm:$0xff]  ;;  %s1743_s1 = sld [smem:[#allocation12_spill]]  ;;  %s1254_s22 = smov [#allocation3]  }
  0x12   :  { %1017 = vmatprep.subr.bf16.mxu1 %v1251_v3  ;;  %v158_v18 = vpack.c.bf16 %v146_v17, %v145_v16  ;;  %v147_v19 = vld [vmem:[%s1722_s5 + $0x40] sm:$0xff]  ;;  %v148_v20 = vld [vmem:[%s1722_s5 + $0x48] sm:$0xff]  ;;  %v149_v22 = vld [vmem:[%s1722_s5 + $0x50] sm:$0xff]  ;;  %s890_s2 = sshll.u32 %s1254_s22, 4  ;;  %s891_s2 = int_to_ptr.vmem [resolvable:$true] %s890_s2 }
  0x13   :  { %v159_v21 = vpack.c.bf16 %v148_v20, %v147_v19  ;;  %v150_v23 = vld [vmem:[%s1722_s5 + $0x58] sm:$0xff]  ;;  %v151_v25 = vld [vmem:[%s1722_s5 + $0x60] sm:$0xff]  ;;  %v152_v26 = vld [vmem:[%s1722_s5 + $0x68] sm:$0xff]  ;;  %s1181_s23 = scalar_lea.vmem %s891_s2, 32  ;;  %p1186_p1 = scmp.lt.s32.totalorder %s891_s2, %s891_s2 }
  0x14   :  { %v160_v24 = vpack.c.bf16 %v150_v23, %v149_v22  ;;  %v161_v27 = vpack.c.bf16 %v152_v26, %v151_v25  ;;  %v153_v28 = vld [vmem:[%s1722_s5 + $0x70] sm:$0xff]  ;;  %v154_v29 = vld [vmem:[%s1722_s5 + $0x78] sm:$0xff]  ;;  %v236_v31 = vld [vmem:[%s1724_s7] sm:$0xff]  ;;  %p1182_p0 = scmp.ne.s32.totalorder %s891_s2, %s1181_s23  ;;  %p1187_p2 = scmp.lt.s32.totalorder %s1181_s23, %s1181_s23 }
  0x15   :  { %1018 = vmatpush3.bf16.msra.mxu1 %v157_v15  ;;  %v162_v30 = vpack.c.bf16 %v154_v29, %v153_v28  ;;  %v237_v32 = vld [vmem:[%s1724_s7 + $0x8] sm:$0xff]  ;;  %v238_v33 = vld [vmem:[%s1724_s7 + $0x10] sm:$0xff]  ;;  %v239_v35 = vld [vmem:[%s1724_s7 + $0x18] sm:$0xff] }
  0x16   :  { %1019 = vmatprep.subr.bf16.mxu1 %v1251_v3  ;;  %v252_v34 = vpack.c.bf16 %v237_v32, %v236_v31  ;;  %v253_v36 = vpack.c.bf16 %v239_v35, %v238_v33  ;;  %v240_v37 = vld [vmem:[%s1724_s7 + $0x20] sm:$0xff]  ;;  %v241_v38 = vld [vmem:[%s1724_s7 + $0x28] sm:$0xff]  ;;  %v242_v40 = vld [vmem:[%s1724_s7 + $0x30] sm:$0xff]  ;;  %p1188_p3 = por %p1187_p2, %p1186_p1 }
  0x17   :  { %v254_v39 = vpack.c.bf16 %v241_v38, %v240_v37  ;;  %v243_v41 = vld [vmem:[%s1724_s7 + $0x38] sm:$0xff]  ;;  %v244_v43 = vld [vmem:[%s1724_s7 + $0x40] sm:$0xff]  ;;  %v245_v44 = vld [vmem:[%s1724_s7 + $0x48] sm:$0xff] }
  0x18   :  { %1042 = vmatpush3.bf16.msra.mxu0 %v252_v34  ;;  %v255_v42 = vpack.c.bf16 %v243_v41, %v242_v40  ;;  %v256_v45 = vpack.c.bf16 %v245_v44, %v244_v43  ;;  %v246_v46 = vld [vmem:[%s1724_s7 + $0x50] sm:$0xff]  ;;  %v247_v47 = vld [vmem:[%s1724_s7 + $0x58] sm:$0xff]  ;;  %v934_v49 = vld [vmem:[%s1743_s1] ss:$0 sm:$0xff]  ;;  %p1189_p4 = pnand %p1188_p3, %p1182_p0 }
  0x19   :  { %1020 = vmatpush3.bf16.msra.mxu1 %v158_v18  ;;  %1043 = vmatprep.subr.bf16.mxu0 %v1251_v3  ;;  %v257_v48 = vpack.c.bf16 %v247_v47, %v246_v46  ;;  %v935_v51 = vld [vmem:[%s1720_s3] ss:$0 sm:$0xff]  ;;  %v249_v63 = vld [vmem:[%s1724_s7 + $0x68] sm:$0xff]  ;;  %v250_v1 = vld [vmem:[%s1724_s7 + $0x70] sm:$0xff] }
  0x1a   :  { %1021 = vmatprep.subr.bf16.mxu1 %v1251_v3  ;;  %v248_v62 = vld [vmem:[%s1724_s7 + $0x60] sm:$0xff]  ;;  %v251_v2 = vld [vmem:[%s1724_s7 + $0x78] sm:$0xff] }
  0x1b   :  { %v258_v0 = vpack.c.bf16 %v249_v63, %v248_v62  ;;  %v259_v4 = vpack.c.bf16 %v251_v2, %v250_v1  ;;  %v936_v5 = vld [vmem:[%s1723_s6] ss:$0 sm:$0xff] }
  0x1c   :  { %1044 = vmatpush3.bf16.msra.mxu0 %v253_v36  ;;  %v937_v34 = vld [vmem:[%s1725_s8] ss:$0 sm:$0xff] }
  0x1d   :  { %1022 = vmatpush3.bf16.msra.mxu1 %v159_v21  ;;  %1045 = vmatprep.subr.bf16.mxu0 %v1251_v3 }
  0x1e   :  { %1023 = vmatprep.subr.bf16.mxu1 %v1251_v3 }
  0x20   :  { %1046 = vmatpush3.bf16.msra.mxu0 %v254_v39 }
  0x21   :  { %1024 = vmatpush3.bf16.msra.mxu1 %v160_v24  ;;  %1047 = vmatprep.subr.bf16.mxu0 %v1251_v3 }
  0x22   :  { %1025 = vmatprep.subr.bf16.mxu1 %v1251_v3 }
  0x24   :  { %1048 = vmatpush3.bf16.msra.mxu0 %v255_v42 }
  0x25   :  { %1026 = vmatpush3.bf16.msra.mxu1 %v161_v27  ;;  %1049 = vmatprep.subr.bf16.mxu0 %v1251_v3 }
  0x26   :  { %1027 = vmatprep.subr.bf16.mxu1 %v1251_v3 }
  0x28   :  { %1050 = vmatpush3.bf16.msra.mxu0 %v256_v45 }
  0x29   :  { %1028 = vmatpush3.bf16.msra.mxu1 %v162_v30  ;;  %1051 = vmatprep.subr.bf16.mxu0 %v1251_v3 }
  0x2a   :  { %1069 = vmatprep.subr.bf16.mxu1 %v1251_v3 }
  0x2c   :  { %1052 = vmatpush3.bf16.msra.mxu0 %v257_v48 }
  0x2d   :  { %1053 = vmatprep.subr.bf16.mxu0 %v1251_v3 }
  0x30   :  { %1054 = vmatpush3.bf16.msra.mxu0 %v258_v0 }
  0x31   :  { %1055 = vmatprep.subr.bf16.mxu0 %v1251_v3 }
  0x34   :  { %1056 = vmatpush3.bf16.msra.mxu0 %v259_v4  ;;  %v475_v4 = vld [vmem:[%s1726_s9 + $0x20] sm:$0xff] }
  0x35   :  { %1075 = vmatprep.subr.bf16.mxu0 %v1251_v3 }
  0xe3   :  { %v99_v50 = vpop.f32.mrb[0].mxu0 }
  0xe4   :  { %v1011_v52 = vpop.f32.mrb[1].mxu0  ;;  %v115_v53 = vmul.f32 %v934_v49, %v99_v50  ;;  %v126_v55 = vmul.f32 %v935_v51, %v99_v50 }
  0xe5   :  { %v102_v54 = vpop.f32.mrb[2].mxu0  ;;  %v471_v52 = vld [vmem:[%s1726_s9] sm:$0xff] }
  0xe6   :  { %v116_v56 = vmul.f32 %v934_v49, %v102_v54  ;;  %v127_v57 = vmul.f32 %v935_v51, %v102_v54  ;;  %v136_v58 = vpack.c.bf16 %v102_v54, %v99_v50  ;;  %v1012_v59 = vpop.f32.mrb[3].mxu0 }
  0xe8   :  { %1030 = vmatmul.mubr.bf16.vlgmr.msra.gmra.mrb[0].mxu1 %v136_v58  ;;  %v137_v60 = vpack.c.bf16 %v116_v56, %v115_v53  ;;  %v138_v61 = vpack.c.bf16 %v127_v57, %v126_v55  ;;  %v472_v53 = vld [vmem:[%s1726_s9 + $0x8] sm:$0xff] }
  0xe9   :  { %1033 = vmatprep.mubr.msk.bf16.mxu1 %vm1252_vm0, %v1251_v3  ;;  %v487_v58 = vpack.c.bf16 %v472_v53, %v471_v52 }
  0xf0   :  { %1034 = vmatmul.mubr.bf16.gmra.mrb[4].mxu1 %v137_v60  ;;  %v473_v60 = vld [vmem:[%s1726_s9 + $0x10] sm:$0xff] }
  0xf1   :  { %1037 = vmatprep.mubr.msk.bf16.mxu1 %vm1252_vm0, %v1251_v3 }
  0xf8   :  { %1038 = vmatmul.mubr.bf16.gmra.mrb[8].mxu1 %v138_v61  ;;  %v474_v61 = vld [vmem:[%s1726_s9 + $0x18] sm:$0xff] }
  0xf9   :  { %1071 = vmatprep.mubr.msk.bf16.mxu1 %vm1252_vm0, %v1251_v3  ;;  %v488_v2 = vpack.c.bf16 %v474_v61, %v473_v60  ;;  %v583_v60 = vld [vmem:[%s1728_s11 + $0x78] sm:$0xff] }
 0x1bb   :  { %v204_v6 = vpop.f32.mrb[0].mxu1 }
 0x1bc   :  { %v205_v7 = vadd.f32 %v936_v5, %v204_v6  ;;  %v1031_v9 = vpop.f32.mrb[1].mxu1 }
 0x1bd   :  { %v207_v10 = vpop.f32.mrb[2].mxu1  ;;  %v477_v9 = vld [vmem:[%s1726_s9 + $0x30] sm:$0xff] }
 0x1be   :  { %v208_v11 = vadd.f32 %v936_v5, %v207_v10  ;;  %v1032_v12 = vpop.f32.mrb[3].mxu1  ;;  %v227_v13 = vmax.f32 %v205_v7, 0.0  ;;  %v478_v10 = vld [vmem:[%s1726_s9 + $0x38] sm:$0xff] }
 0x1bf   :  { %v479_v12 = vld [vmem:[%s1726_s9 + $0x40] sm:$0xff] }
 0x1c0   :  { %v228_v14 = vmax.f32 %v208_v11, 0.0  ;;  %v490_v11 = vpack.c.bf16 %v478_v10, %v477_v9 }
 0x1c2   :  { %v233_v15 = vpack.c.bf16 %v228_v14, %v227_v13  ;;  %v480_v13 = vld [vmem:[%s1726_s9 + $0x48] sm:$0xff] }
 0x1c3   :  { %v212_v16 = vpop.f32.mrb[4].mxu1  ;;  %v491_v14 = vpack.c.bf16 %v480_v13, %v479_v12 }
 0x1c4   :  { %v213_v17 = vadd.f32 %v936_v5, %v212_v16  ;;  %v1035_v18 = vpop.f32.mrb[5].mxu1  ;;  %1058 = vmatmul.mubr.bf16.vlgmr.msra.gmra.mrb[4].mxu0 %v233_v15  ;;  %v482_v15 = vld [vmem:[%s1726_s9 + $0x58] sm:$0xff] }
 0x1c5   :  { %v215_v19 = vpop.f32.mrb[6].mxu1  ;;  %1061 = vmatprep.mubr.msk.bf16.mxu0 %vm1252_vm0, %v1251_v3  ;;  %v484_v18 = vld [vmem:[%s1726_s9 + $0x68] sm:$0xff] }
 0x1c6   :  { %v216_v20 = vadd.f32 %v936_v5, %v215_v19  ;;  %v1036_v21 = vpop.f32.mrb[7].mxu1  ;;  %v229_v22 = vmax.f32 %v213_v17, 0.0  ;;  %v483_v17 = vld [vmem:[%s1726_s9 + $0x60] sm:$0xff] }
 0x1c7   :  { %v493_v19 = vpack.c.bf16 %v484_v18, %v483_v17  ;;  %v486_v21 = vld [vmem:[%s1726_s9 + $0x78] sm:$0xff] }
 0x1c8   :  { %v230_v23 = vmax.f32 %v216_v20, 0.0  ;;  %v485_v20 = vld [vmem:[%s1726_s9 + $0x70] sm:$0xff] }
 0x1ca   :  { %v234_v24 = vpack.c.bf16 %v230_v23, %v229_v22  ;;  %v494_v22 = vpack.c.bf16 %v486_v21, %v485_v20  ;;  %v568_v23 = vld [vmem:[%s1728_s11] sm:$0xff] }
 0x1cb   :  { %v220_v25 = vpop.f32.mrb[8].mxu1 }
 0x1cc   :  { %v221_v26 = vadd.f32 %v936_v5, %v220_v25  ;;  %v1039_v27 = vpop.f32.mrb[9].mxu1  ;;  %1062 = vmatmul.mubr.bf16.gmra.mrb[8].mxu0 %v234_v24  ;;  %v569_v24 = vld [vmem:[%s1728_s11 + $0x8] sm:$0xff]  ;;  %v570_v25 = vld [vmem:[%s1728_s11 + $0x10] sm:$0xff] }
 0x1cd   :  { %v223_v28 = vpop.f32.mrb[10].mxu1  ;;  %1065 = vmatprep.mubr.msk.bf16.mxu0 %vm1252_vm0, %v1251_v3  ;;  %v571_v27 = vld [vmem:[%s1728_s11 + $0x18] sm:$0xff] }
 0x1ce   :  { %v224_v29 = vadd.f32 %v936_v5, %v223_v28  ;;  %v1040_v30 = vpop.f32.mrb[11].mxu1  ;;  %v231_v31 = vmax.f32 %v221_v26, 0.0  ;;  %v476_v5 = vld [vmem:[%s1726_s9 + $0x28] sm:$0xff]  ;;  %v584_v26 = vpack.c.bf16 %v569_v24, %v568_v23  ;;  %v585_v28 = vpack.c.bf16 %v571_v27, %v570_v25 }
 0x1cf   :  { %v489_v7 = vpack.c.bf16 %v476_v5, %v475_v4  ;;  %v573_v30 = vld [vmem:[%s1728_s11 + $0x28] sm:$0xff]  ;;  %v795_v27 = vlaneseq }
 0x1d0   :  { %v232_v32 = vmax.f32 %v224_v29, 0.0  ;;  %v572_v29 = vld [vmem:[%s1728_s11 + $0x20] sm:$0xff] }
 0x1d2   :  { %v235_v33 = vpack.c.bf16 %v232_v32, %v231_v31  ;;  %v586_v31 = vpack.c.bf16 %v573_v30, %v572_v29  ;;  %v574_v32 = vld [vmem:[%s1728_s11 + $0x30] sm:$0xff]  ;;  %v942_v30 = vld [vmem:[%s1729_s12] ss:$0 sm:$0xff] }
 0x1d4   :  { %1066 = vmatmul.mubr.bf16.gmra.mrb[12].mxu0 %v235_v33  ;;  %v575_v33 = vld [vmem:[%s1728_s11 + $0x38] sm:$0xff] }
 0x1d5   :  { %1077 = vmatprep.mubr.msk.bf16.mxu0 %vm1252_vm0, %v1251_v3 }
 0x297   :  { %v301_v35 = vpop.f32.mrb[4].mxu0 }
 0x298   :  { %v302_v36 = vadd.f32 %v937_v34, %v301_v35  ;;  %v1059_v37 = vpop.f32.mrb[5].mxu0  ;;  %v576_v35 = vld [vmem:[%s1728_s11 + $0x40] sm:$0xff] }
 0x299   :  { %v304_v38 = vpop.f32.mrb[6].mxu0 }
 0x29a   :  { %v305_v39 = vadd.f32 %v937_v34, %v304_v38  ;;  %v1060_v40 = vpop.f32.mrb[7].mxu0  ;;  %v324_v41 = vmax.f32 %v302_v36, 0.0  ;;  %v577_v36 = vld [vmem:[%s1728_s11 + $0x48] sm:$0xff]  ;;  %v578_v38 = vld [vmem:[%s1728_s11 + $0x50] sm:$0xff] }
 0x29b   :  { %v588_v37 = vpack.c.bf16 %v577_v36, %v576_v35 }
 0x29c   :  { %v325_v42 = vmax.f32 %v305_v39, 0.0  ;;  %v579_v39 = vld [vmem:[%s1728_s11 + $0x58] sm:$0xff] }
 0x29d   :  { %v589_v40 = vpack.c.bf16 %v579_v39, %v578_v38 }
 0x29e   :  { %v330_v43 = vpack.c.bf16 %v325_v42, %v324_v41 }
 0x29f   :  { %v309_v44 = vpop.f32.mrb[8].mxu0 }
 0x2a0   :  { %v310_v45 = vadd.f32 %v937_v34, %v309_v44  ;;  %v1063_v46 = vpop.f32.mrb[9].mxu0  ;;  %1070 = vmatpush3.bf16.msra.mxu1 %v330_v43 }
 0x2a1   :  { %v312_v47 = vpop.f32.mrb[10].mxu0  ;;  %1081 = vmatprep.subr.bf16.mxu1 %v1251_v3 }
 0x2a2   :  { %v313_v48 = vadd.f32 %v937_v34, %v312_v47  ;;  %v1064_v49 = vpop.f32.mrb[11].mxu0  ;;  %v326_v50 = vmax.f32 %v310_v45, 0.0 }
 0x2a3   :  { %1072 = vmatmul.mubr.msk.bf16.vlgmr.msra.gmra.mrb[12].mxu1 %vm61_vm1, %v1373_v8 }
 0x2a4   :  { %v327_v51 = vmax.f32 %v313_v48, 0.0  ;;  %1083 = vmatprep.mubr.msk.bf16.mxu1 %vm1252_vm0, %v1251_v3 }
 0x2a6   :  { %v331_v54 = vpack.c.bf16 %v327_v51, %v326_v50 }
 0x2a7   :  { %v317_v55 = vpop.f32.mrb[12].mxu0 }
 0x2a8   :  { %v318_v56 = vadd.f32 %v937_v34, %v317_v55  ;;  %v1067_v57 = vpop.f32.mrb[13].mxu0  ;;  %1076 = vmatpush3.bf16.msra.mxu0 %v331_v54 }
 0x2a9   :  { %v320_v59 = vpop.f32.mrb[14].mxu0  ;;  %1087 = vmatprep.subr.bf16.mxu0 %v1251_v3  ;;  %v581_v57 = vld [vmem:[%s1728_s11 + $0x68] sm:$0xff] }
 0x2aa   :  { %v321_v62 = vadd.f32 %v937_v34, %v320_v59  ;;  %v1068_v63 = vpop.f32.mrb[15].mxu0  ;;  %v328_v0 = vmax.f32 %v318_v56, 0.0  ;;  %v587_v34 = vpack.c.bf16 %v575_v33, %v574_v32  ;;  %v580_v56 = vld [vmem:[%s1728_s11 + $0x60] sm:$0xff]  ;;  %v582_v59 = vld [vmem:[%s1728_s11 + $0x70] sm:$0xff] }
 0x2ab   :  { %1078 = vmatmul.mubr.msk.bf16.vlgmr.msra.gmra.mrb[16].mxu0 %vm61_vm1, %v1373_v8  ;;  %v591_v61 = vpack.c.bf16 %v583_v60, %v582_v59 }
 0x2ac   :  { %v329_v1 = vmax.f32 %v321_v62, 0.0  ;;  %1088 = vmatpush3.bf16.msra.mxu0 %v487_v58  ;;  %1103 = vmatprep.mubr.msk.bf16.mxu0 %vm1252_vm0, %v1251_v3  ;;  %v590_v58 = vpack.c.bf16 %v581_v57, %v580_v56  ;;  %v941_v62 = vld [vmem:[%s1727_s10] ss:$0 sm:$0xff] }
 0x2ad   :  { %1089 = vmatprep.subr.bf16.mxu0 %v1251_v3 }
 0x2ae   :  { %v332_v6 = vpack.c.bf16 %v329_v1, %v328_v0 }
 0x2b0   :  { %1082 = vmatpush3.bf16.msra.mxu1 %v332_v6  ;;  %1090 = vmatpush3.bf16.msra.mxu0 %v488_v2 }
 0x2b1   :  { %1091 = vmatprep.subr.bf16.mxu0 %v1251_v3  ;;  %1115 = vmatprep.subr.bf16.mxu1 %v1251_v3 }
 0x2b3   :  { %1084 = vmatmul.mubr.msk.bf16.vlgmr.msra.gmra.mrb[16].mxu1 %vm61_vm1, %v1373_v8  ;;  %v481_v8 = vld [vmem:[%s1726_s9 + $0x50] sm:$0xff] }
 0x2b4   :  { %1092 = vmatpush3.bf16.msra.mxu0 %v489_v7  ;;  %1131 = vmatprep.mubr.msk.bf16.mxu1 %vm1252_vm0, %v1251_v3  ;;  %v492_v16 = vpack.c.bf16 %v482_v15, %v481_v8 }
 0x2b5   :  { %1093 = vmatprep.subr.bf16.mxu0 %v1251_v3  ;;  %1116 = vmatpush3.bf16.msra.mxu1 %v584_v26 }
 0x2b6   :  { %1117 = vmatprep.subr.bf16.mxu1 %v1251_v3 }
 0x2b8   :  { %1094 = vmatpush3.bf16.msra.mxu0 %v490_v11 }
 0x2b9   :  { %1095 = vmatprep.subr.bf16.mxu0 %v1251_v3  ;;  %1118 = vmatpush3.bf16.msra.mxu1 %v585_v28  ;;  %v796_v28 = vshrl.u32 %v795_v27, 7 }
 0x2ba   :  { %1119 = vmatprep.subr.bf16.mxu1 %v1251_v3 }
 0x2bb   :  { %v797_v29 = vsub.s32 0, %v796_v28 }
 0x2bc   :  { %1096 = vmatpush3.bf16.msra.mxu0 %v491_v14 }
 0x2bd   :  { %1097 = vmatprep.subr.bf16.mxu0 %v1251_v3  ;;  %1120 = vmatpush3.bf16.msra.mxu1 %v586_v31  ;;  %v793_v31 = vld [vmem:[%s1730_s13] sm:$0x1] }
 0x2be   :  { %1121 = vmatprep.subr.bf16.mxu1 %v1251_v3  ;;  %v798_v35 = vrot.slane %v793_v31, %v797_v29 }
 0x2c0   :  { %1098 = vmatpush3.bf16.msra.mxu0 %v492_v16 }
 0x2c1   :  { %1099 = vmatprep.subr.bf16.mxu0 %v1251_v3  ;;  %1122 = vmatpush3.bf16.msra.mxu1 %v587_v34 }
 0x2c2   :  { %1123 = vmatprep.subr.bf16.mxu1 %v1251_v3 }
 0x2c4   :  { %1100 = vmatpush3.bf16.msra.mxu0 %v493_v19 }
 0x2c5   :  { %1101 = vmatprep.subr.bf16.mxu0 %v1251_v3  ;;  %1124 = vmatpush3.bf16.msra.mxu1 %v588_v37 }
 0x2c6   :  { %1125 = vmatprep.subr.bf16.mxu1 %v1251_v3 }
 0x2c8   :  { %1102 = vmatpush3.bf16.msra.mxu0 %v494_v22 }
 0x2c9   :  { %1143 = vmatprep.subr.bf16.mxu0 %v1251_v3  ;;  %1126 = vmatpush3.bf16.msra.mxu1 %v589_v40 }
 0x2ca   :  { %1127 = vmatprep.subr.bf16.mxu1 %v1251_v3 }
 0x2cd   :  { %1128 = vmatpush3.bf16.msra.mxu1 %v590_v58  ;;  %v1253_v58 = vmov 0.0|0.0  }
 0x2ce   :  { %1129 = vmatprep.subr.bf16.mxu1 %v1251_v3 }
 0x2d1   :  { %1130 = vmatpush3.bf16.msra.mxu1 %v591_v61 }
 0x2d2   :  { %1149 = vmatprep.subr.bf16.mxu1 %v1251_v3 }
 0x376   :  { %v367_v41 = vpop.f32.mrb[12].mxu1 }
 0x377   :  { %v1073_v42 = vpop.f32.mrb[13].mxu1 }
 0x378   :  { %v370_v43 = vpop.f32.mrb[14].mxu1  ;;  %v662_v42 = vld [vmem:[%s1721_s4] sm:$0x3] }
 0x379   :  { %v468_v44 = vpack.c.bf16 %v370_v43, %v367_v41  ;;  %v1074_v45 = vpop.f32.mrb[15].mxu1 }
 0x37a   :  { %v663_v45 = vpack.c.bf16 %v662_v42, %v662_v42 }
 0x37b   :  { %1104 = vmatmul.mubr.bf16.vlgmr.msra.gmra.mrb[20].mxu0 %v468_v44 }
 0x37c   :  { %1107 = vmatprep.mubr.msk.bf16.mxu0 %vm1252_vm0, %v1251_v3 }
 0x37e   :  { %v410_v46 = vpop.f32.mrb[16].mxu0 }
 0x37f   :  { %v1079_v47 = vpop.f32.mrb[17].mxu0 }
 0x380   :  { %v413_v48 = vpop.f32.mrb[18].mxu0 }
 0x381   :  { %v469_v49 = vpack.c.bf16 %v413_v48, %v410_v46  ;;  %v1080_v50 = vpop.f32.mrb[19].mxu0 }
 0x383   :  { %1108 = vmatmul.mubr.bf16.gmra.mrb[24].mxu0 %v469_v49 }
 0x384   :  { %1111 = vmatprep.mubr.msk.bf16.mxu0 %vm1252_vm0, %v1251_v3 }
 0x386   :  { %v453_v51 = vpop.f32.mrb[16].mxu1 }
 0x387   :  { %v1085_v52 = vpop.f32.mrb[17].mxu1 }
 0x388   :  { %v456_v53 = vpop.f32.mrb[18].mxu1 }
 0x389   :  { %v470_v54 = vpack.c.bf16 %v456_v53, %v453_v51  ;;  %v1086_v55 = vpop.f32.mrb[19].mxu1 }
 0x38b   :  { %1112 = vmatmul.mubr.bf16.gmra.mrb[28].mxu0 %v470_v54 }
 0x38c   :  { %1145 = vmatprep.mubr.msk.bf16.mxu0 %vm1252_vm0, %v1251_v3 }
 0x44e   :  { %v536_v63 = vpop.f32.mrb[20].mxu0 }
 0x44f   :  { %v537_v0 = vadd.f32 %v941_v62, %v536_v63  ;;  %v1105_v1 = vpop.f32.mrb[21].mxu0 }
 0x450   :  { %v539_v2 = vpop.f32.mrb[22].mxu0 }
 0x451   :  { %v540_v4 = vadd.f32 %v941_v62, %v539_v2  ;;  %v1106_v5 = vpop.f32.mrb[23].mxu0  ;;  %v559_v6 = vmax.f32 %v537_v0, 0.0 }
 0x453   :  { %v560_v7 = vmax.f32 %v540_v4, 0.0 }
 0x455   :  { %v565_v9 = vpack.c.bf16 %v560_v7, %v559_v6 }
 0x456   :  { %v544_v10 = vpop.f32.mrb[24].mxu0 }
 0x457   :  { %v545_v11 = vadd.f32 %v941_v62, %v544_v10  ;;  %v1109_v12 = vpop.f32.mrb[25].mxu0  ;;  %1132 = vmatmul.mubr.bf16.vlgmr.msra.gmra.mrb[20].mxu1 %v565_v9 }
 0x458   :  { %v547_v13 = vpop.f32.mrb[26].mxu0  ;;  %1135 = vmatprep.mubr.msk.bf16.mxu1 %vm1252_vm0, %v1251_v3 }
 0x459   :  { %v548_v14 = vadd.f32 %v941_v62, %v547_v13  ;;  %v1110_v8 = vpop.f32.mrb[27].mxu0  ;;  %v561_v15 = vmax.f32 %v545_v11, 0.0 }
 0x45b   :  { %v562_v16 = vmax.f32 %v548_v14, 0.0 }
 0x45d   :  { %v566_v17 = vpack.c.bf16 %v562_v16, %v561_v15 }
 0x45e   :  { %v552_v18 = vpop.f32.mrb[28].mxu0 }
 0x45f   :  { %1136 = vmatmul.mubr.bf16.gmra.mrb[24].mxu1 %v566_v17  ;;  %v553_v19 = vadd.f32 %v941_v62, %v552_v18  ;;  %v1113_v20 = vpop.f32.mrb[29].mxu0 }
 0x460   :  { %v555_v21 = vpop.f32.mrb[30].mxu0  ;;  %1139 = vmatprep.mubr.msk.bf16.mxu1 %vm1252_vm0, %v1251_v3 }
 0x461   :  { %v563_v22 = vmax.f32 %v553_v19, 0.0  ;;  %v556_v23 = vadd.f32 %v941_v62, %v555_v21  ;;  %v1114_v24 = vpop.f32.mrb[31].mxu0 }
 0x463   :  { %v564_v25 = vmax.f32 %v556_v23, 0.0 }
 0x465   :  { %v567_v26 = vpack.c.bf16 %v564_v25, %v563_v22 }
 0x467   :  { %1140 = vmatmul.mubr.bf16.gmra.mrb[28].mxu1 %v567_v26 }
 0x468   :  { %1151 = vmatprep.mubr.msk.bf16.mxu1 %vm1252_vm0, %v1251_v3 }
 0x52a   :  { %v633_v32 = vpop.f32.mrb[20].mxu1 }
 0x52b   :  { %v634_v33 = vadd.f32 %v942_v30, %v633_v32  ;;  %v1133_v34 = vpop.f32.mrb[21].mxu1 }
 0x52c   :  { %v636_v36 = vpop.f32.mrb[22].mxu1 }
 0x52d   :  { %v656_v37 = vmax.f32 %v634_v33, 0.0  ;;  %v637_v38 = vadd.f32 %v942_v30, %v636_v36  ;;  %v1134_v39 = vpop.f32.mrb[23].mxu1 }
 0x52f   :  { %v657_v40 = vmax.f32 %v637_v38, 0.0  ;;  %v800_v41 = vmul.f32 %v798_v35, %v656_v37 }
 0x531   :  { %v664_v43 = vpack.c.bf16 %v657_v40, %v656_v37  ;;  %802 = vadd.xlane.f32.xlu0 %v800_v41  ;;  %v801_v48 = vmul.f32 %v798_v35, %v657_v40 }
 0x532   :  { %v641_v44 = vpop.f32.mrb[24].mxu1 }
 0x533   :  { %v642_v46 = vadd.f32 %v942_v30, %v641_v44  ;;  %v1137_v47 = vpop.f32.mrb[25].mxu1  ;;  %1144 = vmatpush3.bf16.msra.mxu0 %v664_v43 }
 0x534   :  { %v644_v49 = vpop.f32.mrb[26].mxu1  ;;  %1155 = vmatprep.subr.bf16.mxu0 %v1251_v3 }
 0x535   :  { %v645_v50 = vadd.f32 %v942_v30, %v644_v49  ;;  %804 = vadd.xlane.f32.xlu0 %v801_v48  ;;  %v1138_v51 = vpop.f32.mrb[27].mxu1  ;;  %v658_v52 = vmax.f32 %v642_v46, 0.0 }
 0x536   :  { %1146 = vmatmul.mubr.msk.bf16.vlgmr.msra.gmra.mrb[32].mxu0 %vm61_vm1, %v663_v45 }
 0x537   :  { %v659_v53 = vmax.f32 %v645_v50, 0.0  ;;  %1157 = vmatprep.mubr.msk.bf16.mxu0 %vm1252_vm0, %v1251_v3 }
 0x539   :  { %v665_v54 = vpack.c.bf16 %v659_v53, %v658_v52 }
 0x53a   :  { %v649_v55 = vpop.f32.mrb[28].mxu1 }
 0x53b   :  { %1150 = vmatpush3.bf16.msra.mxu1 %v665_v54  ;;  %v650_v56 = vadd.f32 %v942_v30, %v649_v55  ;;  %v1141_v57 = vpop.f32.mrb[29].mxu1 }
 0x53c   :  { %1168 = vmatprep.subr.bf16.mxu1 %v1253_v58  ;;  %v652_v59 = vpop.f32.mrb[30].mxu1 }
 0x53d   :  { %v653_v60 = vadd.f32 %v942_v30, %v652_v59  ;;  %v1142_v61 = vpop.f32.mrb[31].mxu1  ;;  %v660_v62 = vmax.f32 %v650_v56, 0.0 }
 0x53e   :  { %1152 = vmatmul.mubr.msk.bf16.vlgmr.msra.gmra.mrb[32].mxu1 %vm61_vm1, %v663_v45 }
 0x53f   :  { %v661_v63 = vmax.f32 %v653_v60, 0.0  ;;  %1165 = vmatprep.mubr.msk.f32.mxu1 %vm1252_vm0, %v1251_v3 }
 0x541   :  { %v666_v0 = vpack.c.bf16 %v661_v63, %v660_v62 }
 0x543   :  { %1156 = vmatpush3.bf16.msra.mxu0 %v666_v0 }
 0x544   :  { %1170 = vmatpush3.bf16.xpose.msra.mxu1 %v664_v43 }
 0x546   :  { %1158 = vmatmul.mubr.msk.bf16.vlgmr.msra.gmra.mrb[36].mxu0 %vm61_vm1, %v663_v45 }
 0x54b   :  { %1166 = vmatmul.mubr.f32.vlgmr.msra.gmra.mrb[36].mxu1 %v793_v31 }
 0x5be   :  { %v803_v1 = vpop.xlane.xlu0 %802 }
 0x5bf   :  { %1177 = vtanh.f32 %v803_v1 }
 0x5c2   :  { %v805_v2 = vpop.xlane.xlu0 %804 }
 0x5c3   :  { %1179 = vtanh.f32 %v805_v2 }
 0x5c9   :  { %v1178_v4 = vpop.eup %1177 }
 0x5ca   :  { %v808_v5 = vmul.f32 %v1178_v4, %v656_v37 }
 0x5cc   :  { %810 = vst [vmem:[%s1734_s17] sm:$0xff] %v808_v5 }
 0x5cd   :  { %v1180_v6 = vpop.eup %1179 }
 0x5ce   :  { %v809_v7 = vmul.f32 %v1180_v6, %v657_v40 }
 0x5d0   :  { %811 = vst [vmem:[%s1734_s17 + $0x8] sm:$0xff] %v809_v7 }
 0x609   :  { %v704_v3 = vpop.f32.mrb[32].mxu0 }
 0x60a   :  { %710 = vst [vmem:[#allocation3] sm:$0x3] %v704_v3  ;;  %v1147_v9 = vpop.f32.mrb[33].mxu0 }
 0x60b   :  { %v707_v10 = vpop.f32.mrb[34].mxu0 }
 0x60c   :  { %1192 = shalt.err (!%p1189_p4)
}
 0x60d   :  { %s1193_s26 = scalar_lea.hbm %s1731_s14, 32 }
 0x60e   :  { %p1194_p5 = scmp.ne.s32.totalorder %s1731_s14, %s1193_s26  ;;  %p1197_p6 = scmp.lt.u32.totalorder %s1193_s26, %s1731_s14 }
 0x610   :  { %p1199_p7 = pnand %p1197_p6, %p1194_p5 }
 0x612   :  { %1202 = shalt.err (!%p1199_p7)
}
 0x613   :  { %893 = dma.vmem_to_hbm [thread:$0]  %s891_s2, 32, %s1731_s14, [#allocation4]   ;;  %v1148_v11 = vpop.f32.mrb[35].mxu0  ;;  %v745_v12 = vpop.f32.mrb[32].mxu1 }
 0x614   :  { %s1255_s9 = smov [#allocation5]   ;;  %751 = vst [vmem:[#allocation5] sm:$0x3] %v745_v12  ;;  %v1153_v13 = vpop.f32.mrb[33].mxu1 }
 0x615   :  { %s900_s8 = sshll.u32 %s1255_s9, 4  ;;  %v748_v14 = vpop.f32.mrb[34].mxu1  ;;  %s901_s8 = int_to_ptr.vmem [resolvable:$true] %s900_s8 }
 0x616   :  { %s1203_s30 = scalar_lea.vmem %s901_s8, 32  ;;  %p1208_p9 = scmp.lt.s32.totalorder %s901_s8, %s901_s8 }
 0x617   :  { %p1204_p8 = scmp.ne.s32.totalorder %s901_s8, %s1203_s30  ;;  %p1209_p10 = scmp.lt.s32.totalorder %s1203_s30, %s1203_s30 }
 0x619   :  { %p1210_p11 = por %p1209_p10, %p1208_p9 }
 0x61b   :  { %p1211_p12 = pnand %p1210_p11, %p1204_p8 }
 0x61d   :  { %1214 = shalt.err (!%p1211_p12)
}
 0x61e   :  { %s1215_s10 = scalar_lea.hbm %s1732_s15, 32 }
 0x61f   :  { %p1216_p13 = scmp.ne.s32.totalorder %s1732_s15, %s1215_s10  ;;  %p1219_p0 = scmp.lt.u32.totalorder %s1215_s10, %s1732_s15 }
 0x621   :  { %p1221_p1 = pnand %p1219_p0, %p1216_p13 }
 0x623   :  { %1224 = shalt.err (!%p1221_p1)
}
 0x624   :  { %903 = dma.vmem_to_hbm [thread:$0]  %s901_s8, 32, %s1732_s15, [#allocation6]   ;;  %v1154_v8 = vpop.f32.mrb[35].mxu1  ;;  %v786_v15 = vpop.f32.mrb[36].mxu0 }
 0x625   :  { %s1256_s4 = smov [#allocation7]   ;;  %792 = vst [vmem:[#allocation7] sm:$0x3] %v786_v15  ;;  %v1159_v16 = vpop.f32.mrb[37].mxu0 }
 0x626   :  { %s910_s12 = sshll.u32 %s1256_s4, 4  ;;  %v789_v17 = vpop.f32.mrb[38].mxu0  ;;  %s911_s12 = int_to_ptr.vmem [resolvable:$true] %s910_s12 }
 0x627   :  { %s1225_s13 = scalar_lea.vmem %s911_s12, 32  ;;  %p1230_p3 = scmp.lt.s32.totalorder %s911_s12, %s911_s12 }
 0x628   :  { %p1226_p2 = scmp.ne.s32.totalorder %s911_s12, %s1225_s13  ;;  %p1231_p4 = scmp.lt.s32.totalorder %s1225_s13, %s1225_s13 }
 0x62a   :  { %p1232_p5 = por %p1231_p4, %p1230_p3 }
 0x62c   :  { %p1233_p6 = pnand %p1232_p5, %p1226_p2 }
 0x62e   :  { %1236 = shalt.err (!%p1233_p6)
}
 0x62f   :  { %s1237_s2 = scalar_lea.hbm %s1733_s16, 32 }
 0x630   :  { %p1238_p7 = scmp.ne.s32.totalorder %s1733_s16, %s1237_s2  ;;  %p1241_p8 = scmp.lt.u32.totalorder %s1237_s2, %s1733_s16 }
 0x632   :  { %p1243_p9 = pnand %p1241_p8, %p1238_p7 }
 0x634   :  { %1246 = shalt.err (!%p1243_p9)
}
 0x635   :  { %913 = dma.vmem_to_hbm [thread:$0]  %s911_s12, 32, %s1733_s16, [#allocation6]   ;;  %v1160_v18 = vpop.f32.mrb[39].mxu0  ;;  %vm882_vm2 = vcmask 122880   ;;  %v878_v19 = vpop.f32.mrb[36].mxu1 }
 0x636   :  { %883 = vst.msk [vmem:[%s1735_s18] sm:$0x1] %vm882_vm2, %v878_v19  ;;  %v1167_v20 = vpop.f32.mrb[37].mxu1 }
 0x637   :  { %1247 = dma.done.wait [#allocation4], 32  }
 0x638   :  { %1248 = vsyncadd [#allocation4], 4294967264 }
 0x639   :  { %1249 = dma.done.wait [#allocation6], 64  }
 0x63a   :  { %1250 = vsyncadd [#allocation6], 4294967232 }
 0x63b   :  { %931 = vsyncpa [#allocation4], 1 }
 0x63c   :  { %932 = vsyncpa [#allocation6], 1 }

// kernel: hdgcl_forward.5
= control target key start
LH: loop header
LB: loop body
LE: loop exit
PB: predicated region body
PF: predicated region fallthrough
CT: control target
= control target key end

     0   :  { %s1664_s0 = inlined_call_operand.vmem [shape: f32[8,8], index: 0, kind: input, shape index: {}]   ;;  %s1665_s1 = inlined_call_operand.vmem [shape: f32[8,128], index: 1, kind: input, shape index: {}]   ;;  %s1666_s2 = inlined_call_operand.vmem [shape: f32[1,128], index: 2, kind: input, shape index: {}]   ;;  %s1667_s3 = inlined_call_operand.vmem [shape: f32[1,128], index: 3, kind: input, shape index: {}]   ;;  %s1668_s4 = inlined_call_operand.vmem [shape: f32[2,8], index: 4, kind: input, shape index: {}]   ;;  %s1669_s5 = inlined_call_operand.vmem [shape: f32[128,128], index: 5, kind: input, shape index: {}]   ;;  %s1670_s6 = inlined_call_operand.vmem [shape: f32[1,128], index: 6, kind: input, shape index: {}]   ;;  %s1671_s7 = inlined_call_operand.vmem [shape: f32[128,128], index: 7, kind: input, shape index: {}]   ;;  %s1672_s8 = inlined_call_operand.vmem [shape: f32[1,128], index: 8, kind: input, shape index: {}]   ;;  %s1673_s9 = inlined_call_operand.vmem [shape: f32[128,128], index: 9, kind: input, shape index: {}]   ;;  %s1674_s10 = inlined_call_operand.vmem [shape: f32[1,128], index: 10, kind: input, shape index: {}]   ;;  %s1675_s11 = inlined_call_operand.vmem [shape: f32[128,128], index: 11, kind: input, shape index: {}]   ;;  %s1676_s12 = inlined_call_operand.vmem [shape: f32[1,128], index: 12, kind: input, shape index: {}]   ;;  %s1677_s13 = inlined_call_operand.vmem [shape: f32[1,128], index: 13, kind: input, shape index: {}]   ;;  %s1678_s14 = inlined_call_operand.hbm [shape: f32[2,128], index: 14, kind: output, shape index: {0}]   ;;  %s1679_s15 = inlined_call_operand.hbm [shape: f32[2,128], index: 15, kind: output, shape index: {1}]   ;;  %s1680_s16 = inlined_call_operand.hbm [shape: f32[2,128], index: 16, kind: output, shape index: {2}]   ;;  %s1681_s17 = inlined_call_operand.hbm [shape: f32[8,128], index: 17, kind: output, shape index: {3}]   ;;  %s1682_s18 = inlined_call_operand.hbm [shape: f32[1,8], index: 18, kind: output, shape index: {4}]  }
   0x1   :  { %1683 = sst [smem:[#allocation14_spill]] %s1664_s0 }
   0x2   :  { %1684 = sst [smem:[#allocation15_spill]] %s1665_s1 }
   0x3   :  { %1685 = sst [smem:[#allocation16_spill]] %s1666_s2 }
   0x4   :  { %24 = vsyncpa [#allocation4], 0 }
   0x5   :  { %25 = vsyncpa [#allocation6], 0  ;;  %s1686_s29 = sld [smem:[#allocation15_spill]]  ;;  %vm64_vm0 = vcmask 1043456   ;;  %s1687_s19 = sld [smem:[#allocation14_spill]]  ;;  %v1220_v2 = vmov 0.0  }
   0x6   :  { %968 = vmatprep.subr.bf16.mxu0 %v1220_v2  ;;  %vm1221_vm1 = vmmov 0   ;;  %v132_v4 = vld [vmem:[%s1669_s5] sm:$0xff]  ;;  %v133_v5 = vld [vmem:[%s1669_s5 + $0x8] sm:$0xff]  ;;  %v134_v6 = vld [vmem:[%s1669_s5 + $0x10] sm:$0xff]  ;;  %vm60_vm2 = vcmask 64512  }
   0x7   :  { %970 = vmatprep.mubr.msk.bf16.mxu0 %vm1221_vm1, %v1220_v2  ;;  %v148_v7 = vpack.c.bf16 %v133_v5, %v132_v4  ;;  %v135_v8 = vld [vmem:[%s1669_s5 + $0x18] sm:$0xff]  ;;  %v136_v12 = vld [vmem:[%s1669_s5 + $0x20] sm:$0xff]  ;;  %v137_v13 = vld [vmem:[%s1669_s5 + $0x28] sm:$0xff] }
   0x8   :  { %v149_v11 = vpack.c.bf16 %v135_v8, %v134_v6 }
   0x9   :  { %974 = vmatprep.subr.bf16.mxu1 %v148_v7 }
   0xa   :  { %975 = vmatpush3.bf16.msra.mxu1 %v148_v7 }
   0xb   :  { %v58_v0 = vld [vmem:[%s1686_s29] sm:$0xff] }
   0xc   :  { %v56_v1 = vld [vmem:[%s1687_s19] sm:$0xff]  ;;  %v59_v3 = vpack.c.bf16 %v58_v0, %v58_v0 }
   0xd   :  { %v1344_v10 = vpack.c.bf16 %v56_v1, %v56_v1 }
   0xe   :  { %v66_v9 = vsel %vm64_vm0, %v59_v3, 0 }
   0xf   :  { %969 = vmatpush3.bf16.msra.mxu0 %v66_v9 }
  0x10   :  { %26 = vsyncpa [#allocation9], 0  ;;  %976 = vmatprep.subr.bf16.mxu1 %v149_v11  ;;  %v150_v14 = vpack.c.bf16 %v137_v13, %v136_v12  ;;  %v138_v15 = vld [vmem:[%s1669_s5 + $0x30] sm:$0xff]  ;;  %v139_v16 = vld [vmem:[%s1669_s5 + $0x38] sm:$0xff]  ;;  %s1688_s0 = sld [smem:[#allocation16_spill]] }
  0x11   :  { %977 = vmatpush3.bf16.msra.mxu1 %v149_v11  ;;  %v151_v17 = vpack.c.bf16 %v139_v16, %v138_v15  ;;  %v140_v18 = vld [vmem:[%s1669_s5 + $0x40] sm:$0xff]  ;;  %v141_v19 = vld [vmem:[%s1669_s5 + $0x48] sm:$0xff]  ;;  %v142_v21 = vld [vmem:[%s1669_s5 + $0x50] sm:$0xff] }
  0x12   :  { %971 = vmatmul.mubr.msk.bf16.vlgmr.msra.gmra.mrb[0].mxu0 %vm60_vm2, %v1344_v10  ;;  %978 = vmatprep.subr.bf16.mxu1 %v150_v14  ;;  %v152_v20 = vpack.c.bf16 %v141_v19, %v140_v18  ;;  %v143_v22 = vld [vmem:[%s1669_s5 + $0x58] sm:$0xff]  ;;  %v144_v24 = vld [vmem:[%s1669_s5 + $0x60] sm:$0xff]  ;;  %v145_v25 = vld [vmem:[%s1669_s5 + $0x68] sm:$0xff] }
  0x13   :  { %v153_v23 = vpack.c.bf16 %v143_v22, %v142_v21  ;;  %v154_v26 = vpack.c.bf16 %v145_v25, %v144_v24  ;;  %v146_v27 = vld [vmem:[%s1669_s5 + $0x70] sm:$0xff]  ;;  %v147_v28 = vld [vmem:[%s1669_s5 + $0x78] sm:$0xff]  ;;  %v216_v30 = vld [vmem:[%s1671_s7] sm:$0xff] }
  0x14   :  { %v155_v29 = vpack.c.bf16 %v147_v28, %v146_v27  ;;  %v217_v31 = vld [vmem:[%s1671_s7 + $0x8] sm:$0xff]  ;;  %v218_v32 = vld [vmem:[%s1671_s7 + $0x10] sm:$0xff]  ;;  %v219_v34 = vld [vmem:[%s1671_s7 + $0x18] sm:$0xff] }
  0x15   :  { %979 = vmatpush3.bf16.msra.mxu1 %v150_v14  ;;  %v232_v33 = vpack.c.bf16 %v217_v31, %v216_v30  ;;  %v233_v35 = vpack.c.bf16 %v219_v34, %v218_v32  ;;  %v220_v36 = vld [vmem:[%s1671_s7 + $0x20] sm:$0xff]  ;;  %v221_v37 = vld [vmem:[%s1671_s7 + $0x28] sm:$0xff]  ;;  %v222_v39 = vld [vmem:[%s1671_s7 + $0x30] sm:$0xff] }
  0x16   :  { %980 = vmatprep.subr.bf16.mxu1 %v151_v17  ;;  %v234_v38 = vpack.c.bf16 %v221_v37, %v220_v36  ;;  %v223_v40 = vld [vmem:[%s1671_s7 + $0x38] sm:$0xff]  ;;  %v224_v42 = vld [vmem:[%s1671_s7 + $0x40] sm:$0xff]  ;;  %v225_v43 = vld [vmem:[%s1671_s7 + $0x48] sm:$0xff] }
  0x17   :  { %994 = vmatprep.subr.bf16.mxu0 %v232_v33  ;;  %v235_v41 = vpack.c.bf16 %v223_v40, %v222_v39  ;;  %v236_v44 = vpack.c.bf16 %v225_v43, %v224_v42  ;;  %v226_v45 = vld [vmem:[%s1671_s7 + $0x50] sm:$0xff]  ;;  %v227_v46 = vld [vmem:[%s1671_s7 + $0x58] sm:$0xff]  ;;  %v901_v48 = vld [vmem:[%s1667_s3] ss:$0 sm:$0xff] }
  0x18   :  { %995 = vmatpush3.bf16.msra.mxu0 %v232_v33  ;;  %v237_v47 = vpack.c.bf16 %v227_v46, %v226_v45  ;;  %v900_v49 = vld [vmem:[%s1688_s0] ss:$0 sm:$0xff]  ;;  %v229_v59 = vld [vmem:[%s1671_s7 + $0x68] sm:$0xff]  ;;  %v230_v61 = vld [vmem:[%s1671_s7 + $0x70] sm:$0xff] }
  0x19   :  { %981 = vmatpush3.bf16.msra.mxu1 %v151_v17  ;;  %996 = vmatprep.subr.bf16.mxu0 %v233_v35  ;;  %v228_v58 = vld [vmem:[%s1671_s7 + $0x60] sm:$0xff]  ;;  %v231_v62 = vld [vmem:[%s1671_s7 + $0x78] sm:$0xff]  ;;  %v440_v27 = vld [vmem:[%s1673_s9 + $0x8] sm:$0xff] }
  0x1a   :  { %982 = vmatprep.subr.bf16.mxu1 %v152_v20  ;;  %v238_v60 = vpack.c.bf16 %v229_v59, %v228_v58  ;;  %v239_v63 = vpack.c.bf16 %v231_v62, %v230_v61  ;;  %v902_v0 = vld [vmem:[%s1670_s6] ss:$0 sm:$0xff]  ;;  %v441_v33 = vld [vmem:[%s1673_s9 + $0x10] sm:$0xff]  ;;  %v442_v34 = vld [vmem:[%s1673_s9 + $0x18] sm:$0xff] }
  0x1b   :  { %v903_v15 = vld [vmem:[%s1672_s8] ss:$0 sm:$0xff]  ;;  %v456_v37 = vpack.c.bf16 %v442_v34, %v441_v33  ;;  %v444_v39 = vld [vmem:[%s1673_s9 + $0x28] sm:$0xff]  ;;  %v446_v42 = vld [vmem:[%s1673_s9 + $0x38] sm:$0xff] }
  0x1c   :  { %997 = vmatpush3.bf16.msra.mxu0 %v233_v35  ;;  %v448_v45 = vld [vmem:[%s1673_s9 + $0x48] sm:$0xff]  ;;  %v526_v59 = vld [vmem:[%s1675_s11 + $0x18] sm:$0xff]  ;;  %v527_v61 = vld [vmem:[%s1675_s11 + $0x20] sm:$0xff] }
  0x1d   :  { %983 = vmatpush3.bf16.msra.mxu1 %v152_v20  ;;  %998 = vmatprep.subr.bf16.mxu0 %v234_v38  ;;  %v528_v62 = vld [vmem:[%s1675_s11 + $0x28] sm:$0xff] }
  0x1e   :  { %984 = vmatprep.subr.bf16.mxu1 %v153_v23 }
  0x20   :  { %999 = vmatpush3.bf16.msra.mxu0 %v234_v38  ;;  %v443_v38 = vld [vmem:[%s1673_s9 + $0x20] sm:$0xff] }
  0x21   :  { %985 = vmatpush3.bf16.msra.mxu1 %v153_v23  ;;  %1000 = vmatprep.subr.bf16.mxu0 %v235_v41  ;;  %v457_v40 = vpack.c.bf16 %v444_v39, %v443_v38 }
  0x22   :  { %986 = vmatprep.subr.bf16.mxu1 %v154_v26 }
  0x24   :  { %1001 = vmatpush3.bf16.msra.mxu0 %v235_v41  ;;  %v445_v41 = vld [vmem:[%s1673_s9 + $0x30] sm:$0xff] }
  0x25   :  { %987 = vmatpush3.bf16.msra.mxu1 %v154_v26  ;;  %1002 = vmatprep.subr.bf16.mxu0 %v236_v44  ;;  %v439_v26 = vld [vmem:[%s1673_s9] sm:$0xff]  ;;  %v458_v43 = vpack.c.bf16 %v446_v42, %v445_v41 }
  0x26   :  { %988 = vmatprep.subr.bf16.mxu1 %v155_v29  ;;  %v455_v32 = vpack.c.bf16 %v440_v27, %v439_v26  ;;  %v536_v26 = vld [vmem:[%s1675_s11 + $0x68] sm:$0xff] }
  0x28   :  { %1003 = vmatpush3.bf16.msra.mxu0 %v236_v44  ;;  %v447_v44 = vld [vmem:[%s1673_s9 + $0x40] sm:$0xff] }
  0x29   :  { %989 = vmatpush3.bf16.msra.mxu1 %v155_v29  ;;  %1004 = vmatprep.subr.bf16.mxu0 %v237_v47  ;;  %v459_v46 = vpack.c.bf16 %v448_v45, %v447_v44  ;;  %v748_v44 = vlaneseq }
  0x2a   :  { %1014 = vmatprep.subr.bf16.mxu1 %v1220_v2 }
  0x2b   :  { %v749_v45 = vshrl.u32 %v748_v44, 7 }
  0x2c   :  { %1005 = vmatpush3.bf16.msra.mxu0 %v237_v47  ;;  %v449_v47 = vld [vmem:[%s1673_s9 + $0x50] sm:$0xff] }
  0x2d   :  { %1006 = vmatprep.subr.bf16.mxu0 %v238_v60 }
  0x30   :  { %1007 = vmatpush3.bf16.msra.mxu0 %v238_v60 }
  0x31   :  { %1008 = vmatprep.subr.bf16.mxu0 %v239_v63 }
  0x34   :  { %1009 = vmatpush3.bf16.msra.mxu0 %v239_v63  ;;  %v541_v63 = vpack.c.bf16 %v528_v62, %v527_v61 }
  0x35   :  { %1020 = vmatprep.subr.bf16.mxu0 %v1220_v2 }
  0xe5   :  { %v102_v50 = vpop.f32.mrb[0].mxu0 }
  0xe6   :  { %v125_v51 = vmul.f32 %v901_v48, %v102_v50  ;;  %v972_v52 = vpop.f32.mrb[1].mxu0  ;;  %v116_v53 = vmul.f32 %v900_v49, %v102_v50  ;;  %v451_v49 = vld [vmem:[%s1673_s9 + $0x60] sm:$0xff] }
  0xe7   :  { %v105_v54 = vpop.f32.mrb[2].mxu0  ;;  %v453_v52 = vld [vmem:[%s1673_s9 + $0x70] sm:$0xff] }
  0xe8   :  { %v973_v55 = vpop.f32.mrb[3].mxu0  ;;  %v130_v56 = vpack.c.bf16 %v116_v53, %v102_v50  ;;  %v131_v57 = vpack.c.bf16 %v125_v51, %v125_v51  ;;  %v452_v50 = vld [vmem:[%s1673_s9 + $0x68] sm:$0xff]  ;;  %v454_v53 = vld [vmem:[%s1673_s9 + $0x78] sm:$0xff] }
  0xe9   :  { %v461_v51 = vpack.c.bf16 %v452_v50, %v451_v49  ;;  %v462_v54 = vpack.c.bf16 %v454_v53, %v453_v52  ;;  %v523_v55 = vld [vmem:[%s1675_s11] sm:$0xff] }
  0xea   :  { %990 = vmatprep.mubr.bf16.mxu1 %v130_v56  ;;  %v524_v56 = vld [vmem:[%s1675_s11 + $0x8] sm:$0xff] }
  0xeb   :  { %991 = vmatmul.mubr.bf16.vlgmr.msra.gmra.mrb[0].mxu1 %v131_v57  ;;  %v525_v57 = vld [vmem:[%s1675_s11 + $0x10] sm:$0xff]  ;;  %v539_v58 = vpack.c.bf16 %v524_v56, %v523_v55 }
  0xec   :  { %1016 = vmatprep.mubr.msk.bf16.mxu1 %vm1221_vm1, %v1220_v2  ;;  %v540_v60 = vpack.c.bf16 %v526_v59, %v525_v57 }
 0x1be   :  { %v992_v1 = vpop.f32.mrb[0].mxu1 }
 0x1bf   :  { %v206_v3 = vadd.f32 %v992_v1, %v902_v0  ;;  %v197_v4 = vpop.f32.mrb[1].mxu1  ;;  %v530_v1 = vld [vmem:[%s1675_s11 + $0x38] sm:$0xff] }
 0x1c0   :  { %v198_v5 = vadd.f32 %v902_v0, %v197_v4  ;;  %v993_v6 = vpop.f32.mrb[2].mxu1  ;;  %v531_v4 = vld [vmem:[%s1675_s11 + $0x40] sm:$0xff] }
 0x1c1   :  { %v200_v7 = vpop.f32.mrb[3].mxu1  ;;  %v213_v9 = vmax.f32 %v206_v3, 0.0 }
 0x1c2   :  { %v201_v8 = vadd.f32 %v902_v0, %v200_v7  ;;  %v211_v11 = vmax.f32 %v198_v5, 0.0  ;;  %v529_v0 = vld [vmem:[%s1675_s11 + $0x30] sm:$0xff]  ;;  %v532_v5 = vld [vmem:[%s1675_s11 + $0x48] sm:$0xff] }
 0x1c3   :  { %v215_v14 = vpack.c.bf16 %v213_v9, %v213_v9  ;;  %v542_v3 = vpack.c.bf16 %v530_v1, %v529_v0  ;;  %v543_v6 = vpack.c.bf16 %v532_v5, %v531_v4  ;;  %v533_v7 = vld [vmem:[%s1675_s11 + $0x50] sm:$0xff] }
 0x1c4   :  { %v212_v12 = vmax.f32 %v201_v8, 0.0  ;;  %v534_v8 = vld [vmem:[%s1675_s11 + $0x58] sm:$0xff] }
 0x1c5   :  { %v544_v9 = vpack.c.bf16 %v534_v8, %v533_v7 }
 0x1c6   :  { %v214_v13 = vpack.c.bf16 %v212_v12, %v211_v11 }
 0x1c8   :  { %1010 = vmatprep.mubr.bf16.mxu0 %v214_v13 }
 0x1c9   :  { %1011 = vmatmul.mubr.bf16.vlgmr.msra.gmra.mrb[4].mxu0 %v215_v14 }
 0x1ca   :  { %1022 = vmatprep.mubr.msk.bf16.mxu0 %vm1221_vm1, %v1220_v2 }
 0x29c   :  { %v1012_v16 = vpop.f32.mrb[4].mxu0 }
 0x29d   :  { %v281_v17 = vpop.f32.mrb[5].mxu0  ;;  %v290_v18 = vadd.f32 %v1012_v16, %v903_v15 }
 0x29e   :  { %v282_v19 = vadd.f32 %v903_v15, %v281_v17  ;;  %v1013_v20 = vpop.f32.mrb[6].mxu0 }
 0x29f   :  { %v284_v21 = vpop.f32.mrb[7].mxu0  ;;  %v297_v23 = vmax.f32 %v290_v18, 0.0 }
 0x2a0   :  { %v285_v22 = vadd.f32 %v903_v15, %v284_v21  ;;  %v295_v24 = vmax.f32 %v282_v19, 0.0 }
 0x2a1   :  { %v299_v29 = vpack.c.bf16 %v297_v23, %v297_v23 }
 0x2a2   :  { %v296_v25 = vmax.f32 %v285_v22, 0.0 }
 0x2a3   :  { %v391_v36 = vsel %vm64_vm0, %v299_v29, 0  ;;  %v538_v29 = vld [vmem:[%s1675_s11 + $0x78] sm:$0xff] }
 0x2a4   :  { %v298_v28 = vpack.c.bf16 %v296_v25, %v295_v24  ;;  %v535_v25 = vld [vmem:[%s1675_s11 + $0x60] sm:$0xff] }
 0x2a5   :  { %v545_v27 = vpack.c.bf16 %v536_v26, %v535_v25 }
 0x2a6   :  { %v345_v30 = vrot.slane %v298_v28, 4  ;;  %v301_v31 = vsel %vm64_vm0, %v298_v28, 0  ;;  %v537_v28 = vld [vmem:[%s1675_s11 + $0x70] sm:$0xff] }
 0x2a7   :  { %1015 = vmatpush3.bf16.msra.mxu1 %v301_v31  ;;  %v907_v31 = vld [vmem:[%s1674_s10] ss:$0 sm:$0xff] }
 0x2a8   :  { %v347_v35 = vsel %vm64_vm0, %v345_v30, 0  ;;  %1026 = vmatprep.subr.bf16.mxu1 %v1220_v2  ;;  %v546_v30 = vpack.c.bf16 %v538_v29, %v537_v28 }
 0x2a9   :  { %1021 = vmatpush3.bf16.msra.mxu0 %v347_v35 }
 0x2aa   :  { %1017 = vmatmul.mubr.msk.bf16.vlgmr.msra.gmra.mrb[4].mxu1 %vm60_vm2, %v1344_v10  ;;  %1032 = vmatprep.subr.bf16.mxu0 %v455_v32 }
 0x2ab   :  { %1027 = vmatpush3.bf16.msra.mxu1 %v391_v36  ;;  %1028 = vmatprep.mubr.msk.bf16.mxu1 %vm1221_vm1, %v1220_v2 }
 0x2ac   :  { %1023 = vmatmul.mubr.msk.bf16.vlgmr.msra.gmra.mrb[8].mxu0 %vm60_vm2, %v1344_v10  ;;  %1052 = vmatprep.subr.bf16.mxu1 %v539_v58 }
 0x2ad   :  { %1033 = vmatpush3.bf16.msra.mxu0 %v455_v32 }
 0x2ae   :  { %1034 = vmatprep.subr.bf16.mxu0 %v456_v37 }
 0x2b1   :  { %1035 = vmatpush3.bf16.msra.mxu0 %v456_v37 }
 0x2b2   :  { %1029 = vmatmul.mubr.msk.bf16.vlgmr.msra.gmra.mrb[8].mxu1 %vm60_vm2, %v1344_v10  ;;  %1036 = vmatprep.subr.bf16.mxu0 %v457_v40  ;;  %v450_v10 = vld [vmem:[%s1673_s9 + $0x58] sm:$0xff] }
 0x2b3   :  { %v460_v48 = vpack.c.bf16 %v450_v10, %v449_v47  ;;  %1053 = vmatpush3.bf16.msra.mxu1 %v539_v58  ;;  %v908_v47 = vld [vmem:[%s1676_s12] ss:$0 sm:$0xff] }
 0x2b4   :  { %1054 = vmatprep.subr.bf16.mxu1 %v540_v60  ;;  %v746_v10 = vld [vmem:[%s1677_s13] sm:$0x1] }
 0x2b5   :  { %1037 = vmatpush3.bf16.msra.mxu0 %v457_v40 }
 0x2b6   :  { %1038 = vmatprep.subr.bf16.mxu0 %v458_v43 }
 0x2b7   :  { %1055 = vmatpush3.bf16.msra.mxu1 %v540_v60  ;;  %v605_v60 = vld [vmem:[%s1668_s4] sm:$0x3]  ;;  %s1222_s4 = smov [#allocation8]  }
 0x2b8   :  { %1056 = vmatprep.subr.bf16.mxu1 %v541_v63  ;;  %v606_v1 = vpack.c.bf16 %v605_v60, %v605_v60  ;;  %s867_s12 = sshll.u32 %s1222_s4, 4  ;;  %s868_s12 = int_to_ptr.vmem [resolvable:$true] %s867_s12 }
 0x2b9   :  { %1039 = vmatpush3.bf16.msra.mxu0 %v458_v43  ;;  %s1104_s13 = scalar_lea.vmem %s868_s12, 128  ;;  %p1109_p1 = scmp.lt.s32.totalorder %s868_s12, %s868_s12 }
 0x2ba   :  { %1040 = vmatprep.subr.bf16.mxu0 %v459_v46  ;;  %p1105_p0 = scmp.ne.s32.totalorder %s868_s12, %s1104_s13  ;;  %p1110_p2 = scmp.lt.s32.totalorder %s1104_s13, %s1104_s13 }
 0x2bb   :  { %1057 = vmatpush3.bf16.msra.mxu1 %v541_v63 }
 0x2bc   :  { %1058 = vmatprep.subr.bf16.mxu1 %v542_v3  ;;  %p1111_p3 = por %p1110_p2, %p1109_p1 }
 0x2bd   :  { %1041 = vmatpush3.bf16.msra.mxu0 %v459_v46  ;;  %v750_v46 = vsub.s32 0, %v749_v45 }
 0x2be   :  { %1042 = vmatprep.subr.bf16.mxu0 %v460_v48  ;;  %p1112_p4 = pnand %p1111_p3, %p1105_p0 }
 0x2bf   :  { %1059 = vmatpush3.bf16.msra.mxu1 %v542_v3  ;;  %v751_v53 = vrot.slane %v746_v10, %v750_v46 }
 0x2c0   :  { %1060 = vmatprep.subr.bf16.mxu1 %v543_v6 }
 0x2c1   :  { %1043 = vmatpush3.bf16.msra.mxu0 %v460_v48 }
 0x2c2   :  { %1044 = vmatprep.subr.bf16.mxu0 %v461_v51 }
 0x2c3   :  { %1061 = vmatpush3.bf16.msra.mxu1 %v543_v6 }
 0x2c4   :  { %1062 = vmatprep.subr.bf16.mxu1 %v544_v9 }
 0x2c5   :  { %1045 = vmatpush3.bf16.msra.mxu0 %v461_v51 }
 0x2c6   :  { %1046 = vmatprep.subr.bf16.mxu0 %v462_v54 }
 0x2c7   :  { %1063 = vmatpush3.bf16.msra.mxu1 %v544_v9 }
 0x2c8   :  { %1064 = vmatprep.subr.bf16.mxu1 %v545_v27 }
 0x2c9   :  { %1047 = vmatpush3.bf16.msra.mxu0 %v462_v54 }
 0x2ca   :  { %1072 = vmatprep.subr.bf16.mxu0 %v1220_v2 }
 0x2cb   :  { %1065 = vmatpush3.bf16.msra.mxu1 %v545_v27 }
 0x2cc   :  { %1066 = vmatprep.subr.bf16.mxu1 %v546_v30 }
 0x2cf   :  { %1067 = vmatpush3.bf16.msra.mxu1 %v546_v30 }
 0x2d0   :  { %1078 = vmatprep.subr.bf16.mxu1 %v1220_v2 }
 0x37d   :  { %v337_v11 = vpop.f32.mrb[4].mxu1 }
 0x37e   :  { %v1018_v12 = vpop.f32.mrb[5].mxu1 }
 0x37f   :  { %v340_v13 = vpop.f32.mrb[6].mxu1  ;;  %v383_v14 = vpop.f32.mrb[8].mxu0 }
 0x380   :  { %v437_v15 = vpack.c.bf16 %v383_v14, %v337_v11  ;;  %v1019_v16 = vpop.f32.mrb[7].mxu1  ;;  %v1024_v17 = vpop.f32.mrb[9].mxu0 }
 0x381   :  { %v386_v18 = vpop.f32.mrb[10].mxu0 }
 0x382   :  { %1048 = vmatprep.mubr.bf16.mxu0 %v437_v15  ;;  %v1025_v19 = vpop.f32.mrb[11].mxu0 }
 0x385   :  { %v427_v20 = vpop.f32.mrb[8].mxu1 }
 0x386   :  { %v438_v21 = vpack.c.bf16 %v427_v20, %v427_v20  ;;  %v1030_v22 = vpop.f32.mrb[9].mxu1 }
 0x387   :  { %v430_v23 = vpop.f32.mrb[10].mxu1 }
 0x388   :  { %v1031_v24 = vpop.f32.mrb[11].mxu1  ;;  %1049 = vmatmul.mubr.bf16.vlgmr.msra.gmra.mrb[12].mxu0 %v438_v21 }
 0x389   :  { %1074 = vmatprep.mubr.msk.bf16.mxu0 %vm1221_vm1, %v1220_v2 }
 0x45b   :  { %v1050_v32 = vpop.f32.mrb[12].mxu0 }
 0x45c   :  { %v513_v33 = vadd.f32 %v1050_v32, %v907_v31  ;;  %v504_v34 = vpop.f32.mrb[13].mxu0 }
 0x45d   :  { %v505_v35 = vadd.f32 %v907_v31, %v504_v34  ;;  %v1051_v36 = vpop.f32.mrb[14].mxu0 }
 0x45e   :  { %v507_v37 = vpop.f32.mrb[15].mxu0  ;;  %v520_v39 = vmax.f32 %v513_v33, 0.0 }
 0x45f   :  { %v508_v38 = vadd.f32 %v907_v31, %v507_v37  ;;  %v518_v40 = vmax.f32 %v505_v35, 0.0 }
 0x460   :  { %v522_v43 = vpack.c.bf16 %v520_v39, %v520_v39 }
 0x461   :  { %v519_v41 = vmax.f32 %v508_v38, 0.0 }
 0x463   :  { %v521_v42 = vpack.c.bf16 %v519_v41, %v518_v40 }
 0x465   :  { %1068 = vmatprep.mubr.bf16.mxu1 %v521_v42 }
 0x466   :  { %1069 = vmatmul.mubr.bf16.vlgmr.msra.gmra.mrb[12].mxu1 %v522_v43 }
 0x467   :  { %1080 = vmatprep.mubr.msk.bf16.mxu1 %vm1221_vm1, %v1220_v2 }
 0x539   :  { %v1070_v48 = vpop.f32.mrb[12].mxu1 }
 0x53a   :  { %v588_v49 = vpop.f32.mrb[13].mxu1  ;;  %v597_v50 = vadd.f32 %v1070_v48, %v908_v47 }
 0x53b   :  { %v589_v51 = vadd.f32 %v908_v47, %v588_v49  ;;  %v1071_v52 = vpop.f32.mrb[14].mxu1 }
 0x53c   :  { %v591_v54 = vpop.f32.mrb[15].mxu1  ;;  %v604_v57 = vmax.f32 %v597_v50, 0.0 }
 0x53d   :  { %v602_v55 = vmax.f32 %v589_v51, 0.0  ;;  %v592_v56 = vadd.f32 %v908_v47, %v591_v54 }
 0x53e   :  { %v608_v62 = vpack.c.bf16 %v604_v57, %v604_v57 }
 0x53f   :  { %v603_v58 = vmax.f32 %v592_v56, 0.0  ;;  %v753_v59 = vmul.f32 %v751_v53, %v602_v55 }
 0x540   :  { %v703_v4 = vsel %vm64_vm0, %v608_v62, 0 }
 0x541   :  { %v607_v61 = vpack.c.bf16 %v603_v58, %v602_v55  ;;  %754 = vadd.xlane.f32.xlu0 %v753_v59 }
 0x543   :  { %v657_v63 = vrot.slane %v607_v61, 4  ;;  %v613_v0 = vsel %vm64_vm0, %v607_v61, 0 }
 0x544   :  { %1073 = vmatpush3.bf16.msra.mxu0 %v613_v0 }
 0x545   :  { %v659_v3 = vsel %vm64_vm0, %v657_v63, 0  ;;  %1084 = vmatprep.subr.bf16.mxu0 %v1220_v2 }
 0x546   :  { %1079 = vmatpush3.bf16.msra.mxu1 %v659_v3 }
 0x547   :  { %1075 = vmatmul.mubr.msk.bf16.vlgmr.msra.gmra.mrb[16].mxu0 %vm60_vm2, %v606_v1  ;;  %1090 = vmatprep.subr.mxu1 %v1220_v2 }
 0x548   :  { %1085 = vmatpush3.bf16.msra.mxu0 %v703_v4  ;;  %1086 = vmatprep.mubr.msk.bf16.mxu0 %vm1221_vm1, %v1220_v2 }
 0x549   :  { %1081 = vmatmul.mubr.msk.bf16.vlgmr.msra.gmra.mrb[16].mxu1 %vm60_vm2, %v606_v1 }
 0x54a   :  { %1092 = vmatprep.mubr.msk.f32.mxu1 %vm1221_vm1, %v1220_v2 }
 0x54f   :  { %1091 = vmatpush3.xpose.msra.mxu1 %v602_v55  ;;  %1087 = vmatmul.mubr.msk.bf16.vlgmr.msra.gmra.mrb[20].mxu0 %vm60_vm2, %v606_v1 }
 0x552   :  { %1093 = vmatmul.mubr.f32.vlgmr.msra.gmra.mrb[20].mxu1 %v746_v10 }
 0x5ce   :  { %v755_v5 = vpop.xlane.xlu0 %754 }
 0x5cf   :  { %1102 = vtanh.f32 %v755_v5 }
 0x5d9   :  { %v1103_v6 = vpop.eup %1102 }
 0x5da   :  { %v757_v7 = vmul.f32 %v1103_v6, %v602_v55 }
 0x5dc   :  { %758 = vst [vmem:[#allocation8] sm:$0xff] %v757_v7 }
 0x5dd   :  { %1115 = shalt.err (!%p1112_p4)
}
 0x5de   :  { %s1116_s3 = scalar_lea.hbm %s1681_s17, 128 }
 0x5df   :  { %p1117_p5 = scmp.ne.s32.totalorder %s1681_s17, %s1116_s3  ;;  %p1120_p6 = scmp.lt.u32.totalorder %s1116_s3, %s1681_s17 }
 0x5e1   :  { %p1122_p7 = pnand %p1120_p6, %p1117_p5 }
 0x5e3   :  { %1125 = shalt.err (!%p1122_p7)
}
 0x5e4   :  { %870 = dma.vmem_to_hbm [thread:$0]  %s868_s12, 128, %s1681_s17, [#allocation9]  }
 0x5e5   :  { %s1223_s25 = smov [#allocation3]   ;;  %s1224_s9 = smov [#allocation5]  }
 0x5e6   :  { %s837_s7 = sshll.u32 %s1223_s25, 4  ;;  %s847_s26 = sshll.u32 %s1224_s9, 4  ;;  %s838_s7 = int_to_ptr.vmem [resolvable:$true] %s837_s7  ;;  %s1600_s26 = int_to_ptr.vmem [resolvable:$true] %s847_s26 }
 0x5e7   :  { %s1126_s6 = scalar_lea.vmem %s838_s7, 32  ;;  %p1131_p9 = scmp.lt.s32.totalorder %s838_s7, %s838_s7 }
 0x5e8   :  { %p1127_p8 = scmp.ne.s32.totalorder %s838_s7, %s1126_s6  ;;  %p1132_p10 = scmp.lt.s32.totalorder %s1126_s6, %s1126_s6 }
 0x5ea   :  { %p1133_p11 = por %p1132_p10, %p1131_p9 }
 0x5ec   :  { %p1134_p12 = pnand %p1133_p11, %p1127_p8 }
 0x61a   :  { %v649_v2 = vpop.f32.mrb[16].mxu0 }
 0x61b   :  { %655 = vst [vmem:[#allocation3] sm:$0x3] %v649_v2  ;;  %v1076_v8 = vpop.f32.mrb[17].mxu0 }
 0x61c   :  { %v695_v9 = vpop.f32.mrb[16].mxu1  ;;  %v652_v11 = vpop.f32.mrb[18].mxu0 }
 0x61d   :  { %1137 = shalt.err (!%p1134_p12)
}
 0x61e   :  { %s1138_s27 = scalar_lea.hbm %s1678_s14, 32 }
 0x61f   :  { %p1139_p13 = scmp.ne.s32.totalorder %s1678_s14, %s1138_s27  ;;  %p1142_p0 = scmp.lt.u32.totalorder %s1138_s27, %s1678_s14 }
 0x621   :  { %p1144_p1 = pnand %p1142_p0, %p1139_p13 }
 0x623   :  { %1147 = shalt.err (!%p1144_p1)
}
 0x624   :  { %840 = dma.vmem_to_hbm [thread:$0]  %s838_s7, 32, %s1678_s14, [#allocation4]   ;;  %701 = vst [vmem:[#allocation5] sm:$0x3] %v695_v9  ;;  %v1082_v12 = vpop.f32.mrb[17].mxu1  ;;  %v1077_v13 = vpop.f32.mrb[19].mxu0 }
 0x625   :  { %s1225_s0 = smov [#allocation7]   ;;  %v698_v14 = vpop.f32.mrb[18].mxu1  ;;  %s1148_s12 = scalar_lea.vmem %s1600_s26, 32 }
 0x626   :  { %s857_s4 = sshll.u32 %s1225_s0, 4  ;;  %p1149_p2 = scmp.ne.s32.totalorder %s1600_s26, %s1148_s12  ;;  %s858_s4 = int_to_ptr.vmem [resolvable:$true] %s857_s4 }
 0x627   :  { %p1153_p3 = scmp.lt.s32.totalorder %s1600_s26, %s1600_s26  ;;  %p1154_p4 = scmp.lt.s32.totalorder %s1148_s12, %s1148_s12 }
 0x629   :  { %p1155_p5 = por %p1154_p4, %p1153_p3 }
 0x62b   :  { %p1156_p6 = pnand %p1155_p5, %p1149_p2 }
 0x62d   :  { %1159 = shalt.err (!%p1156_p6)
}
 0x62e   :  { %s1160_s1 = scalar_lea.hbm %s1679_s15, 32 }
 0x62f   :  { %p1161_p7 = scmp.ne.s32.totalorder %s1679_s15, %s1160_s1  ;;  %p1164_p8 = scmp.lt.u32.totalorder %s1160_s1, %s1679_s15 }
 0x631   :  { %p1166_p9 = pnand %p1164_p8, %p1161_p7 }
 0x633   :  { %1169 = shalt.err (!%p1166_p9)
}
 0x634   :  { %850 = dma.vmem_to_hbm [thread:$0]  %s1600_s26, 32, %s1679_s15, [#allocation6]   ;;  %v1083_v15 = vpop.f32.mrb[19].mxu1  ;;  %v739_v16 = vpop.f32.mrb[20].mxu0  ;;  %vm829_vm3 = vcmask 57344  }
 0x635   :  { %s1226_s23 = smov [#allocation10]   ;;  %745 = vst [vmem:[#allocation7] sm:$0x3] %v739_v16  ;;  %v1088_v17 = vpop.f32.mrb[21].mxu0  ;;  %s1170_s25 = scalar_lea.vmem %s858_s4, 32 }
 0x636   :  { %s877_s24 = sshll.u32 %s1226_s23, 4  ;;  %v742_v18 = vpop.f32.mrb[22].mxu0  ;;  %p1171_p10 = scmp.ne.s32.totalorder %s858_s4, %s1170_s25  ;;  %s1631_s24 = int_to_ptr.vmem [resolvable:$true] %s877_s24 }
 0x637   :  { %p1175_p11 = scmp.lt.s32.totalorder %s858_s4, %s858_s4  ;;  %p1176_p12 = scmp.lt.s32.totalorder %s1170_s25, %s1170_s25 }
 0x639   :  { %p1177_p13 = por %p1176_p12, %p1175_p11 }
 0x63b   :  { %p1178_p0 = pnand %p1177_p13, %p1171_p10 }
 0x63d   :  { %1181 = shalt.err (!%p1178_p0)
}
 0x63e   :  { %s1182_s9 = scalar_lea.hbm %s1680_s16, 32 }
 0x63f   :  { %p1183_p1 = scmp.ne.s32.totalorder %s1680_s16, %s1182_s9  ;;  %p1186_p2 = scmp.lt.u32.totalorder %s1182_s9, %s1680_s16 }
 0x641   :  { %p1188_p3 = pnand %p1186_p2, %p1183_p1 }
 0x643   :  { %1191 = shalt.err (!%p1188_p3)
}
 0x644   :  { %860 = dma.vmem_to_hbm [thread:$0]  %s858_s4, 32, %s1680_s16, [#allocation6]   ;;  %v1089_v19 = vpop.f32.mrb[23].mxu0  ;;  %v825_v20 = vpop.f32.mrb[20].mxu1 }
 0x645   :  { %830 = vst.msk [vmem:[#allocation10] sm:$0x1] %vm829_vm3, %v825_v20  ;;  %v1094_v21 = vpop.f32.mrb[21].mxu1  ;;  %s1192_s10 = scalar_lea.vmem %s1631_s24, 16  ;;  %s1196_s11 = scalar_lea.vmem %s1631_s24, 32 }
 0x646   :  { %p1193_p4 = scmp.ne.s32.totalorder %s1631_s24, %s1192_s10  ;;  %p1197_p5 = scmp.lt.s32.totalorder %s1631_s24, %s1631_s24 }
 0x647   :  { %p1198_p6 = scmp.lt.s32.totalorder %s1196_s11, %s1192_s10 }
 0x649   :  { %p1199_p7 = por %p1198_p6, %p1197_p5 }
 0x64b   :  { %p1200_p8 = pnand %p1199_p7, %p1193_p4 }
 0x64d   :  { %1203 = shalt.err (!%p1200_p8)
}
 0x64e   :  { %s1204_s30 = scalar_lea.hbm %s1682_s18, 16 }
 0x64f   :  { %p1205_p9 = scmp.ne.s32.totalorder %s1682_s18, %s1204_s30  ;;  %p1208_p10 = scmp.lt.u32.totalorder %s1204_s30, %s1682_s18 }
 0x651   :  { %p1210_p11 = pnand %p1208_p10, %p1205_p9 }
 0x653   :  { %1213 = shalt.err (!%p1210_p11)
}
 0x654   :  { %880 = dma.vmem_to_hbm [thread:$0]  %s1631_s24, 16, %s1682_s18, [#allocation9]  }
 0x655   :  { %1214 = dma.done.wait [#allocation4], 32  }
 0x656   :  { %1215 = vsyncadd [#allocation4], 4294967264 }
 0x657   :  { %1216 = dma.done.wait [#allocation6], 64  }
 0x658   :  { %1217 = vsyncadd [#allocation6], 4294967232 }
 0x659   :  { %1218 = dma.done.wait [#allocation9], 144  }
 0x65a   :  { %1219 = vsyncadd [#allocation9], 4294967152 }
 0x65b   :  { %896 = vsyncpa [#allocation4], 1 }
 0x65c   :  { %897 = vsyncpa [#allocation6], 1 }
 0x65d   :  { %898 = vsyncpa [#allocation9], 1 }

</bundles_post_ra>
